<compile_context>
chip_gen: v6e
topology: v6e:2x2x1
jax: 0.10.0
libtpu: 0.0.40
codegen_flags: <defaults>
</compile_context>

<pallas_src>
import jax
import jax.numpy as jnp
from jax.experimental import pallas as pl
from jax.experimental.pallas import tpu as pltpu

_EPS = 1e-5
_K = 4            # ConvTranspose kernel size used by the whole network


def _round_up(x, m):
    return (x + m - 1) // m * m


def _pad_ch(c):
    """Channel padding: multiple of 16 (bf16 packs 2 rows per sublane)."""
    return max(16, _round_up(c, 16))


def _vmem_budget():
    """Per-call VMEM budget derived from the chip (v7x 64MiB, v5e/v6e 128MiB)."""
    try:
        cap = getattr(pltpu.get_tpu_info(), "vmem_capacity_bytes", None)
    except Exception:
        cap = None
    if not cap:
        cap = 64 * 1024 * 1024          # conservative fallback: v7x physical VMEM
    return int(cap) * 3 // 4            # leave headroom for compiler scratch


def _col_tile(nw, m_rows, cap=4096):
    """Tile along GEMM output width Nw: multiple of 128 dividing nw, <= cap."""
    tn = nw
    while tn > cap and tn % 2 == 0 and (tn // 2) % 128 == 0:
        tn //= 2
    # Ensure >=2 grid steps when the M axis alone cannot provide them
    # (keeps both v7x TensorCores busy on the tiny early layers).
    if tn == nw and m_rows <= 1024 and nw >= 512 and (nw // 2) % 128 == 0:
        tn = nw // 2
    return tn


def _row_tile(m, k, tn, budget, cap=1024):
    """Tile along M: multiple of 8, <= cap, per-step working set <= budget."""
    tm = min(cap, _round_up(m, 8))

    def ws(t):   # double-buffered A (f32 upper bound), B (bf16), out (bf16)
        return 2 * t * k * 4 + 2 * k * tn * 2 + 2 * t * tn * 2 + 4 * k * 4

    while tm > 8 and ws(tm) > budget:
        tm = _round_up(tm // 2, 8)
    return tm


# ----------------------------- Pallas kernels -----------------------------

def _matmul_kernel(a_ref, b_ref, o_ref):
    o_ref[...] = jnp.dot(a_ref[...].astype(b_ref.dtype), b_ref[...],
                         preferred_element_type=jnp.float32).astype(o_ref.dtype)


def _matmul_prenorm_relu_kernel(a_ref, s_ref, t_ref, b_ref, o_ref):
    # Fused BatchNorm affine (f32) + ReLU of the previous layer, then bf16 MXU.
    a = jnp.maximum(a_ref[...].astype(jnp.float32) * s_ref[...] + t_ref[...], 0.0)
    o_ref[...] = jnp.dot(a.astype(b_ref.dtype), b_ref[...],
                         preferred_element_type=jnp.float32).astype(o_ref.dtype)


def pallas_matmul(a, b, scale=None, shift=None):
    """a [M, K] (f32/bf16), b [K, Nw] bf16 -> [M, Nw] bf16 (Nw % 128 == 0).

    If scale/shift ([K] f32) are given, relu(a * scale + shift) is applied to
    the A tile on the fly (fused BN + ReLU of the previous layer).  f32 MXU
    accumulation; the result is stored in bf16.
    """
    M, K = a.shape
    Kb, Nw = b.shape
    assert K == Kb and Nw % 128 == 0

    budget = _vmem_budget()
    tn = _col_tile(Nw, M)
    tm = _row_tile(M, K, tn, budget)
    Mp = _round_up(M, tm)                 # robust: pad rows to the tile
    if Mp != M:
        a = jnp.pad(a, ((0, Mp - M), (0, 0)))
    grid = (Mp // tm, Nw // tn)

    a_spec = pl.BlockSpec((tm, K), lambda i, j: (i, 0))     # resident across j
    b_spec = pl.BlockSpec((K, tn), lambda i, j: (0, j))     # streamed along j
    o_spec = pl.BlockSpec((tm, tn), lambda i, j: (i, j))    # lane-dense bf16
    params = pltpu.CompilerParams(dimension_semantics=("parallel", "parallel"),
                                  vmem_limit_bytes=budget)
    out_shape = jax.ShapeDtypeStruct((Mp, Nw), jnp.bfloat16)

    if scale is None:
        out = pl.pallas_call(
            _matmul_kernel,
            out_shape=out_shape,
            grid_spec=pltpu.PrefetchScalarGridSpec(
                num_scalar_prefetch=0, grid=grid,
                in_specs=[a_spec, b_spec], out_specs=o_spec),
            compiler_params=params,
        )(a, b)
    else:
        sv = scale.reshape(1, K).astype(jnp.float32)
        tv = shift.reshape(1, K).astype(jnp.float32)
        vec_spec = pl.BlockSpec((1, K), lambda i, j: (0, 0))  # grid-invariant
        out = pl.pallas_call(
            _matmul_prenorm_relu_kernel,
            out_shape=out_shape,
            grid_spec=pltpu.PrefetchScalarGridSpec(
                num_scalar_prefetch=0, grid=grid,
                in_specs=[a_spec, vec_spec, vec_spec, b_spec],
                out_specs=o_spec),
            compiler_params=params,
        )(a, sv, tv, b)
    if Mp != M:
        out = out[:M]
    return out


# ------------------------ col2im epilogue (XLA glue) ------------------------
# ConvTranspose2d(k=4, s=2, p=1): output row 2q+ph collects taps (ki, row
# shift dq):  ph=0 -> {(1, 0), (3, -1)},  ph=1 -> {(2, 0), (0, +1)}  (same for
# columns).  Derivation: out[oh] <- y[ih, ki] with oh = 2*ih + ki - 1.
_PHASE_TAPS = {0: ((1, 0), (3, -1)), 1: ((2, 0), (0, 1))}


def _shift2d(a, dq, dr):
    """a [N, H, W, C] -> a'[n, q, r, c] = a[n, q+dq, r+dr, c], zero padded."""
    n, h, w, c = a.shape
    if dq == -1:
        a = jnp.pad(a, ((0, 0), (1, 0), (0, 0), (0, 0)))[:, :h]
    elif dq == 1:
        a = jnp.pad(a, ((0, 0), (0, 1), (0, 0), (0, 0)))[:, 1:]
    if dr == -1:
        a = jnp.pad(a, ((0, 0), (0, 0), (1, 0), (0, 0)))[:, :, :w]
    elif dr == 1:
        a = jnp.pad(a, ((0, 0), (0, 0), (0, 1), (0, 0)))[:, :, 1:]
    return a


def subpixel_combine_s2(y6):
    """col2im for k=4, stride=2, pad=1 via 2x2 sub-pixel phases.

    y6 [N, H, W, 4, 4, C] -> [N, 2H, 2W, C] float32.  Each output phase sums
    exactly 4 shifted taps; no interior-dilated pads, no full-size temporaries.
    """
    n, h, w, k, _, c = y6.shape
    y6 = y6.astype(jnp.float32)
    rows = []
    for ph in (0, 1):
        cols = []
        for pw in (0, 1):
            acc = None
            for ki, dq in _PHASE_TAPS[ph]:
                for kj, dr in _PHASE_TAPS[pw]:
                    t = _shift2d(y6[:, :, :, ki, kj, :], dq, dr)
                    acc = t if acc is None else acc + t
            cols.append(acc)
        rows.append(jnp.stack(cols, axis=3))        # [N, H, W, 2(pw), C]
    full = jnp.stack(rows, axis=2)                  # [N, H, 2(ph), W, 2(pw), C]
    return full.reshape(n, 2 * h, 2 * w, c)


def _col2im_reference(y6, stride, pad, ho, wo):
    """Dilated-pad overlap-add reference (self-test only; not on the hot path)."""
    n, h, w, k, _, c = y6.shape
    hf = (h - 1) * stride + k
    wf = (w - 1) * stride + k
    dh = (h - 1) * stride + 1
    dw = (w - 1) * stride + 1
    out = jnp.zeros((n, hf, wf, c), y6.dtype)
    for ki in range(k):
        for kj in range(k):
            out = out + jax.lax.pad(
                y6[:, :, :, ki, kj, :], jnp.zeros((), y6.dtype),
                ((0, 0, 0), (ki, hf - ki - dh, stride - 1),
                 (kj, wf - kj - dw, stride - 1), (0, 0, 0)))
    return out[:, pad:pad + ho, pad:pad + wo, :]


# ------------------------------ model glue ----------------------------------

def init_generator_params(key, nz, nc, ngf):
    """DCGAN-style N(0, 0.02) weights; BN gamma=1, beta=0.  Weights are stored
    pre-reshaped as GEMM matrices [Cin_pad, 16*Cout_pad] in bf16."""
    specs = [  # (cin, cout, stride, pad, has_bn)
        (nz,      ngf * 8, 1, 0, True),
        (ngf * 8, ngf * 4, 2, 1, True),
        (ngf * 4, ngf * 2, 2, 1, True),
        (ngf * 2, ngf,     2, 1, True),
        (ngf,     nc,      2, 1, False),
    ]
    layers = []
    for cin, cout, stride, pad, bn in specs:
        key, wk = jax.random.split(key)
        w = 0.02 * jax.random.normal(wk, (cin, cout, _K, _K), jnp.float32)
        cin_p, cout_p = _pad_ch(cin), _pad_ch(cout)
        wp = jnp.zeros((cin_p, cout_p, _K, _K), jnp.float32).at[:cin, :cout].set(w)
        # [Cin_p, ki, kj, Cout_p] -> [Cin_p, 16*Cout_p]; lane dim % 256 == 0.
        w2d = wp.transpose(0, 2, 3, 1).reshape(cin_p, _K * _K * cout_p)
        layer = dict(w2d=w2d.astype(jnp.bfloat16), stride=stride, pad=pad,
                     bn=bn, cout=cout, cout_pad=cout_p, cin_pad=cin_p)
        if bn:
            layer["gamma"] = jnp.ones((cout_p,), jnp.float32)
            layer["beta"] = jnp.zeros((cout_p,), jnp.float32)
        layers.append(layer)
    return layers


def generator_forward(x, layers):
    """x: [N, nz, 1, 1] (NCHW) -> [N, nc, 64, 64] in [-1, 1] (training-mode BN).

    bf16 activations / weights with f32 accumulation and f32 BN math; small
    deviation from PyTorch's f32 ConvTranspose2d is expected (GAN-tolerant).
    """
    n, c_in, h, w = x.shape
    h2d = x.transpose(0, 2, 3, 1).reshape(n * h * w, c_in)
    cin_p0 = layers[0]["cin_pad"]
    if cin_p0 != c_in:
        h2d = jnp.pad(h2d, ((0, 0), (0, cin_p0 - c_in)))
    scale = shift = None   # BN affine + ReLU of the previous layer (fused lazily)

    for layer in layers:
        stride, pad, cout_p = layer["stride"], layer["pad"], layer["cout_pad"]
        ho = (h - 1) * stride - 2 * pad + _K
        wo = (w - 1) * stride - 2 * pad + _K

        # ConvTranspose as an input-stationary GEMM (Pallas, MXU) with the
        # previous layer's BN + ReLU fused into the A tile.  Output is bf16.
        y2d = pallas_matmul(h2d, layer["w2d"], scale, shift)

        # col2im epilogue (XLA glue, fused with the BN stats / tanh below).
        if stride == 1:
            assert h == 1 and w == 1 and pad == 0       # DCGAN first layer
            act = y2d.reshape(n, _K, _K, cout_p).astype(jnp.float32)
        elif stride == 2 and pad == 1:
            act = subpixel_combine_s2(y2d.reshape(n, h, w, _K, _K, cout_p))
        else:  # pragma: no cover
            raise NotImplementedError("only the DCGAN conv-transpose configs")

        if layer["bn"]:
            # Training-mode BatchNorm2d: biased batch stats over (N, H, W),
            # computed on the bf16 activation the next layer will consume so
            # XLA fuses the reductions into the same epilogue.
            m2 = n * ho * wo
            h2d = act.astype(jnp.bfloat16).reshape(m2, cout_p)
            a32 = h2d.astype(jnp.float32)
            mean = jnp.sum(a32, axis=0) / m2
            # Single-pass E[x^2]-E[x]^2, clamped >= 0 (acceptable for a GAN
            # forward; switch to a centered second pass if drift is observed).
            var = jnp.maximum(jnp.sum(a32 * a32, axis=0) / m2 - mean * mean, 0.0)
            scale = layer["gamma"] * jax.lax.rsqrt(var + _EPS)
            shift = layer["beta"] - mean * scale
            h, w = ho, wo
        else:
            # Final layer: tanh fused into the same epilogue, crop pad channels.
            img = jnp.tanh(act[:, :, :, :layer["cout"]])
            return img.transpose(0, 3, 1, 2)            # NCHW at the API


# -------------------------------- main --------------------------------------

if __name__ == "__main__":
    # Self-check: sub-pixel combine == dilated overlap-add reference.
    yck = jax.random.normal(jax.random.PRNGKey(42), (1, 3, 5, 4, 4, 8),
                            jnp.float32)
    got = subpixel_combine_s2(yck)
    ref = _col2im_reference(yck, 2, 1, 6, 10)
    assert bool(jnp.allclose(got, ref, atol=1e-5)), \
        float(jnp.max(jnp.abs(got - ref)))

    nz, nc, ngf = 8, 3, 8            # small synthetic config
    N = 2
    key = jax.random.PRNGKey(0)
    key, xk = jax.random.split(key)
    x = jax.random.normal(xk, (N, nz, 1, 1), jnp.float32)        # latent, NCHW

    layers = init_generator_params(jax.random.PRNGKey(1), nz, nc, ngf)

    fwd = jax.jit(lambda inp: generator_forward(inp, layers))
    out = jax.block_until_ready(fwd(x))

    assert out.shape == (N, nc, 64, 64), out.shape
    assert bool(jnp.all(jnp.isfinite(out)))
    assert bool(jnp.max(jnp.abs(out)) <= 1.0 + 1e-6)             # tanh range
    print("KERNEL_OK")
</pallas_src>

<mosaic_0001>
module attributes {stable_mosaic.version = 11 : i64} {
  func.func @_matmul_prenorm_relu_kernel(%arg0: i32, %arg1: i32, %arg2: memref<32x64xbf16, #tpu.memory_space<vmem>>, %arg3: memref<1x64xf32, #tpu.memory_space<vmem>>, %arg4: memref<1x64xf32, #tpu.memory_space<vmem>>, %arg5: memref<64x256xbf16, #tpu.memory_space<vmem>>, %arg6: memref<32x256xbf16, #tpu.memory_space<vmem>>) attributes {dimension_semantics = [#tpu.dimension_semantics<parallel>, #tpu.dimension_semantics<parallel>], iteration_bounds = array<i64: 1, 2>, scalar_prefetch = 0 : i64, scratch_operands = 0 : i64, tpu.core_type = #tpu.core_type<tc>, window_params = [{transform_indices = @transform_0, window_bounds = array<i64: 32, 64>}, {pipeline_mode = #tpu.pipeline_mode<synchronous>, transform_indices = @transform_1, window_bounds = array<i64: 1, 64>}, {pipeline_mode = #tpu.pipeline_mode<synchronous>, transform_indices = @transform_2, window_bounds = array<i64: 1, 64>}, {transform_indices = @transform_3, window_bounds = array<i64: 64, 256>}, {transform_indices = @transform_4, window_bounds = array<i64: 32, 256>}]} {
    %c0 = arith.constant 0 : index
    %c0_0 = arith.constant 0 : index
    %0 = vector.load %arg2[%c0, %c0_0] : memref<32x64xbf16, #tpu.memory_space<vmem>>, vector<32x64xbf16>
    %1 = arith.extf %0 : vector<32x64xbf16> to vector<32x64xf32>
    %c0_1 = arith.constant 0 : index
    %c0_2 = arith.constant 0 : index
    %2 = vector.load %arg3[%c0_1, %c0_2] : memref<1x64xf32, #tpu.memory_space<vmem>>, vector<1x64xf32>
    %3 = vector.broadcast %2 : vector<1x64xf32> to vector<32x64xf32>
    %4 = arith.mulf %1, %3 : vector<32x64xf32>
    %c0_3 = arith.constant 0 : index
    %c0_4 = arith.constant 0 : index
    %5 = vector.load %arg4[%c0_3, %c0_4] : memref<1x64xf32, #tpu.memory_space<vmem>>, vector<1x64xf32>
    %6 = vector.broadcast %5 : vector<1x64xf32> to vector<32x64xf32>
    %7 = arith.addf %4, %6 : vector<32x64xf32>
    %cst = arith.constant 0.000000e+00 : f32
    %8 = vector.broadcast %cst : f32 to vector<32x64xf32>
    %9 = arith.maximumf %7, %8 : vector<32x64xf32>
    %10 = arith.truncf %9 : vector<32x64xf32> to vector<32x64xbf16>
    %c0_5 = arith.constant 0 : index
    %c0_6 = arith.constant 0 : index
    %11 = vector.load %arg5[%c0_5, %c0_6] : memref<64x256xbf16, #tpu.memory_space<vmem>>, vector<64x256xbf16>
    %cst_7 = arith.constant dense<0.000000e+00> : vector<32x256xf32>
    %12 = tpu.matmul %10, %11, %cst_7 {dimension_numbers = #tpu.dot_dimension_numbers<[1], [0], [0], [1], [0, 0, 1, 1], [], []>} : vector<32x64xbf16>, vector<64x256xbf16>, vector<32x256xf32> -> vector<32x256xf32>
    %13 = arith.truncf %12 : vector<32x256xf32> to vector<32x256xbf16>
    %c0_8 = arith.constant 0 : index
    %c0_9 = arith.constant 0 : index
    %14 = vector.load %arg6[%c0_8, %c0_9] : memref<32x256xbf16, #tpu.memory_space<vmem>>, vector<32x256xbf16>
    tpu.vector_store %arg6[%c0_8, %c0_9], %13 {strides = array<i32>} : memref<32x256xbf16, #tpu.memory_space<vmem>>, vector<32x256xbf16>,
    return
  }
  func.func @transform_0(%arg0: i32, %arg1: i32) -> (i32, i32) {
    %c0_i32 = arith.constant 0 : i32
    %c0_i32_0 = arith.constant 0 : i32
    return %arg0, %c0_i32 : i32, i32
  }
  func.func @transform_1(%arg0: i32, %arg1: i32) -> (i32, i32) {
    %c0_i32 = arith.constant 0 : i32
    %c0_i32_0 = arith.constant 0 : i32
    %c0_i32_1 = arith.constant 0 : i32
    return %c0_i32, %c0_i32_0 : i32, i32
  }
  func.func @transform_2(%arg0: i32, %arg1: i32) -> (i32, i32) {
    %c0_i32 = arith.constant 0 : i32
    %c0_i32_0 = arith.constant 0 : i32
    %c0_i32_1 = arith.constant 0 : i32
    return %c0_i32, %c0_i32_0 : i32, i32
  }
  func.func @transform_3(%arg0: i32, %arg1: i32) -> (i32, i32) {
    %c0_i32 = arith.constant 0 : i32
    %c0_i32_0 = arith.constant 0 : i32
    return %c0_i32, %arg1 : i32, i32
  }
  func.func @transform_4(%arg0: i32, %arg1: i32) -> (i32, i32) {
    %c0_i32 = arith.constant 0 : i32
    return %arg0, %arg1 : i32, i32
  }
}

module attributes {stable_mosaic.version = 11 : i64} {
  func.func @_matmul_kernel(%arg0: i32, %arg1: i32, %arg2: memref<8x16xf32, #tpu.memory_space<vmem>>, %arg3: memref<16x512xbf16, #tpu.memory_space<vmem>>, %arg4: memref<8x512xbf16, #tpu.memory_space<vmem>>) attributes {dimension_semantics = [#tpu.dimension_semantics<parallel>, #tpu.dimension_semantics<parallel>], iteration_bounds = array<i64: 1, 2>, scalar_prefetch = 0 : i64, scratch_operands = 0 : i64, tpu.core_type = #tpu.core_type<tc>, window_params = [{transform_indices = @transform_0, window_bounds = array<i64: 8, 16>}, {transform_indices = @transform_1, window_bounds = array<i64: 16, 512>}, {transform_indices = @transform_2, window_bounds = array<i64: 8, 512>}]} {
    %c0 = arith.constant 0 : index
    %c0_0 = arith.constant 0 : index
    %0 = vector.load %arg2[%c0, %c0_0] : memref<8x16xf32, #tpu.memory_space<vmem>>, vector<8x16xf32>
    %1 = arith.truncf %0 : vector<8x16xf32> to vector<8x16xbf16>
    %c0_1 = arith.constant 0 : index
    %c0_2 = arith.constant 0 : index
    %2 = vector.load %arg3[%c0_1, %c0_2] : memref<16x512xbf16, #tpu.memory_space<vmem>>, vector<16x512xbf16>
    %cst = arith.constant dense<0.000000e+00> : vector<8x512xf32>
    %3 = tpu.matmul %1, %2, %cst {dimension_numbers = #tpu.dot_dimension_numbers<[1], [0], [0], [1], [0, 0, 1, 1], [], []>} : vector<8x16xbf16>, vector<16x512xbf16>, vector<8x512xf32> -> vector<8x512xf32>
    %4 = arith.truncf %3 : vector<8x512xf32> to vector<8x512xbf16>
    %c0_3 = arith.constant 0 : index
    %c0_4 = arith.constant 0 : index
    %5 = vector.load %arg4[%c0_3, %c0_4] : memref<8x512xbf16, #tpu.memory_space<vmem>>, vector<8x512xbf16>
    tpu.vector_store %arg4[%c0_3, %c0_4], %4 {strides = array<i32>} : memref<8x512xbf16, #tpu.memory_space<vmem>>, vector<8x512xbf16>,
    return
  }
  func.func @transform_0(%arg0: i32, %arg1: i32) -> (i32, i32) {
    %c0_i32 = arith.constant 0 : i32
    %c0_i32_0 = arith.constant 0 : i32
    return %arg0, %c0_i32 : i32, i32
  }
  func.func @transform_1(%arg0: i32, %arg1: i32) -> (i32, i32) {
    %c0_i32 = arith.constant 0 : i32
    %c0_i32_0 = arith.constant 0 : i32
    return %c0_i32, %arg1 : i32, i32
  }
  func.func @transform_2(%arg0: i32, %arg1: i32) -> (i32, i32) {
    %c0_i32 = arith.constant 0 : i32
    return %arg0, %arg1 : i32, i32
  }
}

module attributes {stable_mosaic.version = 11 : i64} {
  func.func @_matmul_prenorm_relu_kernel(%arg0: i32, %arg1: i32, %arg2: memref<128x32xbf16, #tpu.memory_space<vmem>>, %arg3: memref<1x32xf32, #tpu.memory_space<vmem>>, %arg4: memref<1x32xf32, #tpu.memory_space<vmem>>, %arg5: memref<32x256xbf16, #tpu.memory_space<vmem>>, %arg6: memref<128x256xbf16, #tpu.memory_space<vmem>>) attributes {dimension_semantics = [#tpu.dimension_semantics<parallel>, #tpu.dimension_semantics<parallel>], iteration_bounds = array<i64: 1, 1>, scalar_prefetch = 0 : i64, scratch_operands = 0 : i64, tpu.core_type = #tpu.core_type<tc>, window_params = [{transform_indices = @transform_0, window_bounds = array<i64: 128, 32>}, {pipeline_mode = #tpu.pipeline_mode<synchronous>, transform_indices = @transform_1, window_bounds = array<i64: 1, 32>}, {pipeline_mode = #tpu.pipeline_mode<synchronous>, transform_indices = @transform_2, window_bounds = array<i64: 1, 32>}, {transform_indices = @transform_3, window_bounds = array<i64: 32, 256>}, {transform_indices = @transform_4, window_bounds = array<i64: 128, 256>}]} {
    %c0 = arith.constant 0 : index
    %c0_0 = arith.constant 0 : index
    %0 = vector.load %arg2[%c0, %c0_0] : memref<128x32xbf16, #tpu.memory_space<vmem>>, vector<128x32xbf16>
    %1 = arith.extf %0 : vector<128x32xbf16> to vector<128x32xf32>
    %c0_1 = arith.constant 0 : index
    %c0_2 = arith.constant 0 : index
    %2 = vector.load %arg3[%c0_1, %c0_2] : memref<1x32xf32, #tpu.memory_space<vmem>>, vector<1x32xf32>
    %3 = vector.broadcast %2 : vector<1x32xf32> to vector<128x32xf32>
    %4 = arith.mulf %1, %3 : vector<128x32xf32>
    %c0_3 = arith.constant 0 : index
    %c0_4 = arith.constant 0 : index
    %5 = vector.load %arg4[%c0_3, %c0_4] : memref<1x32xf32, #tpu.memory_space<vmem>>, vector<1x32xf32>
    %6 = vector.broadcast %5 : vector<1x32xf32> to vector<128x32xf32>
    %7 = arith.addf %4, %6 : vector<128x32xf32>
    %cst = arith.constant 0.000000e+00 : f32
    %8 = vector.broadcast %cst : f32 to vector<128x32xf32>
    %9 = arith.maximumf %7, %8 : vector<128x32xf32>
    %10 = arith.truncf %9 : vector<128x32xf32> to vector<128x32xbf16>
    %c0_5 = arith.constant 0 : index
    %c0_6 = arith.constant 0 : index
    %11 = vector.load %arg5[%c0_5, %c0_6] : memref<32x256xbf16, #tpu.memory_space<vmem>>, vector<32x256xbf16>
    %cst_7 = arith.constant dense<0.000000e+00> : vector<128x256xf32>
    %12 = tpu.matmul %10, %11, %cst_7 {dimension_numbers = #tpu.dot_dimension_numbers<[1], [0], [0], [1], [0, 0, 1, 1], [], []>} : vector<128x32xbf16>, vector<32x256xbf16>, vector<128x256xf32> -> vector<128x256xf32>
    %13 = arith.truncf %12 : vector<128x256xf32> to vector<128x256xbf16>
    %c0_8 = arith.constant 0 : index
    %c0_9 = arith.constant 0 : index
    %14 = vector.load %arg6[%c0_8, %c0_9] : memref<128x256xbf16, #tpu.memory_space<vmem>>, vector<128x256xbf16>
    tpu.vector_store %arg6[%c0_8, %c0_9], %13 {strides = array<i32>} : memref<128x256xbf16, #tpu.memory_space<vmem>>, vector<128x256xbf16>,
    return
  }
  func.func @transform_0(%arg0: i32, %arg1: i32) -> (i32, i32) {
    %c0_i32 = arith.constant 0 : i32
    %c0_i32_0 = arith.constant 0 : i32
    return %arg0, %c0_i32 : i32, i32
  }
  func.func @transform_1(%arg0: i32, %arg1: i32) -> (i32, i32) {
    %c0_i32 = arith.constant 0 : i32
    %c0_i32_0 = arith.constant 0 : i32
    %c0_i32_1 = arith.constant 0 : i32
    return %c0_i32, %c0_i32_0 : i32, i32
  }
  func.func @transform_2(%arg0: i32, %arg1: i32) -> (i32, i32) {
    %c0_i32 = arith.constant 0 : i32
    %c0_i32_0 = arith.constant 0 : i32
    %c0_i32_1 = arith.constant 0 : i32
    return %c0_i32, %c0_i32_0 : i32, i32
  }
  func.func @transform_3(%arg0: i32, %arg1: i32) -> (i32, i32) {
    %c0_i32 = arith.constant 0 : i32
    %c0_i32_0 = arith.constant 0 : i32
    return %c0_i32, %arg1 : i32, i32
  }
  func.func @transform_4(%arg0: i32, %arg1: i32) -> (i32, i32) {
    %c0_i32 = arith.constant 0 : i32
    return %arg0, %arg1 : i32, i32
  }
}

module attributes {stable_mosaic.version = 11 : i64} {
  func.func @_matmul_prenorm_relu_kernel(%arg0: i32, %arg1: i32, %arg2: memref<512x16xbf16, #tpu.memory_space<vmem>>, %arg3: memref<1x16xf32, #tpu.memory_space<vmem>>, %arg4: memref<1x16xf32, #tpu.memory_space<vmem>>, %arg5: memref<16x256xbf16, #tpu.memory_space<vmem>>, %arg6: memref<512x256xbf16, #tpu.memory_space<vmem>>) attributes {dimension_semantics = [#tpu.dimension_semantics<parallel>, #tpu.dimension_semantics<parallel>], iteration_bounds = array<i64: 1, 1>, scalar_prefetch = 0 : i64, scratch_operands = 0 : i64, tpu.core_type = #tpu.core_type<tc>, window_params = [{transform_indices = @transform_0, window_bounds = array<i64: 512, 16>}, {pipeline_mode = #tpu.pipeline_mode<synchronous>, transform_indices = @transform_1, window_bounds = array<i64: 1, 16>}, {pipeline_mode = #tpu.pipeline_mode<synchronous>, transform_indices = @transform_2, window_bounds = array<i64: 1, 16>}, {transform_indices = @transform_3, window_bounds = array<i64: 16, 256>}, {transform_indices = @transform_4, window_bounds = array<i64: 512, 256>}]} {
    %c0 = arith.constant 0 : index
    %c0_0 = arith.constant 0 : index
    %0 = vector.load %arg2[%c0, %c0_0] : memref<512x16xbf16, #tpu.memory_space<vmem>>, vector<512x16xbf16>
    %1 = arith.extf %0 : vector<512x16xbf16> to vector<512x16xf32>
    %c0_1 = arith.constant 0 : index
    %c0_2 = arith.constant 0 : index
    %2 = vector.load %arg3[%c0_1, %c0_2] : memref<1x16xf32, #tpu.memory_space<vmem>>, vector<1x16xf32>
    %3 = vector.broadcast %2 : vector<1x16xf32> to vector<512x16xf32>
    %4 = arith.mulf %1, %3 : vector<512x16xf32>
    %c0_3 = arith.constant 0 : index
    %c0_4 = arith.constant 0 : index
    %5 = vector.load %arg4[%c0_3, %c0_4] : memref<1x16xf32, #tpu.memory_space<vmem>>, vector<1x16xf32>
    %6 = vector.broadcast %5 : vector<1x16xf32> to vector<512x16xf32>
    %7 = arith.addf %4, %6 : vector<512x16xf32>
    %cst = arith.constant 0.000000e+00 : f32
    %8 = vector.broadcast %cst : f32 to vector<512x16xf32>
    %9 = arith.maximumf %7, %8 : vector<512x16xf32>
    %10 = arith.truncf %9 : vector<512x16xf32> to vector<512x16xbf16>
    %c0_5 = arith.constant 0 : index
    %c0_6 = arith.constant 0 : index
    %11 = vector.load %arg5[%c0_5, %c0_6] : memref<16x256xbf16, #tpu.memory_space<vmem>>, vector<16x256xbf16>
    %cst_7 = arith.constant dense<0.000000e+00> : vector<512x256xf32>
    %12 = tpu.matmul %10, %11, %cst_7 {dimension_numbers = #tpu.dot_dimension_numbers<[1], [0], [0], [1], [0, 0, 1, 1], [], []>} : vector<512x16xbf16>, vector<16x256xbf16>, vector<512x256xf32> -> vector<512x256xf32>
    %13 = arith.truncf %12 : vector<512x256xf32> to vector<512x256xbf16>
    %c0_8 = arith.constant 0 : index
    %c0_9 = arith.constant 0 : index
    %14 = vector.load %arg6[%c0_8, %c0_9] : memref<512x256xbf16, #tpu.memory_space<vmem>>, vector<512x256xbf16>
    tpu.vector_store %arg6[%c0_8, %c0_9], %13 {strides = array<i32>} : memref<512x256xbf16, #tpu.memory_space<vmem>>, vector<512x256xbf16>,
    return
  }
  func.func @transform_0(%arg0: i32, %arg1: i32) -> (i32, i32) {
    %c0_i32 = arith.constant 0 : i32
    %c0_i32_0 = arith.constant 0 : i32
    return %arg0, %c0_i32 : i32, i32
  }
  func.func @transform_1(%arg0: i32, %arg1: i32) -> (i32, i32) {
    %c0_i32 = arith.constant 0 : i32
    %c0_i32_0 = arith.constant 0 : i32
    %c0_i32_1 = arith.constant 0 : i32
    return %c0_i32, %c0_i32_0 : i32, i32
  }
  func.func @transform_2(%arg0: i32, %arg1: i32) -> (i32, i32) {
    %c0_i32 = arith.constant 0 : i32
    %c0_i32_0 = arith.constant 0 : i32
    %c0_i32_1 = arith.constant 0 : i32
    return %c0_i32, %c0_i32_0 : i32, i32
  }
  func.func @transform_3(%arg0: i32, %arg1: i32) -> (i32, i32) {
    %c0_i32 = arith.constant 0 : i32
    %c0_i32_0 = arith.constant 0 : i32
    return %c0_i32, %arg1 : i32, i32
  }
  func.func @transform_4(%arg0: i32, %arg1: i32) -> (i32, i32) {
    %c0_i32 = arith.constant 0 : i32
    return %arg0, %arg1 : i32, i32
  }
}

module attributes {stable_mosaic.version = 11 : i64} {
  func.func @_matmul_prenorm_relu_kernel(%arg0: i32, %arg1: i32, %arg2: memref<1024x16xbf16, #tpu.memory_space<vmem>>, %arg3: memref<1x16xf32, #tpu.memory_space<vmem>>, %arg4: memref<1x16xf32, #tpu.memory_space<vmem>>, %arg5: memref<16x256xbf16, #tpu.memory_space<vmem>>, %arg6: memref<1024x256xbf16, #tpu.memory_space<vmem>>) attributes {dimension_semantics = [#tpu.dimension_semantics<parallel>, #tpu.dimension_semantics<parallel>], iteration_bounds = array<i64: 2, 1>, scalar_prefetch = 0 : i64, scratch_operands = 0 : i64, tpu.core_type = #tpu.core_type<tc>, window_params = [{transform_indices = @transform_0, window_bounds = array<i64: 1024, 16>}, {pipeline_mode = #tpu.pipeline_mode<synchronous>, transform_indices = @transform_1, window_bounds = array<i64: 1, 16>}, {pipeline_mode = #tpu.pipeline_mode<synchronous>, transform_indices = @transform_2, window_bounds = array<i64: 1, 16>}, {transform_indices = @transform_3, window_bounds = array<i64: 16, 256>}, {transform_indices = @transform_4, window_bounds = array<i64: 1024, 256>}]} {
    %c0 = arith.constant 0 : index
    %c0_0 = arith.constant 0 : index
    %0 = vector.load %arg2[%c0, %c0_0] : memref<1024x16xbf16, #tpu.memory_space<vmem>>, vector<1024x16xbf16>
    %1 = arith.extf %0 : vector<1024x16xbf16> to vector<1024x16xf32>
    %c0_1 = arith.constant 0 : index
    %c0_2 = arith.constant 0 : index
    %2 = vector.load %arg3[%c0_1, %c0_2] : memref<1x16xf32, #tpu.memory_space<vmem>>, vector<1x16xf32>
    %3 = vector.broadcast %2 : vector<1x16xf32> to vector<1024x16xf32>
    %4 = arith.mulf %1, %3 : vector<1024x16xf32>
    %c0_3 = arith.constant 0 : index
    %c0_4 = arith.constant 0 : index
    %5 = vector.load %arg4[%c0_3, %c0_4] : memref<1x16xf32, #tpu.memory_space<vmem>>, vector<1x16xf32>
    %6 = vector.broadcast %5 : vector<1x16xf32> to vector<1024x16xf32>
    %7 = arith.addf %4, %6 : vector<1024x16xf32>
    %cst = arith.constant 0.000000e+00 : f32
    %8 = vector.broadcast %cst : f32 to vector<1024x16xf32>
    %9 = arith.maximumf %7, %8 : vector<1024x16xf32>
    %10 = arith.truncf %9 : vector<1024x16xf32> to vector<1024x16xbf16>
    %c0_5 = arith.constant 0 : index
    %c0_6 = arith.constant 0 : index
    %11 = vector.load %arg5[%c0_5, %c0_6] : memref<16x256xbf16, #tpu.memory_space<vmem>>, vector<16x256xbf16>
    %cst_7 = arith.constant dense<0.000000e+00> : vector<1024x256xf32>
    %12 = tpu.matmul %10, %11, %cst_7 {dimension_numbers = #tpu.dot_dimension_numbers<[1], [0], [0], [1], [0, 0, 1, 1], [], []>} : vector<1024x16xbf16>, vector<16x256xbf16>, vector<1024x256xf32> -> vector<1024x256xf32>
    %13 = arith.truncf %12 : vector<1024x256xf32> to vector<1024x256xbf16>
    %c0_8 = arith.constant 0 : index
    %c0_9 = arith.constant 0 : index
    %14 = vector.load %arg6[%c0_8, %c0_9] : memref<1024x256xbf16, #tpu.memory_space<vmem>>, vector<1024x256xbf16>
    tpu.vector_store %arg6[%c0_8, %c0_9], %13 {strides = array<i32>} : memref<1024x256xbf16, #tpu.memory_space<vmem>>, vector<1024x256xbf16>,
    return
  }
  func.func @transform_0(%arg0: i32, %arg1: i32) -> (i32, i32) {
    %c0_i32 = arith.constant 0 : i32
    %c0_i32_0 = arith.constant 0 : i32
    return %arg0, %c0_i32 : i32, i32
  }
  func.func @transform_1(%arg0: i32, %arg1: i32) -> (i32, i32) {
    %c0_i32 = arith.constant 0 : i32
    %c0_i32_0 = arith.constant 0 : i32
    %c0_i32_1 = arith.constant 0 : i32
    return %c0_i32, %c0_i32_0 : i32, i32
  }
  func.func @transform_2(%arg0: i32, %arg1: i32) -> (i32, i32) {
    %c0_i32 = arith.constant 0 : i32
    %c0_i32_0 = arith.constant 0 : i32
    %c0_i32_1 = arith.constant 0 : i32
    return %c0_i32, %c0_i32_0 : i32, i32
  }
  func.func @transform_3(%arg0: i32, %arg1: i32) -> (i32, i32) {
    %c0_i32 = arith.constant 0 : i32
    %c0_i32_0 = arith.constant 0 : i32
    return %c0_i32, %arg1 : i32, i32
  }
  func.func @transform_4(%arg0: i32, %arg1: i32) -> (i32, i32) {
    %c0_i32 = arith.constant 0 : i32
    return %arg0, %arg1 : i32, i32
  }
}

</mosaic_0001>

<bundles_post_ra>
// kernel: _lambda_.6
= control target key start
LH: loop header
LB: loop body
LE: loop exit
PB: predicated region body
PF: predicated region fallthrough
CT: control target
= control target key end

     0   :  { %9 = vsyncpa [#allocation3], 0  ;;  %s936_s0 = inlined_call_operand.vmem [shape: bf16[32,64], index: 0, kind: input, shape index: {}]   ;;  %s937_s1 = inlined_call_operand.vmem [shape: f32[1,64], index: 1, kind: input, shape index: {}]   ;;  %s938_s2 = inlined_call_operand.vmem [shape: f32[1,64], index: 2, kind: input, shape index: {}]   ;;  %s939_s3 = inlined_call_operand.hbm [shape: bf16[64,512], index: 3, kind: input, shape index: {}]   ;;  %s940_s4 = inlined_call_operand.vmem [shape: bf16[32,512], index: 4, kind: output, shape index: {}]  }
   0x1   :  { %11 = vsyncpa [#allocation3 + $0x1], 0  ;;  %s806_s15 = smov 0   ;;  %s808_s16 = smov 0  }
   0x2   :  { %s810_s17 = smov 0   ;;  %s812_s18 = smov 0  }
   0x3   :  { %s814_s19 = smov 0   ;;  %s816_s20 = smov 0  }
   0x4 LB: > { %s570_s21 = sadd.s32 4294967295, %s774_s20   ;;  %s26_s22 = sadd.s32 1, %s770_s19  ;;  %s774_s20 = sphi %s816_s20, %s17_s20   ;;  %s770_s19 = sphi %s814_s19, %s949_s19   ;;  %s766_s18 = sphi %s812_s18, %s948_s18   ;;  %s762_s17 = sphi %s810_s17, %s947_s17   ;;  %s758_s16 = sphi %s808_s16, %s946_s16   ;;  %s754_s15 = sphi %s806_s15, %s945_s15  }
   0x5   : > { %p27_p0 = scmp.ge.s32.totalorder %s26_s22, 2  ;;  %s104_s23 = sadd.s32 1, %s762_s17 }
   0x6   : > { %p111_p1 = scmp.ne.s32.totalorder %s762_s17, %s758_s16  ;;  %p112_p2 = scmp.eq.s32.totalorder %s774_s20, 0 }
   0x7   : > { %s951_s22 = smov (%p27_p0, %s26_s22), 0  ;;  %p117_p4 = scmp.ne.s32.totalorder %s758_s16, %s754_s15 }
   0x8   : > { %p842_p3 = por %p112_p2, %p111_p1  ;;  %s101_s25 = ssub.s32 %s770_s19, %s951_s22 }
   0x9   : > { %p118_p5 = scmp.eq.s32.totalorder %s570_s21, 0  ;;  %p102_p6 = scmp.eq.s32.totalorder %s101_s25, 0 }
   0xa   : > { %p143_p7 = scmp.eq.s32.totalorder %s570_s21, 1  ;;  %p631_p10 = scmp.lt.s32.totalorder %s774_s20, 2 }
   0xb   : > { %p849_p8 = por %p118_p5, %p117_p4  ;;  %s184_s29 = sand.u32 1, %s762_s17  }
   0xc   : > { %s854_s27 = scalar_select %p102_p6, %s762_s17, %s104_s23  }
   0xd   : > { %p856_p9 = por %p143_p7, %p111_p1  ;;  %s602_s30 = sshll.u32 %s770_s19, 7 }
   0xe   : > { %s575_s5 = sshll.u32 %s184_s29, 6  ;;  %s194_s8 = scalar_lea.hbm %s939_s3, %s602_s30 }
   0xf   : > { %s188_s9 = scalar_lea.vmem [#allocation2], %s575_s5  ;;  %p868_p11 = pnand %p631_p10, %p842_p3 }
  0x10   : > { %s195_s10 = sshll.u32 %s188_s9, 4  ;;  %p578_p12 = scmp.ge.s32.totalorder %s774_s20, 1  ;;  %s196_s10 = int_to_ptr.vmem [resolvable:$true] %s195_s10 }
  0x11   : > { %s185_s12 = scalar_lea.sflag [#allocation3], %s184_s29  ;;  %p698_p13 = pneg %p868_p11 }
  0x12   : > { %s709_s13 = scalar_lea.vmem %s196_s10, 1024  ;;  %s776_s14 = smov [#allocation2]  }
  0x13   : > { %p710_p0 = scmp.ne.s32.totalorder %s196_s10, %s709_s13  ;;  %s714_s15 = sshll.u32 %s776_s14, 4  ;;  %s715_s15 = int_to_ptr.vmem [resolvable:$false] %s714_s15 }
  0x14   : > { %s716_s21 = scalar_lea.vmem %s715_s15, 2048  ;;  %p717_p4 = scmp.lt.s32.totalorder %s196_s10, %s715_s15 }
  0x15   : > { %p712_p1 = pnand %p710_p0, %p698_p13  ;;  %p718_p5 = scmp.lt.s32.totalorder %s716_s21, %s709_s13 }
  0x17   : > { %p713_p2 = pneg %p712_p1  ;;  %p719_p3 = por %p718_p5, %p717_p4 }
  0x19   : > { %p720_p6 = pnand %p719_p3, %p713_p2 }
  0x1b   : > { %723 = shalt.err (!%p720_p6)
}
  0x1c   : > { %s777_s23 = smov 256   ;;  %s778_s24 = smov 128  }
  0x1d   : > { %s779_s25 = smov 8   ;;  %p203_p7 = scmp.lt.s32.totalorder %s774_s20, 3 }
  0x1e   : > { %630 = dma.hbm_to_vmem [thread:$0]  (!%p868_p11), %s194_s8, 1024, %s196_s10, %s185_s12, %s777_s23, %s778_s24, %s779_s25  }
  0x1f   : > { %p204_p10 = pnand %p578_p12, %p203_p7 }
  0x20   : > { %s881_s29 = sand.u32 (!%p204_p10), 1, %s758_s16  }
  0x21   : > { %207 = sbr.rel (%p204_p10) target bundleno = 267 (0x10b), region = 36  ;;  %s579_s30 = sshll.u32 (!%p204_p10), %s881_s29, 6 }
  0x22   : > { %s210_s5 = scalar_lea.sflag (!%p204_p10), [#allocation3], %s881_s29  ;;  %s885_s6 = scalar_lea.vmem (!%p204_p10), [#allocation2], %s579_s30 }
  0x26   : > { %749 = dma.done.wait (%p849_p8), %s210_s5, 1024  }
  0x27   : > { %751 = vsyncadd (%p849_p8), %s210_s5, 4294966272  ;;  %v780_v0 = vmov 0   ;;  %v684_v1 = vld [vmem:[%s885_s6 + $0x34] ss:$8 sps:$4 sm:$0xff]   ;;  %v686_v2 = vld [vmem:[%s885_s6 + $0x30] ss:$8 sps:$4 sm:$0xff]  }
  0x28   : > { %375 = vmatprep.mubr.bf16.mxu0 %v780_v0  ;;  %385 = vmatprep.mubr.bf16.mxu1 %v780_v0  ;;  %v687_v3 = vld [vmem:[%s885_s6 + $0x24] ss:$8 sps:$4 sm:$0xff]   ;;  %v689_v4 = vld [vmem:[%s885_s6 + $0x20] ss:$8 sps:$4 sm:$0xff]   ;;  %v690_v5 = vld [vmem:[%s885_s6 + $0x14] ss:$8 sps:$4 sm:$0xff]  }
  0x29   : > { %351 = vmatprep.subr.bf16.mxu0 %v684_v1  ;;  %617 = vmatprep.subr.bf16.mxu1 %v684_v1  ;;  %v609_v6 = vld [vmem:[%s936_s0] sm:$0xff]   ;;  %v616_v10 = vld [vmem:[%s936_s0 + $0x8] sm:$0xff]   ;;  %v692_v11 = vld [vmem:[%s885_s6 + $0x10] ss:$8 sps:$4 sm:$0xff]   ;;  %vm336_vm0 = vcmask 523264   ;;  %s580_s14 = sshll.u32 %s881_s29, 5 }
  0x2a   : > { %352 = vmatpush1.bf16.msra.mxu0 %v686_v2  ;;  %621 = vmatpush1.bf16.msra.mxu1 %v686_v2  ;;  %v581_v7 = vld [vmem:[%s937_s1] ss:$0 sm:$0xff]  ;;  %v610_v8 = vunpack.c.l.bf16 %v609_v6  ;;  %v611_v9 = vunpack.c.h.bf16 %v609_v6  ;;  %v614_v13 = vunpack.c.l.bf16 %v616_v10  ;;  %v615_v14 = vunpack.c.h.bf16 %v616_v10  ;;  %v693_v15 = vld [vmem:[%s885_s6 + $0x4] ss:$8 sps:$4 sm:$0xff]   ;;  %s241_s15 = scalar_lea.vmem [#allocation4], %s580_s14  ;;  %s607_s21 = sshll.u32 (%p856_p9), %s766_s18, 3 }
  0x2b   : > { %353 = vmatprep.subr.bf16.mxu0 %v687_v3  ;;  %618 = vmatprep.subr.bf16.mxu1 %v687_v3  ;;  %v582_v12 = vld [vmem:[%s938_s2] ss:$0 sm:$0xff]  ;;  %s436_s25 = scalar_lea.vmem (%p856_p9), %s940_s4, %s607_s21 }
  0x2c   : > { %v267_v16 = vmul.f32 %v610_v8, %v581_v7  ;;  %v268_v17 = vmul.f32 %v611_v9, %v581_v7  ;;  %v269_v18 = vmul.f32 %v614_v13, %v581_v7  ;;  %v270_v19 = vmul.f32 %v615_v14, %v581_v7  ;;  %v695_v22 = vld [vmem:[%s885_s6] ss:$8 sps:$4 sm:$0xff]  }
  0x2e   : > { %354 = vmatpush1.bf16.msra.mxu0 %v689_v4  ;;  %622 = vmatpush1.bf16.msra.mxu1 %v689_v4  ;;  %v278_v20 = vadd.f32 %v582_v12, %v267_v16  ;;  %v279_v21 = vadd.f32 %v582_v12, %v268_v17  ;;  %v280_v23 = vadd.f32 %v582_v12, %v269_v18 }
  0x2f   : > { %355 = vmatprep.subr.bf16.mxu0 %v690_v5  ;;  %619 = vmatprep.subr.bf16.mxu1 %v690_v5  ;;  %v281_v24 = vadd.f32 %v582_v12, %v270_v19 }
  0x30   : > { %v282_v25 = vmax.f32 %v278_v20, 0.0  ;;  %v283_v26 = vmax.f32 %v279_v21, 0.0  ;;  %v284_v27 = vmax.f32 %v280_v23, 0.0 }
  0x31   : > { %v285_v28 = vmax.f32 %v281_v24, 0.0 }
  0x32   : > { %356 = vmatpush1.bf16.msra.mxu0 %v692_v11  ;;  %623 = vmatpush1.bf16.msra.mxu1 %v692_v11  ;;  %v286_v29 = vpack.c.bf16 %v283_v26, %v282_v25 }
  0x33   : > { %357 = vmatprep.subr.bf16.mxu0 %v693_v15  ;;  %620 = vmatprep.subr.bf16.mxu1 %v693_v15  ;;  %v287_v30 = vpack.c.bf16 %v285_v28, %v284_v27 }
  0x36   : > { %358 = vmatpush1.bf16.msra.mxu0 %v695_v22  ;;  %624 = vmatpush1.bf16.msra.mxu1 %v695_v22 }
  0x39   : > { %591 = vmatmul.mubr.msk.bf16.vlgmr.msra.gmra.mxu0 %vm336_vm0, %v286_v29  ;;  %592 = vmatmul.mubr.msk.bf16.vlgmr.msra.gmra.mxu1 %vm336_vm0, %v287_v30 }
  0xf9   : > { %v377_v31 = vpop.f32.mrf.mxu0  ;;  %v387_v32 = vpop.f32.mrf.mxu1 }
  0xfb   : > { %v379_v33 = vpop.f32.mrf.mxu0  ;;  %v389_v34 = vpop.f32.mrf.mxu1 }
  0xfc   : > { %v603_v35 = vpack.c.bf16 %v379_v33, %v377_v31  ;;  %v605_v36 = vpack.c.bf16 %v389_v34, %v387_v32 }
  0xfd   : > { %v381_v37 = vpop.f32.mrf.mxu0  ;;  %v391_v38 = vpop.f32.mrf.mxu1 }
  0xfe   : > { %420 = vst [vmem:[%s241_s15] sm:$0xff] %v603_v35  ;;  %422 = vst [vmem:[%s241_s15 + $0x10] sm:$0xff] %v605_v36  ;;  %430 = sbr.rel (!%p856_p9) target bundleno = 267 (0x10b), region = 44 }
  0xff   : > { %v383_v39 = vpop.f32.mrf.mxu0  ;;  %v393_v40 = vpop.f32.mrf.mxu1 }
 0x100   : > { %v604_v41 = vpack.c.bf16 %v383_v39, %v381_v37  ;;  %v606_v42 = vpack.c.bf16 %v393_v40, %v391_v38 }
 0x102   : > { %421 = vst [vmem:[%s241_s15 + $0x8] sm:$0xff] %v604_v41  ;;  %423 = vst [vmem:[%s241_s15 + $0x18] sm:$0xff] %v606_v42 }
 0x105   : > { %v471_v43 = vld [vmem:[%s241_s15] sm:$0xff]  ;;  %v475_v45 = vld [vmem:[%s241_s15 + $0x10] sm:$0xff] }
 0x106   : > { %472 = vst [vmem:[%s436_s25] sm:$0xff] %v471_v43  ;;  %476 = vst [vmem:[%s436_s25 + $0x20] sm:$0xff] %v475_v45 }
 0x109   : > { %v473_v44 = vld [vmem:[%s241_s15 + $0x8] sm:$0xff]  ;;  %v477_v46 = vld [vmem:[%s241_s15 + $0x18] sm:$0xff] }
 0x10a   : > { %474 = vst [vmem:[%s436_s25 + $0x10] sm:$0xff] %v473_v44  ;;  %478 = vst [vmem:[%s436_s25 + $0x30] sm:$0xff] %v477_v46 }
 0x10b PF: > { %s17_s20 = sadd.s32 1, %s774_s20   ;;  %s945_s15 = smov %s758_s16 }
 0x10c   : > { %p14_p8 = scmp.ge.s32.totalorder %s17_s20, 4   ;;  %s946_s16 = smov %s762_s17 }
 0x10d   : > { %s947_s17 = smov %s854_s27  ;;  %s948_s18 = smov %s770_s19 }
 0x10e   : > { %s949_s19 = smov %s951_s22  ;;  %16 = sbr.rel (!%p14_p8) target bundleno = 4 (0x4), region = 117 }
 0x113   :  { %494 = vsyncpa [#allocation3], 1 }
 0x114   :  { %496 = vsyncpa [#allocation3 + $0x1], 1 }

// kernel: _lambda_.5
= control target key start
LH: loop header
LB: loop body
LE: loop exit
PB: predicated region body
PF: predicated region fallthrough
CT: control target
= control target key end

     0   :  { %7 = vsyncpa [#allocation3], 0  ;;  %s733_s0 = inlined_call_operand.vmem [shape: f32[8,16], index: 0, kind: input, shape index: {}]   ;;  %s734_s1 = inlined_call_operand.hbm [shape: bf16[16,1024], index: 1, kind: input, shape index: {}]   ;;  %s735_s2 = inlined_call_operand.vmem [shape: bf16[8,1024], index: 2, kind: output, shape index: {}]  }
   0x1   :  { %9 = vsyncpa [#allocation3 + $0x1], 0  ;;  %s633_s9 = smov 0   ;;  %s635_s10 = smov 0  }
   0x2   :  { %s637_s11 = smov 0   ;;  %s639_s12 = smov 0  }
   0x3   :  { %s641_s13 = smov 0   ;;  %s643_s14 = smov 0  }
   0x4 LB: > { %s443_s15 = sadd.s32 4294967295, %s611_s14   ;;  %s24_s16 = sadd.s32 1, %s607_s13  ;;  %s611_s14 = sphi %s643_s14, %s15_s14   ;;  %s607_s13 = sphi %s641_s13, %s743_s13   ;;  %s603_s12 = sphi %s639_s12, %s742_s12   ;;  %s599_s11 = sphi %s637_s11, %s741_s11   ;;  %s595_s10 = sphi %s635_s10, %s740_s10   ;;  %s591_s9 = sphi %s633_s9, %s739_s9  }
   0x5   : > { %p25_p0 = scmp.ge.s32.totalorder %s24_s16, 2  ;;  %s60_s17 = sadd.s32 1, %s599_s11 }
   0x6   : > { %p67_p1 = scmp.ne.s32.totalorder %s599_s11, %s595_s10  ;;  %p68_p2 = scmp.eq.s32.totalorder %s611_s14, 0 }
   0x7   : > { %s745_s16 = smov (%p25_p0, %s24_s16), 0  ;;  %p73_p4 = scmp.ne.s32.totalorder %s595_s10, %s591_s9 }
   0x8   : > { %p669_p3 = por %p68_p2, %p67_p1  ;;  %s57_s19 = ssub.s32 %s607_s13, %s745_s16 }
   0x9   : > { %p74_p5 = scmp.eq.s32.totalorder %s443_s15, 0  ;;  %p58_p6 = scmp.eq.s32.totalorder %s57_s19, 0 }
   0xa   : > { %p474_p8 = scmp.lt.s32.totalorder %s611_s14, 2  ;;  %s132_s22 = sand.u32 1, %s599_s11  }
   0xb   : > { %p676_p7 = por %p74_p5, %p73_p4  ;;  %s465_s23 = sshll.u32 %s607_s13, 8 }
   0xc   : > { %s682_s21 = scalar_select %p58_p6, %s599_s11, %s60_s17  }
   0xd   : > { %s448_s24 = sshll.u32 %s132_s22, 5  ;;  %s142_s27 = scalar_lea.hbm %s734_s1, %s465_s23 }
   0xe   : > { %s136_s28 = scalar_lea.vmem [#allocation2], %s448_s24  ;;  %p691_p9 = pnand %p474_p8, %p669_p3 }
   0xf   : > { %s143_s29 = sshll.u32 %s136_s28, 4  ;;  %p451_p10 = scmp.ge.s32.totalorder %s611_s14, 1  ;;  %s144_s29 = int_to_ptr.vmem [resolvable:$true] %s143_s29 }
  0x10   : > { %s133_s3 = scalar_lea.sflag [#allocation3], %s132_s22  ;;  %p535_p11 = pneg %p691_p9 }
  0x11   : > { %s546_s4 = scalar_lea.vmem %s144_s29, 512  ;;  %s613_s5 = smov [#allocation2]  }
  0x12   : > { %p547_p12 = scmp.ne.s32.totalorder %s144_s29, %s546_s4  ;;  %s551_s6 = sshll.u32 %s613_s5, 4  ;;  %s552_s6 = int_to_ptr.vmem [resolvable:$false] %s551_s6 }
  0x13   : > { %s553_s7 = scalar_lea.vmem %s552_s6, 1024  ;;  %p554_p1 = scmp.lt.s32.totalorder %s144_s29, %s552_s6 }
  0x14   : > { %p549_p13 = pnand %p547_p12, %p535_p11  ;;  %p555_p2 = scmp.lt.s32.totalorder %s553_s7, %s546_s4 }
  0x16   : > { %p550_p0 = pneg %p549_p13  ;;  %p556_p3 = por %p555_p2, %p554_p1 }
  0x18   : > { %p557_p4 = pnand %p556_p3, %p550_p0 }
  0x1a   : > { %560 = shalt.err (!%p557_p4)
}
  0x1b   : > { %s614_s8 = smov 512   ;;  %s615_s9 = smov 256  }
  0x1c   : > { %s616_s15 = smov 16   ;;  %p151_p5 = scmp.lt.s32.totalorder %s611_s14, 3 }
  0x1d   : > { %473 = dma.hbm_to_vmem [thread:$0]  (!%p691_p9), %s142_s27, 512, %s144_s29, %s133_s3, %s614_s8, %s615_s9, %s616_s15  }
  0x1e   : > { %p152_p6 = pnand %p451_p10, %p151_p5 }
  0x1f   : > { %s157_s17 = sand.u32 (!%p152_p6), 1, %s595_s10  }
  0x20   : > { %155 = sbr.rel (%p152_p6) target bundleno = 243 (0xf3), region = 28  ;;  %s452_s18 = sshll.u32 (!%p152_p6), %s157_s17, 5 }
  0x21   : > { %s158_s19 = scalar_lea.sflag (!%p152_p6), [#allocation3], %s157_s17  ;;  %s161_s22 = scalar_lea.vmem (!%p152_p6), [#allocation2], %s452_s18 }
  0x25   : > { %586 = dma.done.wait (%p676_p7), %s158_s19, 512  }
  0x26   : > { %588 = vsyncadd (%p676_p7), %s158_s19, 4294966784  ;;  %v617_v0 = vmov 0   ;;  %v527_v1 = vld [vmem:[%s161_s22 + $0x4] ss:$16 sps:$4 sm:$0xff]   ;;  %v529_v2 = vld [vmem:[%s161_s22 + $0xc] ss:$16 sps:$4 sm:$0xff]  }
  0x27   : > { %268 = vmatprep.mubr.bf16.mxu0 %v617_v0  ;;  %309 = vmatprep.mubr.bf16.mxu1 %v617_v0  ;;  %v531_v3 = vld [vmem:[%s161_s22] ss:$16 sps:$4 sm:$0xff]   ;;  %v532_v4 = vld [vmem:[%s161_s22 + $0x8] ss:$16 sps:$4 sm:$0xff]   ;;  %vm232_vm0 = vcmask 130048   ;;  %s453_s20 = sshll.u32 %s603_s12, 2 }
  0x28   : > { %250 = vmatprep.subr.bf16.mxu0 %v527_v1  ;;  %v206_v5 = vld [vmem:[%s733_s0] sm:$0xff]  ;;  %291 = vmatprep.subr.bf16.mxu1 %v529_v2  ;;  %p198_p7 = scmp.lt.s32.totalorder %s453_s20, 7 }
  0x29   : > { %v207_v6 = vpack.c.bf16 %v206_v5, %v206_v5  ;;  %251 = vmatpush1.bf16.msra.mxu0 %v531_v3  ;;  %292 = vmatpush1.bf16.msra.mxu1 %v532_v4 }
  0x2a   : > { %s747_s20 = smov (!%p198_p7, %s453_s20), 7 }
  0x2b   : > { %s454_s25 = sshll.u32 %s747_s20, 2 }
  0x2c   : > { %459 = vmatmul.mubr.msk.bf16.vlgmr.msra.gmra.mxu0 %vm232_vm0, %v207_v6  ;;  %460 = vmatmul.mubr.msk.bf16.vlgmr.msra.gmra.mxu1 %vm232_vm0, %v207_v6  ;;  %s203_s28 = scalar_lea.vmem %s735_s2, %s454_s25 }
  0xec   : > { %v270_v7 = vpop.f32.mrf.mxu0  ;;  %v311_v8 = vpop.f32.mrf.mxu1 }
  0xee   : > { %v272_v9 = vpop.f32.mrf.mxu0  ;;  %v313_v10 = vpop.f32.mrf.mxu1 }
  0xef   : > { %v466_v11 = vpack.c.bf16 %v272_v9, %v270_v7  ;;  %v467_v12 = vpack.c.bf16 %v313_v10, %v311_v8 }
  0xf0   : > { %v274_v13 = vpop.f32.mrf.mxu0  ;;  %v315_v14 = vpop.f32.mrf.mxu1 }
  0xf1   : > { %334 = vst [vmem:[%s203_s28] sm:$0xff] %v466_v11  ;;  %335 = vst [vmem:[%s203_s28 + $0x8] sm:$0xff] %v467_v12 }
  0xf2   : > { %v275_v15 = vpop.f32.mrf.mxu0  ;;  %v316_v16 = vpop.f32.mrf.mxu1 }
  0xf3 PF: > { %s15_s14 = sadd.s32 1, %s611_s14   ;;  %s739_s9 = smov %s595_s10 }
  0xf4   : > { %p12_p8 = scmp.ge.s32.totalorder %s15_s14, 4   ;;  %s740_s10 = smov %s599_s11 }
  0xf5   : > { %s741_s11 = smov %s682_s21  ;;  %s742_s12 = smov %s607_s13 }
  0xf6   : > { %s743_s13 = smov %s745_s16  ;;  %14 = sbr.rel (!%p12_p8) target bundleno = 4 (0x4), region = 71 }
  0xfb   :  { %366 = vsyncpa [#allocation3], 1 }
  0xfc   :  { %368 = vsyncpa [#allocation3 + $0x1], 1 }

// kernel: _lambda_.7
= control target key start
LH: loop header
LB: loop body
LE: loop exit
PB: predicated region body
PF: predicated region fallthrough
CT: control target
= control target key end

     0   :  { %9 = vsyncpa [#allocation3], 0  ;;  %s534_s15 = smov [#allocation2]   ;;  %s696_s0 = inlined_call_operand.vmem [shape: bf16[128,32], index: 0, kind: input, shape index: {}]   ;;  %s697_s1 = inlined_call_operand.vmem [shape: f32[1,32], index: 1, kind: input, shape index: {}]   ;;  %s698_s2 = inlined_call_operand.vmem [shape: f32[1,32], index: 2, kind: input, shape index: {}]   ;;  %s699_s3 = inlined_call_operand.hbm [shape: bf16[32,256], index: 3, kind: input, shape index: {}]   ;;  %s700_s4 = inlined_call_operand.vmem [shape: bf16[128,256], index: 4, kind: output, shape index: {}]  }
   0x1   :  { %s21_s16 = sshll.u32 %s534_s15, 4  ;;  %s22_s16 = int_to_ptr.vmem [resolvable:$true] %s21_s16 }
   0x2   :  { %s520_s17 = scalar_lea.vmem %s22_s16, 512  ;;  %p525_p1 = scmp.lt.s32.totalorder %s22_s16, %s22_s16 }
   0x3   :  { %p521_p0 = scmp.ne.s32.totalorder %s22_s16, %s520_s17  ;;  %p526_p2 = scmp.lt.s32.totalorder %s520_s17, %s520_s17 }
   0x5   :  { %p527_p3 = por %p526_p2, %p525_p1 }
   0x7   :  { %p528_p4 = pnand %p527_p3, %p521_p0 }
   0x9   :  { %531 = shalt.err (!%p528_p4)
}
   0xa   :  { %s535_s18 = smov 128   ;;  %s536_s19 = smov 8  }
   0xb   :  { %27 = dma.hbm_to_vmem [thread:$0]  %s699_s3, 512, %s22_s16, [#allocation3], %s535_s18, %s535_s18, %s536_s19  }
   0xc   :  { %532 = dma.done.wait [#allocation3], 512  }
   0xd   :  { %533 = vsyncadd [#allocation3], 4294966784  ;;  %v537_v0 = vmov 0   ;;  %v506_v1 = vld [vmem:[#allocation2 + $0x14] ss:$8 sps:$4 sm:$0xff]   ;;  %v460_v5 = vld [vmem:[%s696_s0] sm:$0xff]  }
   0xe   :  { %215 = vmatprep.mubr.bf16.mxu0 %v537_v0  ;;  %255 = vmatprep.mubr.bf16.mxu1 %v537_v0  ;;  %v508_v2 = vld [vmem:[#allocation2 + $0x10] ss:$8 sps:$4 sm:$0xff]   ;;  %v509_v3 = vld [vmem:[#allocation2 + $0x4] ss:$8 sps:$4 sm:$0xff]   ;;  %v511_v4 = vld [vmem:[#allocation2] ss:$8 sps:$4 sm:$0xff]   ;;  %v461_v6 = vunpack.c.l.bf16 %v460_v5  ;;  %v462_v7 = vunpack.c.h.bf16 %v460_v5 }
   0xf   :  { %195 = vmatprep.subr.bf16.mxu0 %v506_v1  ;;  %498 = vmatprep.subr.bf16.mxu1 %v506_v1  ;;  %v574_v8 = vld [vmem:[%s697_s1] ss:$0 sm:$0xff]  ;;  %vm158_vm0 = vcmask 261120   ;;  %v491_v13 = vld [vmem:[%s696_s0 + $0x8] sm:$0xff]   ;;  %v492_v15 = vld [vmem:[%s696_s0 + $0x10] sm:$0xff]  }
  0x10   :  { %196 = vmatpush1.bf16.msra.mxu0 %v508_v2  ;;  %500 = vmatpush1.bf16.msra.mxu1 %v508_v2  ;;  %v579_v9 = vld [vmem:[%s698_s2] ss:$0 sm:$0xff]  ;;  %v495_v14 = vld [vmem:[%s696_s0 + $0x28] sm:$0xff]   ;;  %v71_v16 = vmul.f32 %v461_v6, %v574_v8  ;;  %v72_v17 = vmul.f32 %v462_v7, %v574_v8  ;;  %v465_v18 = vunpack.c.l.bf16 %v491_v13  ;;  %v466_v19 = vunpack.c.h.bf16 %v491_v13  ;;  %v496_v40 = vld [vmem:[%s696_s0 + $0x30] sm:$0xff]  }
  0x11   :  { %v494_v10 = vld [vmem:[%s696_s0 + $0x20] sm:$0xff]   ;;  %197 = vmatprep.subr.bf16.mxu0 %v509_v3  ;;  %499 = vmatprep.subr.bf16.mxu1 %v509_v3  ;;  %v481_v22 = vunpack.c.l.bf16 %v495_v14  ;;  %v482_v23 = vunpack.c.h.bf16 %v495_v14  ;;  %v469_v27 = vunpack.c.l.bf16 %v492_v15  ;;  %v470_v44 = vunpack.c.h.bf16 %v492_v15  ;;  %v493_v53 = vld [vmem:[%s696_s0 + $0x18] sm:$0xff]  }
  0x12   :  { %v477_v11 = vunpack.c.l.bf16 %v494_v10  ;;  %v478_v12 = vunpack.c.h.bf16 %v494_v10  ;;  %v94_v24 = vadd.f32 %v579_v9, %v71_v16  ;;  %v95_v25 = vadd.f32 %v579_v9, %v72_v17  ;;  %v497_v56 = vld [vmem:[%s696_s0 + $0x38] sm:$0xff]  }
  0x13   :  { %v73_v26 = vmul.f32 %v465_v18, %v574_v8  ;;  %v74_v30 = vmul.f32 %v466_v19, %v574_v8  ;;  %v81_v31 = vmul.f32 %v481_v22, %v574_v8  ;;  %v82_v35 = vmul.f32 %v482_v23, %v574_v8 }
  0x14   :  { %v79_v20 = vmul.f32 %v477_v11, %v574_v8  ;;  %v80_v21 = vmul.f32 %v478_v12, %v574_v8  ;;  %198 = vmatpush1.bf16.msra.mxu0 %v511_v4  ;;  %501 = vmatpush1.bf16.msra.mxu1 %v511_v4  ;;  %v110_v32 = vmax.f32 %v94_v24, 0.0  ;;  %v111_v33 = vmax.f32 %v95_v25, 0.0 }
  0x15   :  { %v96_v34 = vadd.f32 %v579_v9, %v73_v26  ;;  %v97_v38 = vadd.f32 %v579_v9, %v74_v30  ;;  %v104_v39 = vadd.f32 %v579_v9, %v81_v31  ;;  %v105_v43 = vadd.f32 %v579_v9, %v82_v35 }
  0x16   :  { %v102_v28 = vadd.f32 %v579_v9, %v79_v20  ;;  %v103_v29 = vadd.f32 %v579_v9, %v80_v21  ;;  %v126_v41 = vpack.c.bf16 %v111_v33, %v110_v32  ;;  %v75_v48 = vmul.f32 %v469_v27, %v574_v8 }
  0x17   :  { %v112_v42 = vmax.f32 %v96_v34, 0.0  ;;  %v113_v46 = vmax.f32 %v97_v38, 0.0  ;;  %v120_v47 = vmax.f32 %v104_v39, 0.0  ;;  %v121_v49 = vmax.f32 %v105_v43, 0.0 }
  0x18   :  { %v118_v36 = vmax.f32 %v102_v28, 0.0  ;;  %v119_v37 = vmax.f32 %v103_v29, 0.0  ;;  %419 = vmatmul.mubr.msk.bf16.vlgmr.msra.gmra.mxu0 %vm158_vm0, %v126_v41  ;;  %v76_v50 = vmul.f32 %v470_v44, %v574_v8  ;;  %v485_v51 = vunpack.c.l.bf16 %v496_v40 }
  0x19   :  { %v486_v52 = vunpack.c.h.bf16 %v496_v40  ;;  %225 = vmatprep.mubr.bf16.mxu0 %v537_v0  ;;  %v127_v57 = vpack.c.bf16 %v113_v46, %v112_v42  ;;  %v98_v58 = vadd.f32 %v579_v9, %v75_v48  ;;  %v131_v59 = vpack.c.bf16 %v121_v49, %v120_v47 }
  0x1a   :  { %v130_v45 = vpack.c.bf16 %v119_v37, %v118_v36  ;;  %v83_v54 = vmul.f32 %v485_v51, %v574_v8  ;;  %v99_v60 = vadd.f32 %v579_v9, %v76_v50  ;;  %v473_v61 = vunpack.c.l.bf16 %v493_v53 }
  0x1b   :  { %v84_v55 = vmul.f32 %v486_v52, %v574_v8  ;;  %v474_v62 = vunpack.c.h.bf16 %v493_v53  ;;  %v489_v2 = vunpack.c.l.bf16 %v497_v56  ;;  %v490_v3 = vunpack.c.h.bf16 %v497_v56 }
  0x1c   :  { %423 = vmatmul.mubr.msk.bf16.vlgmr.msra.gmra.mxu1 %vm158_vm0, %v130_v45  ;;  %v106_v63 = vadd.f32 %v579_v9, %v83_v54  ;;  %v114_v4 = vmax.f32 %v98_v58, 0.0  ;;  %v115_v5 = vmax.f32 %v99_v60, 0.0  ;;  %v77_v6 = vmul.f32 %v473_v61, %v574_v8 }
  0x1d   :  { %265 = vmatprep.mubr.bf16.mxu1 %v537_v0  ;;  %v107_v1 = vadd.f32 %v579_v9, %v84_v55  ;;  %v78_v7 = vmul.f32 %v474_v62, %v574_v8  ;;  %v85_v12 = vmul.f32 %v489_v2, %v574_v8  ;;  %v86_v13 = vmul.f32 %v490_v3, %v574_v8 }
  0x1e   :  { %v122_v10 = vmax.f32 %v106_v63, 0.0  ;;  %v128_v14 = vpack.c.bf16 %v115_v5, %v114_v4  ;;  %v100_v15 = vadd.f32 %v579_v9, %v77_v6 }
  0x1f   :  { %v123_v11 = vmax.f32 %v107_v1, 0.0  ;;  %v101_v16 = vadd.f32 %v579_v9, %v78_v7  ;;  %v108_v18 = vadd.f32 %v579_v9, %v85_v12  ;;  %v109_v19 = vadd.f32 %v579_v9, %v86_v13 }
  0x20   :  { %420 = vmatmul.mubr.msk.bf16.gmra.mxu0 %vm158_vm0, %v127_v57  ;;  %v116_v20 = vmax.f32 %v100_v15, 0.0 }
  0x21   :  { %235 = vmatprep.mubr.bf16.mxu0 %v537_v0  ;;  %v132_v17 = vpack.c.bf16 %v123_v11, %v122_v10  ;;  %v117_v21 = vmax.f32 %v101_v16, 0.0  ;;  %v124_v8 = vmax.f32 %v108_v18, 0.0  ;;  %v125_v22 = vmax.f32 %v109_v19, 0.0 }
  0x23   :  { %v129_v23 = vpack.c.bf16 %v117_v21, %v116_v20  ;;  %v133_v24 = vpack.c.bf16 %v125_v22, %v124_v8 }
  0x24   :  { %424 = vmatmul.mubr.msk.bf16.gmra.mxu1 %vm158_vm0, %v131_v59 }
  0x25   :  { %275 = vmatprep.mubr.bf16.mxu1 %v537_v0 }
  0x28   :  { %421 = vmatmul.mubr.msk.bf16.gmra.mxu0 %vm158_vm0, %v128_v14 }
  0x29   :  { %245 = vmatprep.mubr.bf16.mxu0 %v537_v0 }
  0x2c   :  { %425 = vmatmul.mubr.msk.bf16.gmra.mxu1 %vm158_vm0, %v132_v17 }
  0x2d   :  { %285 = vmatprep.mubr.bf16.mxu1 %v537_v0 }
  0x30   :  { %422 = vmatmul.mubr.msk.bf16.gmra.mxu0 %vm158_vm0, %v129_v23 }
  0x34   :  { %426 = vmatmul.mubr.msk.bf16.gmra.mxu1 %vm158_vm0, %v133_v24 }
  0xd8   :  { %v217_v25 = vpop.f32.mrf.mxu0 }
  0xda   :  { %v219_v26 = vpop.f32.mrf.mxu0 }
  0xdb   :  { %v443_v27 = vpack.c.bf16 %v219_v26, %v217_v25 }
  0xdc   :  { %v257_v9 = vpop.f32.mrf.mxu1  ;;  %v221_v30 = vpop.f32.mrf.mxu0 }
  0xdd   :  { %392 = vst [vmem:[%s700_s4] sm:$0xff] %v443_v27 }
  0xde   :  { %v259_v28 = vpop.f32.mrf.mxu1  ;;  %v223_v0 = vpop.f32.mrf.mxu0 }
  0xdf   :  { %v451_v29 = vpack.c.bf16 %v259_v28, %v257_v9  ;;  %v444_v32 = vpack.c.bf16 %v223_v0, %v221_v30 }
  0xe0   :  { %v261_v31 = vpop.f32.mrf.mxu1  ;;  %v227_v35 = vpop.f32.mrf.mxu0 }
  0xe1   :  { %400 = vst [vmem:[%s700_s4 + $0x40] sm:$0xff] %v451_v29  ;;  %393 = vst [vmem:[%s700_s4 + $0x8] sm:$0xff] %v444_v32 }
  0xe2   :  { %v263_v33 = vpop.f32.mrf.mxu1  ;;  %v229_v37 = vpop.f32.mrf.mxu0 }
  0xe3   :  { %v452_v34 = vpack.c.bf16 %v263_v33, %v261_v31  ;;  %v445_v38 = vpack.c.bf16 %v229_v37, %v227_v35 }
  0xe4   :  { %v267_v36 = vpop.f32.mrf.mxu1  ;;  %v231_v41 = vpop.f32.mrf.mxu0 }
  0xe5   :  { %401 = vst [vmem:[%s700_s4 + $0x48] sm:$0xff] %v452_v34  ;;  %394 = vst [vmem:[%s700_s4 + $0x10] sm:$0xff] %v445_v38 }
  0xe6   :  { %v269_v39 = vpop.f32.mrf.mxu1  ;;  %v233_v43 = vpop.f32.mrf.mxu0 }
  0xe7   :  { %v453_v40 = vpack.c.bf16 %v269_v39, %v267_v36  ;;  %v446_v44 = vpack.c.bf16 %v233_v43, %v231_v41 }
  0xe8   :  { %v271_v42 = vpop.f32.mrf.mxu1  ;;  %v237_v47 = vpop.f32.mrf.mxu0 }
  0xe9   :  { %402 = vst [vmem:[%s700_s4 + $0x50] sm:$0xff] %v453_v40  ;;  %395 = vst [vmem:[%s700_s4 + $0x18] sm:$0xff] %v446_v44 }
  0xea   :  { %v273_v45 = vpop.f32.mrf.mxu1  ;;  %v239_v49 = vpop.f32.mrf.mxu0 }
  0xeb   :  { %v454_v46 = vpack.c.bf16 %v273_v45, %v271_v42  ;;  %v447_v50 = vpack.c.bf16 %v239_v49, %v237_v47 }
  0xec   :  { %v277_v48 = vpop.f32.mrf.mxu1  ;;  %v241_v53 = vpop.f32.mrf.mxu0 }
  0xed   :  { %403 = vst [vmem:[%s700_s4 + $0x58] sm:$0xff] %v454_v46  ;;  %396 = vst [vmem:[%s700_s4 + $0x20] sm:$0xff] %v447_v50 }
  0xee   :  { %v279_v51 = vpop.f32.mrf.mxu1  ;;  %v243_v55 = vpop.f32.mrf.mxu0 }
  0xef   :  { %v455_v52 = vpack.c.bf16 %v279_v51, %v277_v48  ;;  %v448_v56 = vpack.c.bf16 %v243_v55, %v241_v53 }
  0xf0   :  { %v281_v54 = vpop.f32.mrf.mxu1  ;;  %v247_v59 = vpop.f32.mrf.mxu0 }
  0xf1   :  { %404 = vst [vmem:[%s700_s4 + $0x60] sm:$0xff] %v455_v52  ;;  %397 = vst [vmem:[%s700_s4 + $0x28] sm:$0xff] %v448_v56 }
  0xf2   :  { %v283_v57 = vpop.f32.mrf.mxu1  ;;  %v249_v61 = vpop.f32.mrf.mxu0 }
  0xf3   :  { %v456_v58 = vpack.c.bf16 %v283_v57, %v281_v54  ;;  %v449_v62 = vpack.c.bf16 %v249_v61, %v247_v59 }
  0xf4   :  { %v287_v60 = vpop.f32.mrf.mxu1  ;;  %v251_v2 = vpop.f32.mrf.mxu0 }
  0xf5   :  { %405 = vst [vmem:[%s700_s4 + $0x68] sm:$0xff] %v456_v58  ;;  %398 = vst [vmem:[%s700_s4 + $0x30] sm:$0xff] %v449_v62 }
  0xf6   :  { %v289_v63 = vpop.f32.mrf.mxu1  ;;  %v253_v4 = vpop.f32.mrf.mxu0 }
  0xf7   :  { %v457_v1 = vpack.c.bf16 %v289_v63, %v287_v60  ;;  %v450_v5 = vpack.c.bf16 %v253_v4, %v251_v2 }
  0xf8   :  { %v291_v3 = vpop.f32.mrf.mxu1 }
  0xf9   :  { %406 = vst [vmem:[%s700_s4 + $0x70] sm:$0xff] %v457_v1  ;;  %399 = vst [vmem:[%s700_s4 + $0x38] sm:$0xff] %v450_v5 }
  0xfa   :  { %v293_v6 = vpop.f32.mrf.mxu1 }
  0xfb   :  { %v458_v7 = vpack.c.bf16 %v293_v6, %v291_v3 }
  0xfd   :  { %407 = vst [vmem:[%s700_s4 + $0x78] sm:$0xff] %v458_v7 }
  0xfe   :  { %412 = vsyncpa [#allocation3], 1 }

// kernel: _lambda_.8
= control target key start
LH: loop header
LB: loop body
LE: loop exit
PB: predicated region body
PF: predicated region fallthrough
CT: control target
= control target key end

     0   :  { %v1627_v1 = vmov 0   ;;  %vm396_vm0 = vcmask 130048   ;;  %s2149_s3 = inlined_call_operand.vmem [shape: bf16[16,256], index: 3, kind: input, shape index: {}]   ;;  %s2150_s0 = inlined_call_operand.vmem [shape: bf16[512,16], index: 0, kind: input, shape index: {}]   ;;  %s2151_s1 = inlined_call_operand.vmem [shape: f32[1,16], index: 1, kind: input, shape index: {}]   ;;  %s2152_s2 = inlined_call_operand.vmem [shape: f32[1,16], index: 2, kind: input, shape index: {}]   ;;  %s2153_s4 = inlined_call_operand.vmem [shape: bf16[512,256], index: 4, kind: output, shape index: {}]  }
   0x1   :  { %v1624_v0 = vld [vmem:[%s2149_s3 + $0x4] ss:$8 sps:$4 sm:$0xff]   ;;  %525 = vmatprep.mubr.bf16.mxu0 %v1627_v1  ;;  %685 = vmatprep.mubr.bf16.mxu1 %v1627_v1  ;;  %v1626_v2 = vld [vmem:[%s2149_s3] ss:$8 sps:$4 sm:$0xff]   ;;  %v1591_v29 = vld [vmem:[%s2150_s0 + $0x10] sm:$0xff]  }
   0x2   :  { %v1463_v3 = vld [vmem:[%s2150_s0] sm:$0xff]   ;;  %507 = vmatprep.subr.bf16.mxu0 %v1624_v0  ;;  %1621 = vmatprep.subr.bf16.mxu1 %v1624_v0  ;;  %v1590_v8 = vld [vmem:[%s2150_s0 + $0x8] sm:$0xff]   ;;  %v1607_v34 = vld [vmem:[%s2150_s0 + $0x90] sm:$0xff]   ;;  %v1472_v40 = vunpack.c.l.bf16 %v1591_v29  ;;  %v1473_v42 = vunpack.c.h.bf16 %v1591_v29 }
   0x3   :  { %v1667_v4 = vld [vmem:[%s2151_s1] ss:$0 sm:$0xff]  ;;  %v1464_v5 = vunpack.c.l.bf16 %v1463_v3  ;;  %v1465_v6 = vunpack.c.h.bf16 %v1463_v3  ;;  %508 = vmatpush1.bf16.msra.mxu0 %v1626_v2  ;;  %1622 = vmatpush1.bf16.msra.mxu1 %v1626_v2  ;;  %v1468_v12 = vunpack.c.l.bf16 %v1590_v8  ;;  %v1469_v13 = vunpack.c.h.bf16 %v1590_v8  ;;  %v1606_v14 = vld [vmem:[%s2150_s0 + $0x88] sm:$0xff]   ;;  %v1592_v48 = vld [vmem:[%s2150_s0 + $0x18] sm:$0xff]  }
   0x4   :  { %v1605_v7 = vld [vmem:[%s2150_s0 + $0x80] sm:$0xff]   ;;  %v1532_v17 = vunpack.c.l.bf16 %v1606_v14  ;;  %v1533_v18 = vunpack.c.h.bf16 %v1606_v14  ;;  %v1536_v43 = vunpack.c.l.bf16 %v1607_v34  ;;  %v157_v46 = vmul.f32 %v1472_v40, %v1667_v4  ;;  %v1608_v53 = vld [vmem:[%s2150_s0 + $0x98] sm:$0xff]  }
   0x5   :  { %v1678_v9 = vld [vmem:[%s2152_s2] ss:$0 sm:$0xff]  ;;  %v1528_v10 = vunpack.c.l.bf16 %v1605_v7  ;;  %v1529_v11 = vunpack.c.h.bf16 %v1605_v7  ;;  %v153_v15 = vmul.f32 %v1464_v5, %v1667_v4  ;;  %v154_v16 = vmul.f32 %v1465_v6, %v1667_v4 }
   0x6   :  { %v155_v21 = vmul.f32 %v1468_v12, %v1667_v4  ;;  %v156_v22 = vmul.f32 %v1469_v13, %v1667_v4  ;;  %v187_v25 = vmul.f32 %v1532_v17, %v1667_v4  ;;  %v188_v26 = vmul.f32 %v1533_v18, %v1667_v4  ;;  %v1593_v12 = vld [vmem:[%s2150_s0 + $0x20] sm:$0xff]  }
   0x7   :  { %v185_v19 = vmul.f32 %v1528_v10, %v1667_v4  ;;  %v186_v20 = vmul.f32 %v1529_v11, %v1667_v4  ;;  %v224_v23 = vadd.f32 %v1678_v9, %v153_v15  ;;  %v225_v24 = vadd.f32 %v1678_v9, %v154_v16  ;;  %v1609_v13 = vld [vmem:[%s2150_s0 + $0xa0] sm:$0xff]  }
   0x8   :  { %v226_v32 = vadd.f32 %v1678_v9, %v155_v21  ;;  %v227_v33 = vadd.f32 %v1678_v9, %v156_v22  ;;  %v258_v37 = vadd.f32 %v1678_v9, %v187_v25  ;;  %v259_v38 = vadd.f32 %v1678_v9, %v188_v26 }
   0x9   :  { %v256_v27 = vadd.f32 %v1678_v9, %v185_v19  ;;  %v257_v28 = vadd.f32 %v1678_v9, %v186_v20  ;;  %v288_v30 = vmax.f32 %v224_v23, 0.0  ;;  %v289_v31 = vmax.f32 %v225_v24, 0.0 }
   0xa   :  { %v290_v44 = vmax.f32 %v226_v32, 0.0  ;;  %v291_v45 = vmax.f32 %v227_v33, 0.0  ;;  %v1537_v47 = vunpack.c.h.bf16 %v1607_v34  ;;  %v322_v49 = vmax.f32 %v258_v37, 0.0  ;;  %v1610_v33 = vld [vmem:[%s2150_s0 + $0xa8] sm:$0xff]  }
   0xb   :  { %v320_v35 = vmax.f32 %v256_v27, 0.0  ;;  %v321_v36 = vmax.f32 %v257_v28, 0.0  ;;  %v352_v39 = vpack.c.bf16 %v289_v31, %v288_v30  ;;  %v323_v50 = vmax.f32 %v259_v38, 0.0  ;;  %v1594_v28 = vld [vmem:[%s2150_s0 + $0x28] sm:$0xff]  }
   0xc   :  { %v158_v51 = vmul.f32 %v1473_v42, %v1667_v4  ;;  %v189_v52 = vmul.f32 %v1536_v43, %v1667_v4  ;;  %v190_v54 = vmul.f32 %v1537_v47, %v1667_v4  ;;  %v1476_v55 = vunpack.c.l.bf16 %v1592_v48 }
   0xd   :  { %v368_v41 = vpack.c.bf16 %v321_v36, %v320_v35  ;;  %1302 = vmatmul.mubr.msk.bf16.vlgmr.msra.gmra.mxu0 %vm396_vm0, %v352_v39  ;;  %v1477_v56 = vunpack.c.h.bf16 %v1592_v48  ;;  %v353_v57 = vpack.c.bf16 %v291_v45, %v290_v44  ;;  %v228_v58 = vadd.f32 %v1678_v9, %v157_v46 }
   0xe   :  { %535 = vmatprep.mubr.bf16.mxu0 %v1627_v1  ;;  %v229_v59 = vadd.f32 %v1678_v9, %v158_v51  ;;  %v1540_v60 = vunpack.c.l.bf16 %v1608_v53  ;;  %v369_v61 = vpack.c.bf16 %v323_v50, %v322_v49  ;;  %v260_v62 = vadd.f32 %v1678_v9, %v189_v52  ;;  %v1595_v49 = vld [vmem:[%s2150_s0 + $0x30] sm:$0xff]  }
   0xf   :  { %1318 = vmatmul.mubr.msk.bf16.vlgmr.msra.gmra.mxu1 %vm396_vm0, %v368_v41  ;;  %v261_v63 = vadd.f32 %v1678_v9, %v190_v54  ;;  %v1541_v0 = vunpack.c.h.bf16 %v1608_v53  ;;  %v159_v2 = vmul.f32 %v1476_v55, %v1667_v4  ;;  %v160_v3 = vmul.f32 %v1477_v56, %v1667_v4  ;;  %v1611_v53 = vld [vmem:[%s2150_s0 + $0xb0] sm:$0xff]  }
  0x10   :  { %695 = vmatprep.mubr.bf16.mxu1 %v1627_v1  ;;  %v292_v5 = vmax.f32 %v228_v58, 0.0  ;;  %v293_v6 = vmax.f32 %v229_v59, 0.0  ;;  %v191_v7 = vmul.f32 %v1540_v60, %v1667_v4  ;;  %v324_v8 = vmax.f32 %v260_v62, 0.0 }
  0x11   :  { %v325_v10 = vmax.f32 %v261_v63, 0.0  ;;  %v192_v11 = vmul.f32 %v1541_v0, %v1667_v4  ;;  %v230_v14 = vadd.f32 %v1678_v9, %v159_v2  ;;  %v231_v15 = vadd.f32 %v1678_v9, %v160_v3 }
  0x12   :  { %v354_v16 = vpack.c.bf16 %v293_v6, %v292_v5  ;;  %v262_v17 = vadd.f32 %v1678_v9, %v191_v7  ;;  %v1480_v18 = vunpack.c.l.bf16 %v1593_v12  ;;  %v1481_v19 = vunpack.c.h.bf16 %v1593_v12  ;;  %v1612_v12 = vld [vmem:[%s2150_s0 + $0xb8] sm:$0xff]  }
  0x13   :  { %v370_v20 = vpack.c.bf16 %v325_v10, %v324_v8  ;;  %v263_v21 = vadd.f32 %v1678_v9, %v192_v11  ;;  %v1544_v22 = vunpack.c.l.bf16 %v1609_v13  ;;  %v1545_v23 = vunpack.c.h.bf16 %v1609_v13  ;;  %v1596_v11 = vld [vmem:[%s2150_s0 + $0x38] sm:$0xff]  }
  0x14   :  { %v294_v24 = vmax.f32 %v230_v14, 0.0  ;;  %v295_v25 = vmax.f32 %v231_v15, 0.0  ;;  %v161_v26 = vmul.f32 %v1480_v18, %v1667_v4  ;;  %v162_v27 = vmul.f32 %v1481_v19, %v1667_v4 }
  0x15   :  { %1303 = vmatmul.mubr.msk.bf16.gmra.mxu0 %vm396_vm0, %v353_v57  ;;  %v326_v29 = vmax.f32 %v262_v17, 0.0  ;;  %v327_v30 = vmax.f32 %v263_v21, 0.0  ;;  %v193_v31 = vmul.f32 %v1544_v22, %v1667_v4  ;;  %v194_v32 = vmul.f32 %v1545_v23, %v1667_v4 }
  0x16   :  { %545 = vmatprep.mubr.bf16.mxu0 %v1627_v1  ;;  %v1484_v34 = vunpack.c.l.bf16 %v1594_v28  ;;  %v1485_v35 = vunpack.c.h.bf16 %v1594_v28  ;;  %v355_v36 = vpack.c.bf16 %v295_v25, %v294_v24  ;;  %v232_v37 = vadd.f32 %v1678_v9, %v161_v26  ;;  %v1597_v28 = vld [vmem:[%s2150_s0 + $0x40] sm:$0xff]  }
  0x17   :  { %1319 = vmatmul.mubr.msk.bf16.gmra.mxu1 %vm396_vm0, %v369_v61  ;;  %v233_v38 = vadd.f32 %v1678_v9, %v162_v27  ;;  %v1548_v39 = vunpack.c.l.bf16 %v1610_v33  ;;  %v371_v40 = vpack.c.bf16 %v327_v30, %v326_v29  ;;  %v264_v41 = vadd.f32 %v1678_v9, %v193_v31 }
  0x18   :  { %705 = vmatprep.mubr.bf16.mxu1 %v1627_v1  ;;  %v265_v42 = vadd.f32 %v1678_v9, %v194_v32  ;;  %v1549_v43 = vunpack.c.h.bf16 %v1610_v33  ;;  %v163_v44 = vmul.f32 %v1484_v34, %v1667_v4  ;;  %v164_v45 = vmul.f32 %v1485_v35, %v1667_v4  ;;  %v1613_v32 = vld [vmem:[%s2150_s0 + $0xc0] sm:$0xff]  }
  0x19   :  { %v296_v46 = vmax.f32 %v232_v37, 0.0  ;;  %v297_v47 = vmax.f32 %v233_v38, 0.0  ;;  %v195_v48 = vmul.f32 %v1548_v39, %v1667_v4  ;;  %v328_v50 = vmax.f32 %v264_v41, 0.0 }
  0x1a   :  { %v329_v51 = vmax.f32 %v265_v42, 0.0  ;;  %v196_v52 = vmul.f32 %v1549_v43, %v1667_v4  ;;  %v234_v54 = vadd.f32 %v1678_v9, %v163_v44  ;;  %v235_v55 = vadd.f32 %v1678_v9, %v164_v45 }
  0x1b   :  { %v1488_v56 = vunpack.c.l.bf16 %v1595_v49  ;;  %v356_v57 = vpack.c.bf16 %v297_v47, %v296_v46  ;;  %v266_v58 = vadd.f32 %v1678_v9, %v195_v48  ;;  %v1489_v59 = vunpack.c.h.bf16 %v1595_v49  ;;  %v1598_v47 = vld [vmem:[%s2150_s0 + $0x48] sm:$0xff]  }
  0x1c   :  { %v372_v60 = vpack.c.bf16 %v329_v51, %v328_v50  ;;  %v267_v61 = vadd.f32 %v1678_v9, %v196_v52  ;;  %v1552_v62 = vunpack.c.l.bf16 %v1611_v53  ;;  %v1553_v63 = vunpack.c.h.bf16 %v1611_v53  ;;  %v1614_v52 = vld [vmem:[%s2150_s0 + $0xc8] sm:$0xff]  }
  0x1d   :  { %1304 = vmatmul.mubr.msk.bf16.gmra.mxu0 %vm396_vm0, %v354_v16  ;;  %v298_v0 = vmax.f32 %v234_v54, 0.0  ;;  %v299_v2 = vmax.f32 %v235_v55, 0.0  ;;  %v165_v3 = vmul.f32 %v1488_v56, %v1667_v4  ;;  %v166_v5 = vmul.f32 %v1489_v59, %v1667_v4 }
  0x1e   :  { %555 = vmatprep.mubr.bf16.mxu0 %v1627_v1  ;;  %v330_v6 = vmax.f32 %v266_v58, 0.0  ;;  %v331_v7 = vmax.f32 %v267_v61, 0.0  ;;  %v197_v8 = vmul.f32 %v1552_v62, %v1667_v4  ;;  %v198_v10 = vmul.f32 %v1553_v63, %v1667_v4 }
  0x1f   :  { %1320 = vmatmul.mubr.msk.bf16.gmra.mxu1 %vm396_vm0, %v370_v20  ;;  %v357_v13 = vpack.c.bf16 %v299_v2, %v298_v0  ;;  %v236_v14 = vadd.f32 %v1678_v9, %v165_v3  ;;  %v237_v15 = vadd.f32 %v1678_v9, %v166_v5  ;;  %v1492_v16 = vunpack.c.l.bf16 %v1596_v11 }
  0x20   :  { %715 = vmatprep.mubr.bf16.mxu1 %v1627_v1  ;;  %v1493_v17 = vunpack.c.h.bf16 %v1596_v11  ;;  %v1556_v18 = vunpack.c.l.bf16 %v1612_v12  ;;  %v373_v19 = vpack.c.bf16 %v331_v7, %v330_v6  ;;  %v268_v20 = vadd.f32 %v1678_v9, %v197_v8  ;;  %v1615_v11 = vld [vmem:[%s2150_s0 + $0xd0] sm:$0xff]  }
  0x21   :  { %v269_v21 = vadd.f32 %v1678_v9, %v198_v10  ;;  %v1557_v22 = vunpack.c.h.bf16 %v1612_v12  ;;  %v300_v23 = vmax.f32 %v236_v14, 0.0  ;;  %v301_v24 = vmax.f32 %v237_v15, 0.0  ;;  %v1599_v10 = vld [vmem:[%s2150_s0 + $0x50] sm:$0xff]  }
  0x22   :  { %v167_v25 = vmul.f32 %v1492_v16, %v1667_v4  ;;  %v168_v26 = vmul.f32 %v1493_v17, %v1667_v4  ;;  %v199_v27 = vmul.f32 %v1556_v18, %v1667_v4  ;;  %v332_v29 = vmax.f32 %v268_v20, 0.0 }
  0x23   :  { %v333_v30 = vmax.f32 %v269_v21, 0.0  ;;  %v200_v31 = vmul.f32 %v1557_v22, %v1667_v4  ;;  %v1496_v33 = vunpack.c.l.bf16 %v1597_v28  ;;  %v1497_v34 = vunpack.c.h.bf16 %v1597_v28 }
  0x24   :  { %v358_v35 = vpack.c.bf16 %v301_v24, %v300_v23  ;;  %v239_v37 = vadd.f32 %v1678_v9, %v168_v26  ;;  %v270_v38 = vadd.f32 %v1678_v9, %v199_v27  ;;  %v1560_v41 = vunpack.c.l.bf16 %v1613_v32  ;;  %v1600_v26 = vld [vmem:[%s2150_s0 + $0x58] sm:$0xff]  }
  0x25   :  { %1305 = vmatmul.mubr.msk.bf16.gmra.mxu0 %vm396_vm0, %v355_v36  ;;  %v238_v36 = vadd.f32 %v1678_v9, %v167_v25  ;;  %v374_v39 = vpack.c.bf16 %v333_v30, %v332_v29  ;;  %v1561_v42 = vunpack.c.h.bf16 %v1613_v32  ;;  %v169_v43 = vmul.f32 %v1496_v33, %v1667_v4 }
  0x26   :  { %565 = vmatprep.mubr.bf16.mxu0 %v1627_v1  ;;  %v170_v44 = vmul.f32 %v1497_v34, %v1667_v4  ;;  %v303_v46 = vmax.f32 %v239_v37, 0.0  ;;  %v334_v48 = vmax.f32 %v270_v38, 0.0  ;;  %v201_v50 = vmul.f32 %v1560_v41, %v1667_v4 }
  0x27   :  { %1321 = vmatmul.mubr.msk.bf16.gmra.mxu1 %vm396_vm0, %v371_v40  ;;  %v271_v40 = vadd.f32 %v1678_v9, %v200_v31  ;;  %v302_v45 = vmax.f32 %v238_v36, 0.0  ;;  %v202_v51 = vmul.f32 %v1561_v42, %v1667_v4  ;;  %v240_v53 = vadd.f32 %v1678_v9, %v169_v43  ;;  %v1616_v31 = vld [vmem:[%s2150_s0 + $0xd8] sm:$0xff]  }
  0x28   :  { %725 = vmatprep.mubr.bf16.mxu1 %v1627_v1  ;;  %v241_v54 = vadd.f32 %v1678_v9, %v170_v44  ;;  %v1500_v55 = vunpack.c.l.bf16 %v1598_v47  ;;  %v1564_v58 = vunpack.c.l.bf16 %v1614_v52  ;;  %v1565_v62 = vunpack.c.h.bf16 %v1614_v52 }
  0x29   :  { %v335_v49 = vmax.f32 %v271_v40, 0.0  ;;  %v359_v56 = vpack.c.bf16 %v303_v46, %v302_v45  ;;  %v273_v61 = vadd.f32 %v1678_v9, %v202_v51  ;;  %v304_v63 = vmax.f32 %v240_v53, 0.0  ;;  %v1617_v51 = vld [vmem:[%s2150_s0 + $0xe0] sm:$0xff]  }
  0x2a   :  { %v305_v0 = vmax.f32 %v241_v54, 0.0  ;;  %v171_v2 = vmul.f32 %v1500_v55, %v1667_v4  ;;  %v203_v5 = vmul.f32 %v1564_v58, %v1667_v4  ;;  %v204_v8 = vmul.f32 %v1565_v62, %v1667_v4 }
  0x2b   :  { %v375_v59 = vpack.c.bf16 %v335_v49, %v334_v48  ;;  %v337_v7 = vmax.f32 %v273_v61, 0.0  ;;  %v1504_v16 = vunpack.c.l.bf16 %v1599_v10  ;;  %v1505_v17 = vunpack.c.h.bf16 %v1599_v10  ;;  %v1618_v10 = vld [vmem:[%s2150_s0 + $0xe8] sm:$0xff]  }
  0x2c   :  { %v360_v12 = vpack.c.bf16 %v305_v0, %v304_v63  ;;  %v274_v15 = vadd.f32 %v1678_v9, %v203_v5  ;;  %v1568_v20 = vunpack.c.l.bf16 %v1615_v11  ;;  %v1569_v21 = vunpack.c.h.bf16 %v1615_v11 }
  0x2d   :  { %1306 = vmatmul.mubr.msk.bf16.gmra.mxu0 %vm396_vm0, %v356_v57  ;;  %v1501_v57 = vunpack.c.h.bf16 %v1598_v47  ;;  %v173_v24 = vmul.f32 %v1504_v16, %v1667_v4  ;;  %v174_v25 = vmul.f32 %v1505_v17, %v1667_v4  ;;  %v1508_v32 = vunpack.c.l.bf16 %v1600_v26 }
  0x2e   :  { %575 = vmatprep.mubr.bf16.mxu0 %v1627_v1  ;;  %v338_v27 = vmax.f32 %v274_v15, 0.0  ;;  %v205_v29 = vmul.f32 %v1568_v20, %v1667_v4  ;;  %v206_v30 = vmul.f32 %v1569_v21, %v1667_v4  ;;  %v1509_v33 = vunpack.c.h.bf16 %v1600_v26 }
  0x2f   :  { %1322 = vmatmul.mubr.msk.bf16.gmra.mxu1 %vm396_vm0, %v372_v60  ;;  %v272_v60 = vadd.f32 %v1678_v9, %v201_v50  ;;  %v172_v3 = vmul.f32 %v1501_v57, %v1667_v4  ;;  %v245_v36 = vadd.f32 %v1678_v9, %v174_v25  ;;  %v1572_v37 = vunpack.c.l.bf16 %v1616_v31  ;;  %v1601_v50 = vld [vmem:[%s2150_s0 + $0x60] sm:$0xff]   ;;  %v1603_v25 = vld [vmem:[%s2150_s0 + $0x70] sm:$0xff]  }
  0x30   :  { %735 = vmatprep.mubr.bf16.mxu1 %v1627_v1  ;;  %v277_v40 = vadd.f32 %v1678_v9, %v206_v30  ;;  %v1573_v41 = vunpack.c.h.bf16 %v1616_v31  ;;  %v175_v42 = vmul.f32 %v1508_v32, %v1667_v4  ;;  %v176_v43 = vmul.f32 %v1509_v33, %v1667_v4  ;;  %v1619_v30 = vld [vmem:[%s2150_s0 + $0xf0] sm:$0xff]  }
  0x31   :  { %v336_v6 = vmax.f32 %v272_v60, 0.0  ;;  %v243_v14 = vadd.f32 %v1678_v9, %v172_v3  ;;  %v309_v45 = vmax.f32 %v245_v36, 0.0  ;;  %v207_v46 = vmul.f32 %v1572_v37, %v1667_v4  ;;  %v1602_v3 = vld [vmem:[%s2150_s0 + $0x68] sm:$0xff]  }
  0x32   :  { %v341_v48 = vmax.f32 %v277_v40, 0.0  ;;  %v208_v49 = vmul.f32 %v1573_v41, %v1667_v4  ;;  %v246_v52 = vadd.f32 %v1678_v9, %v175_v42  ;;  %v247_v53 = vadd.f32 %v1678_v9, %v176_v43 }
  0x33   :  { %v376_v18 = vpack.c.bf16 %v337_v7, %v336_v6  ;;  %v307_v23 = vmax.f32 %v243_v14, 0.0  ;;  %v278_v55 = vadd.f32 %v1678_v9, %v207_v46  ;;  %v1513_v57 = vunpack.c.h.bf16 %v1601_v50 }
  0x34   :  { %v1576_v60 = vunpack.c.l.bf16 %v1617_v51  ;;  %v1577_v61 = vunpack.c.h.bf16 %v1617_v51  ;;  %v310_v62 = vmax.f32 %v246_v52, 0.0  ;;  %v311_v63 = vmax.f32 %v247_v53, 0.0 }
  0x35   :  { %1307 = vmatmul.mubr.msk.bf16.gmra.mxu0 %vm396_vm0, %v357_v13  ;;  %v242_v13 = vadd.f32 %v1678_v9, %v171_v2  ;;  %v178_v2 = vmul.f32 %v1513_v57, %v1667_v4  ;;  %v342_v5 = vmax.f32 %v278_v55, 0.0  ;;  %v1516_v11 = vunpack.c.l.bf16 %v1602_v3 }
  0x36   :  { %585 = vmatprep.mubr.bf16.mxu0 %v1627_v1  ;;  %v209_v7 = vmul.f32 %v1576_v60, %v1667_v4  ;;  %v1580_v16 = vunpack.c.l.bf16 %v1618_v10  ;;  %v1581_v20 = vunpack.c.h.bf16 %v1618_v10  ;;  %v1520_v33 = vunpack.c.l.bf16 %v1603_v25 }
  0x37   :  { %1323 = vmatmul.mubr.msk.bf16.gmra.mxu1 %vm396_vm0, %v373_v19  ;;  %v275_v19 = vadd.f32 %v1678_v9, %v204_v8  ;;  %v306_v22 = vmax.f32 %v242_v13, 0.0  ;;  %v210_v8 = vmul.f32 %v1577_v61, %v1667_v4  ;;  %v363_v13 = vpack.c.bf16 %v311_v63, %v310_v62 }
  0x38   :  { %745 = vmatprep.mubr.bf16.mxu1 %v1627_v1  ;;  %v249_v15 = vadd.f32 %v1678_v9, %v178_v2  ;;  %v179_v21 = vmul.f32 %v1516_v11, %v1667_v4  ;;  %v1584_v36 = vunpack.c.l.bf16 %v1619_v30  ;;  %v1585_v40 = vunpack.c.h.bf16 %v1619_v30 }
  0x39   :  { %v339_v28 = vmax.f32 %v275_v19, 0.0  ;;  %v361_v34 = vpack.c.bf16 %v307_v23, %v306_v22  ;;  %v281_v19 = vadd.f32 %v1678_v9, %v210_v8  ;;  %v181_v43 = vmul.f32 %v1520_v33, %v1667_v4 }
  0x3a   :  { %v250_v31 = vadd.f32 %v1678_v9, %v179_v21 }
  0x3b   :  { %v377_v38 = vpack.c.bf16 %v339_v28, %v338_v27  ;;  %v345_v27 = vmax.f32 %v281_v19, 0.0  ;;  %v211_v28 = vmul.f32 %v1580_v16, %v1667_v4  ;;  %v252_v52 = vadd.f32 %v1678_v9, %v181_v43 }
  0x3c   :  { %v314_v41 = vmax.f32 %v250_v31, 0.0 }
  0x3d   :  { %1308 = vmatmul.mubr.msk.bf16.gmra.mxu0 %vm396_vm0, %v358_v35  ;;  %v244_v35 = vadd.f32 %v1678_v9, %v173_v24  ;;  %v313_v24 = vmax.f32 %v249_v15, 0.0  ;;  %v316_v61 = vmax.f32 %v252_v52, 0.0 }
  0x3e   :  { %595 = vmatprep.mubr.bf16.mxu0 %v1627_v1 }
  0x3f   :  { %1324 = vmatmul.mubr.msk.bf16.gmra.mxu1 %vm396_vm0, %v374_v39  ;;  %v276_v39 = vadd.f32 %v1678_v9, %v205_v29  ;;  %v308_v44 = vmax.f32 %v244_v35, 0.0  ;;  %v212_v29 = vmul.f32 %v1581_v20, %v1667_v4  ;;  %v1521_v35 = vunpack.c.h.bf16 %v1603_v25 }
  0x40   :  { %755 = vmatprep.mubr.bf16.mxu1 %v1627_v1 }
  0x41   :  { %v340_v47 = vmax.f32 %v276_v39, 0.0  ;;  %v362_v54 = vpack.c.bf16 %v309_v45, %v308_v44  ;;  %v283_v39 = vadd.f32 %v1678_v9, %v212_v29  ;;  %v182_v44 = vmul.f32 %v1521_v35, %v1667_v4 }
  0x42   :  { %v213_v45 = vmul.f32 %v1584_v36, %v1667_v4 }
  0x43   :  { %v378_v58 = vpack.c.bf16 %v341_v48, %v340_v47  ;;  %v347_v47 = vmax.f32 %v283_v39, 0.0  ;;  %v214_v48 = vmul.f32 %v1585_v40, %v1667_v4  ;;  %v253_v53 = vadd.f32 %v1678_v9, %v182_v44 }
  0x45   :  { %1309 = vmatmul.mubr.msk.bf16.gmra.mxu0 %vm396_vm0, %v359_v56  ;;  %v1512_v56 = vunpack.c.l.bf16 %v1601_v50  ;;  %v1620_v50 = vld [vmem:[%s2150_s0 + $0xf8] sm:$0xff]   ;;  %v317_v62 = vmax.f32 %v253_v53, 0.0 }
  0x46   :  { %605 = vmatprep.mubr.bf16.mxu0 %v1627_v1  ;;  %v1589_v60 = vunpack.c.h.bf16 %v1620_v50 }
  0x47   :  { %1325 = vmatmul.mubr.msk.bf16.gmra.mxu1 %vm396_vm0, %v375_v59  ;;  %v279_v59 = vadd.f32 %v1678_v9, %v208_v49  ;;  %v177_v0 = vmul.f32 %v1512_v56, %v1667_v4  ;;  %v1604_v49 = vld [vmem:[%s2150_s0 + $0x78] sm:$0xff]  }
  0x48   :  { %765 = vmatprep.mubr.bf16.mxu1 %v1627_v1  ;;  %v1524_v55 = vunpack.c.l.bf16 %v1604_v49  ;;  %v1525_v56 = vunpack.c.h.bf16 %v1604_v49 }
  0x49   :  { %v343_v6 = vmax.f32 %v279_v59, 0.0  ;;  %v248_v14 = vadd.f32 %v1678_v9, %v177_v0  ;;  %v1588_v59 = vunpack.c.l.bf16 %v1620_v50 }
  0x4a   :  { %v183_v63 = vmul.f32 %v1524_v55, %v1667_v4  ;;  %v184_v0 = vmul.f32 %v1525_v56, %v1667_v4 }
  0x4b   :  { %v379_v17 = vpack.c.bf16 %v343_v6, %v342_v5  ;;  %v312_v23 = vmax.f32 %v248_v14, 0.0  ;;  %v215_v5 = vmul.f32 %v1588_v59, %v1667_v4  ;;  %v216_v6 = vmul.f32 %v1589_v60, %v1667_v4 }
  0x4c   :  { %v254_v8 = vadd.f32 %v1678_v9, %v183_v63  ;;  %v255_v10 = vadd.f32 %v1678_v9, %v184_v0 }
  0x4d   :  { %1310 = vmatmul.mubr.msk.bf16.gmra.mxu0 %vm396_vm0, %v360_v12  ;;  %v1517_v12 = vunpack.c.h.bf16 %v1602_v3 }
  0x4e   :  { %615 = vmatprep.mubr.bf16.mxu0 %v1627_v1  ;;  %v318_v14 = vmax.f32 %v254_v8, 0.0  ;;  %v319_v15 = vmax.f32 %v255_v10, 0.0 }
  0x4f   :  { %1326 = vmatmul.mubr.msk.bf16.gmra.mxu1 %vm396_vm0, %v376_v18  ;;  %v280_v18 = vadd.f32 %v1678_v9, %v209_v7  ;;  %v180_v22 = vmul.f32 %v1517_v12, %v1667_v4  ;;  %v366_v7 = vpack.c.bf16 %v317_v62, %v316_v61  ;;  %v286_v12 = vadd.f32 %v1678_v9, %v215_v5 }
  0x50   :  { %775 = vmatprep.mubr.bf16.mxu1 %v1627_v1 }
  0x51   :  { %v344_v26 = vmax.f32 %v280_v18, 0.0  ;;  %v251_v32 = vadd.f32 %v1678_v9, %v180_v22  ;;  %v350_v4 = vmax.f32 %v286_v12, 0.0 }
  0x53   :  { %v380_v37 = vpack.c.bf16 %v345_v27, %v344_v26  ;;  %v315_v42 = vmax.f32 %v251_v32, 0.0 }
  0x55   :  { %1311 = vmatmul.mubr.msk.bf16.gmra.mxu0 %vm396_vm0, %v361_v34  ;;  %v364_v34 = vpack.c.bf16 %v313_v24, %v312_v23  ;;  %v365_v51 = vpack.c.bf16 %v315_v42, %v314_v41 }
  0x56   :  { %625 = vmatprep.mubr.bf16.mxu0 %v1627_v1 }
  0x57   :  { %1327 = vmatmul.mubr.msk.bf16.gmra.mxu1 %vm396_vm0, %v377_v38  ;;  %v282_v38 = vadd.f32 %v1678_v9, %v211_v28 }
  0x58   :  { %785 = vmatprep.mubr.bf16.mxu1 %v1627_v1 }
  0x59   :  { %v346_v46 = vmax.f32 %v282_v38, 0.0 }
  0x5b   :  { %v381_v57 = vpack.c.bf16 %v347_v47, %v346_v46 }
  0x5d   :  { %1312 = vmatmul.mubr.msk.bf16.gmra.mxu0 %vm396_vm0, %v362_v54  ;;  %v284_v54 = vadd.f32 %v1678_v9, %v213_v45 }
  0x5e   :  { %635 = vmatprep.mubr.bf16.mxu0 %v1627_v1 }
  0x5f   :  { %1328 = vmatmul.mubr.msk.bf16.gmra.mxu1 %vm396_vm0, %v378_v58  ;;  %v285_v58 = vadd.f32 %v1678_v9, %v214_v48  ;;  %v348_v2 = vmax.f32 %v284_v54, 0.0 }
  0x60   :  { %795 = vmatprep.mubr.bf16.mxu1 %v1627_v1 }
  0x61   :  { %v349_v3 = vmax.f32 %v285_v58, 0.0 }
  0x63   :  { %v382_v11 = vpack.c.bf16 %v349_v3, %v348_v2 }
  0x65   :  { %1313 = vmatmul.mubr.msk.bf16.gmra.mxu0 %vm396_vm0, %v363_v13  ;;  %v287_v13 = vadd.f32 %v1678_v9, %v216_v6 }
  0x66   :  { %645 = vmatprep.mubr.bf16.mxu0 %v1627_v1 }
  0x67   :  { %1329 = vmatmul.mubr.msk.bf16.gmra.mxu1 %vm396_vm0, %v379_v17  ;;  %v351_v16 = vmax.f32 %v287_v13, 0.0  ;;  %v367_v17 = vpack.c.bf16 %v319_v15, %v318_v14 }
  0x68   :  { %805 = vmatprep.mubr.bf16.mxu1 %v1627_v1 }
  0x69   :  { %v383_v18 = vpack.c.bf16 %v351_v16, %v350_v4 }
  0x6d   :  { %1314 = vmatmul.mubr.msk.bf16.gmra.mxu0 %vm396_vm0, %v364_v34 }
  0x6e   :  { %655 = vmatprep.mubr.bf16.mxu0 %v1627_v1 }
  0x6f   :  { %1330 = vmatmul.mubr.msk.bf16.gmra.mxu1 %vm396_vm0, %v380_v37 }
  0x70   :  { %815 = vmatprep.mubr.bf16.mxu1 %v1627_v1 }
  0x75   :  { %1315 = vmatmul.mubr.msk.bf16.gmra.mxu0 %vm396_vm0, %v365_v51 }
  0x76   :  { %665 = vmatprep.mubr.bf16.mxu0 %v1627_v1 }
  0x77   :  { %1331 = vmatmul.mubr.msk.bf16.gmra.mxu1 %vm396_vm0, %v381_v57 }
  0x78   :  { %825 = vmatprep.mubr.bf16.mxu1 %v1627_v1 }
  0x7d   :  { %1316 = vmatmul.mubr.msk.bf16.gmra.mxu0 %vm396_vm0, %v366_v7 }
  0x7e   :  { %675 = vmatprep.mubr.bf16.mxu0 %v1627_v1 }
  0x7f   :  { %1332 = vmatmul.mubr.msk.bf16.gmra.mxu1 %vm396_vm0, %v382_v11 }
  0x80   :  { %835 = vmatprep.mubr.bf16.mxu1 %v1627_v1 }
  0x85   :  { %1317 = vmatmul.mubr.msk.bf16.gmra.mxu0 %vm396_vm0, %v367_v17 }
  0x87   :  { %1333 = vmatmul.mubr.msk.bf16.gmra.mxu1 %vm396_vm0, %v383_v18 }
  0xcd   :  { %v527_v19 = vpop.f32.mrf.mxu0 }
  0xcf   :  { %v687_v9 = vpop.f32.mrf.mxu1  ;;  %v529_v20 = vpop.f32.mrf.mxu0 }
  0xd0   :  { %v1398_v21 = vpack.c.bf16 %v529_v20, %v527_v19 }
  0xd1   :  { %v689_v22 = vpop.f32.mrf.mxu1  ;;  %v531_v24 = vpop.f32.mrf.mxu0 }
  0xd2   :  { %v1430_v23 = vpack.c.bf16 %v689_v22, %v687_v9  ;;  %1230 = vst [vmem:[%s2153_s4] sm:$0xff] %v1398_v21 }
  0xd3   :  { %v691_v25 = vpop.f32.mrf.mxu1  ;;  %v533_v1 = vpop.f32.mrf.mxu0 }
  0xd4   :  { %1262 = vst [vmem:[%s2153_s4 + $0x100] sm:$0xff] %v1430_v23  ;;  %v1399_v26 = vpack.c.bf16 %v533_v1, %v531_v24 }
  0xd5   :  { %v693_v27 = vpop.f32.mrf.mxu1  ;;  %v537_v29 = vpop.f32.mrf.mxu0 }
  0xd6   :  { %v1431_v28 = vpack.c.bf16 %v693_v27, %v691_v25  ;;  %1231 = vst [vmem:[%s2153_s4 + $0x8] sm:$0xff] %v1399_v26 }
  0xd7   :  { %v697_v30 = vpop.f32.mrf.mxu1  ;;  %v539_v31 = vpop.f32.mrf.mxu0 }
  0xd8   :  { %1263 = vst [vmem:[%s2153_s4 + $0x108] sm:$0xff] %v1431_v28  ;;  %v1400_v32 = vpack.c.bf16 %v539_v31, %v537_v29 }
  0xd9   :  { %v699_v33 = vpop.f32.mrf.mxu1  ;;  %v541_v35 = vpop.f32.mrf.mxu0 }
  0xda   :  { %v1432_v34 = vpack.c.bf16 %v699_v33, %v697_v30  ;;  %1232 = vst [vmem:[%s2153_s4 + $0x10] sm:$0xff] %v1400_v32 }
  0xdb   :  { %v701_v36 = vpop.f32.mrf.mxu1  ;;  %v543_v37 = vpop.f32.mrf.mxu0 }
  0xdc   :  { %1264 = vst [vmem:[%s2153_s4 + $0x110] sm:$0xff] %v1432_v34  ;;  %v1401_v38 = vpack.c.bf16 %v543_v37, %v541_v35 }
  0xdd   :  { %v703_v39 = vpop.f32.mrf.mxu1  ;;  %v547_v41 = vpop.f32.mrf.mxu0 }
  0xde   :  { %v1433_v40 = vpack.c.bf16 %v703_v39, %v701_v36  ;;  %1233 = vst [vmem:[%s2153_s4 + $0x18] sm:$0xff] %v1401_v38 }
  0xdf   :  { %v707_v42 = vpop.f32.mrf.mxu1  ;;  %v549_v43 = vpop.f32.mrf.mxu0 }
  0xe0   :  { %1265 = vst [vmem:[%s2153_s4 + $0x118] sm:$0xff] %v1433_v40  ;;  %v1402_v44 = vpack.c.bf16 %v549_v43, %v547_v41 }
  0xe1   :  { %v709_v45 = vpop.f32.mrf.mxu1  ;;  %v551_v47 = vpop.f32.mrf.mxu0 }
  0xe2   :  { %v1434_v46 = vpack.c.bf16 %v709_v45, %v707_v42  ;;  %1234 = vst [vmem:[%s2153_s4 + $0x20] sm:$0xff] %v1402_v44 }
  0xe3   :  { %v711_v48 = vpop.f32.mrf.mxu1  ;;  %v553_v49 = vpop.f32.mrf.mxu0 }
  0xe4   :  { %1266 = vst [vmem:[%s2153_s4 + $0x120] sm:$0xff] %v1434_v46  ;;  %v1403_v50 = vpack.c.bf16 %v553_v49, %v551_v47 }
  0xe5   :  { %v713_v51 = vpop.f32.mrf.mxu1  ;;  %v557_v53 = vpop.f32.mrf.mxu0 }
  0xe6   :  { %v1435_v52 = vpack.c.bf16 %v713_v51, %v711_v48  ;;  %1235 = vst [vmem:[%s2153_s4 + $0x28] sm:$0xff] %v1403_v50 }
  0xe7   :  { %v717_v54 = vpop.f32.mrf.mxu1  ;;  %v559_v55 = vpop.f32.mrf.mxu0 }
  0xe8   :  { %1267 = vst [vmem:[%s2153_s4 + $0x128] sm:$0xff] %v1435_v52  ;;  %v1404_v56 = vpack.c.bf16 %v559_v55, %v557_v53 }
  0xe9   :  { %v719_v57 = vpop.f32.mrf.mxu1  ;;  %v561_v59 = vpop.f32.mrf.mxu0 }
  0xea   :  { %v1436_v58 = vpack.c.bf16 %v719_v57, %v717_v54  ;;  %1236 = vst [vmem:[%s2153_s4 + $0x30] sm:$0xff] %v1404_v56 }
  0xeb   :  { %v721_v60 = vpop.f32.mrf.mxu1  ;;  %v563_v61 = vpop.f32.mrf.mxu0 }
  0xec   :  { %1268 = vst [vmem:[%s2153_s4 + $0x130] sm:$0xff] %v1436_v58  ;;  %v1405_v62 = vpack.c.bf16 %v563_v61, %v561_v59 }
  0xed   :  { %v723_v63 = vpop.f32.mrf.mxu1  ;;  %v567_v2 = vpop.f32.mrf.mxu0 }
  0xee   :  { %v1437_v0 = vpack.c.bf16 %v723_v63, %v721_v60  ;;  %1237 = vst [vmem:[%s2153_s4 + $0x38] sm:$0xff] %v1405_v62 }
  0xef   :  { %v727_v3 = vpop.f32.mrf.mxu1  ;;  %v569_v5 = vpop.f32.mrf.mxu0 }
  0xf0   :  { %1269 = vst [vmem:[%s2153_s4 + $0x138] sm:$0xff] %v1437_v0  ;;  %v1406_v6 = vpack.c.bf16 %v569_v5, %v567_v2 }
  0xf1   :  { %v729_v7 = vpop.f32.mrf.mxu1  ;;  %v571_v10 = vpop.f32.mrf.mxu0 }
  0xf2   :  { %v1438_v8 = vpack.c.bf16 %v729_v7, %v727_v3  ;;  %1238 = vst [vmem:[%s2153_s4 + $0x40] sm:$0xff] %v1406_v6 }
  0xf3   :  { %v731_v11 = vpop.f32.mrf.mxu1  ;;  %v573_v12 = vpop.f32.mrf.mxu0 }
  0xf4   :  { %1270 = vst [vmem:[%s2153_s4 + $0x140] sm:$0xff] %v1438_v8  ;;  %v1407_v13 = vpack.c.bf16 %v573_v12, %v571_v10 }
  0xf5   :  { %v733_v14 = vpop.f32.mrf.mxu1  ;;  %v577_v4 = vpop.f32.mrf.mxu0 }
  0xf6   :  { %v1439_v15 = vpack.c.bf16 %v733_v14, %v731_v11  ;;  %1239 = vst [vmem:[%s2153_s4 + $0x48] sm:$0xff] %v1407_v13 }
  0xf7   :  { %v737_v16 = vpop.f32.mrf.mxu1  ;;  %v579_v17 = vpop.f32.mrf.mxu0 }
  0xf8   :  { %1271 = vst [vmem:[%s2153_s4 + $0x148] sm:$0xff] %v1439_v15  ;;  %v1408_v18 = vpack.c.bf16 %v579_v17, %v577_v4 }
  0xf9   :  { %v739_v19 = vpop.f32.mrf.mxu1  ;;  %v581_v20 = vpop.f32.mrf.mxu0 }
  0xfa   :  { %v1440_v9 = vpack.c.bf16 %v739_v19, %v737_v16  ;;  %1240 = vst [vmem:[%s2153_s4 + $0x50] sm:$0xff] %v1408_v18 }
  0xfb   :  { %v741_v21 = vpop.f32.mrf.mxu1  ;;  %v583_v22 = vpop.f32.mrf.mxu0 }
  0xfc   :  { %1272 = vst [vmem:[%s2153_s4 + $0x150] sm:$0xff] %v1440_v9  ;;  %v1409_v23 = vpack.c.bf16 %v583_v22, %v581_v20 }
  0xfd   :  { %v743_v24 = vpop.f32.mrf.mxu1  ;;  %v587_v1 = vpop.f32.mrf.mxu0 }
  0xfe   :  { %v1441_v25 = vpack.c.bf16 %v743_v24, %v741_v21  ;;  %1241 = vst [vmem:[%s2153_s4 + $0x58] sm:$0xff] %v1409_v23 }
  0xff   :  { %v747_v26 = vpop.f32.mrf.mxu1  ;;  %v589_v27 = vpop.f32.mrf.mxu0 }
 0x100   :  { %1273 = vst [vmem:[%s2153_s4 + $0x158] sm:$0xff] %v1441_v25  ;;  %v1410_v28 = vpack.c.bf16 %v589_v27, %v587_v1 }
 0x101   :  { %v749_v29 = vpop.f32.mrf.mxu1  ;;  %v591_v31 = vpop.f32.mrf.mxu0 }
 0x102   :  { %v1442_v30 = vpack.c.bf16 %v749_v29, %v747_v26  ;;  %1242 = vst [vmem:[%s2153_s4 + $0x60] sm:$0xff] %v1410_v28 }
 0x103   :  { %v751_v32 = vpop.f32.mrf.mxu1  ;;  %v593_v33 = vpop.f32.mrf.mxu0 }
 0x104   :  { %1274 = vst [vmem:[%s2153_s4 + $0x160] sm:$0xff] %v1442_v30  ;;  %v1411_v34 = vpack.c.bf16 %v593_v33, %v591_v31 }
 0x105   :  { %v753_v35 = vpop.f32.mrf.mxu1  ;;  %v597_v37 = vpop.f32.mrf.mxu0 }
 0x106   :  { %v1443_v36 = vpack.c.bf16 %v753_v35, %v751_v32  ;;  %1243 = vst [vmem:[%s2153_s4 + $0x68] sm:$0xff] %v1411_v34 }
 0x107   :  { %v757_v38 = vpop.f32.mrf.mxu1  ;;  %v599_v39 = vpop.f32.mrf.mxu0 }
 0x108   :  { %1275 = vst [vmem:[%s2153_s4 + $0x168] sm:$0xff] %v1443_v36  ;;  %v1412_v40 = vpack.c.bf16 %v599_v39, %v597_v37 }
 0x109   :  { %v759_v41 = vpop.f32.mrf.mxu1  ;;  %v601_v43 = vpop.f32.mrf.mxu0 }
 0x10a   :  { %v1444_v42 = vpack.c.bf16 %v759_v41, %v757_v38  ;;  %1244 = vst [vmem:[%s2153_s4 + $0x70] sm:$0xff] %v1412_v40 }
 0x10b   :  { %v761_v44 = vpop.f32.mrf.mxu1  ;;  %v603_v45 = vpop.f32.mrf.mxu0 }
 0x10c   :  { %1276 = vst [vmem:[%s2153_s4 + $0x170] sm:$0xff] %v1444_v42  ;;  %v1413_v46 = vpack.c.bf16 %v603_v45, %v601_v43 }
 0x10d   :  { %v763_v47 = vpop.f32.mrf.mxu1  ;;  %v607_v49 = vpop.f32.mrf.mxu0 }
 0x10e   :  { %v1445_v48 = vpack.c.bf16 %v763_v47, %v761_v44  ;;  %1245 = vst [vmem:[%s2153_s4 + $0x78] sm:$0xff] %v1413_v46 }
 0x10f   :  { %v767_v50 = vpop.f32.mrf.mxu1  ;;  %v609_v51 = vpop.f32.mrf.mxu0 }
 0x110   :  { %1277 = vst [vmem:[%s2153_s4 + $0x178] sm:$0xff] %v1445_v48  ;;  %v1414_v52 = vpack.c.bf16 %v609_v51, %v607_v49 }
 0x111   :  { %v769_v53 = vpop.f32.mrf.mxu1  ;;  %v611_v55 = vpop.f32.mrf.mxu0 }
 0x112   :  { %v1446_v54 = vpack.c.bf16 %v769_v53, %v767_v50  ;;  %1246 = vst [vmem:[%s2153_s4 + $0x80] sm:$0xff] %v1414_v52 }
 0x113   :  { %v771_v56 = vpop.f32.mrf.mxu1  ;;  %v613_v57 = vpop.f32.mrf.mxu0 }
 0x114   :  { %1278 = vst [vmem:[%s2153_s4 + $0x180] sm:$0xff] %v1446_v54  ;;  %v1415_v58 = vpack.c.bf16 %v613_v57, %v611_v55 }
 0x115   :  { %v773_v59 = vpop.f32.mrf.mxu1  ;;  %v617_v61 = vpop.f32.mrf.mxu0 }
 0x116   :  { %v1447_v60 = vpack.c.bf16 %v773_v59, %v771_v56  ;;  %1247 = vst [vmem:[%s2153_s4 + $0x88] sm:$0xff] %v1415_v58 }
 0x117   :  { %v777_v62 = vpop.f32.mrf.mxu1  ;;  %v619_v63 = vpop.f32.mrf.mxu0 }
 0x118   :  { %1279 = vst [vmem:[%s2153_s4 + $0x188] sm:$0xff] %v1447_v60  ;;  %v1416_v0 = vpack.c.bf16 %v619_v63, %v617_v61 }
 0x119   :  { %v779_v2 = vpop.f32.mrf.mxu1  ;;  %v621_v5 = vpop.f32.mrf.mxu0 }
 0x11a   :  { %v1448_v3 = vpack.c.bf16 %v779_v2, %v777_v62  ;;  %1248 = vst [vmem:[%s2153_s4 + $0x90] sm:$0xff] %v1416_v0 }
 0x11b   :  { %v781_v6 = vpop.f32.mrf.mxu1  ;;  %v623_v7 = vpop.f32.mrf.mxu0 }
 0x11c   :  { %1280 = vst [vmem:[%s2153_s4 + $0x190] sm:$0xff] %v1448_v3  ;;  %v1417_v8 = vpack.c.bf16 %v623_v7, %v621_v5 }
 0x11d   :  { %v783_v10 = vpop.f32.mrf.mxu1  ;;  %v627_v12 = vpop.f32.mrf.mxu0 }
 0x11e   :  { %v1449_v11 = vpack.c.bf16 %v783_v10, %v781_v6  ;;  %1249 = vst [vmem:[%s2153_s4 + $0x98] sm:$0xff] %v1417_v8 }
 0x11f   :  { %v787_v13 = vpop.f32.mrf.mxu1  ;;  %v629_v14 = vpop.f32.mrf.mxu0 }
 0x120   :  { %1281 = vst [vmem:[%s2153_s4 + $0x198] sm:$0xff] %v1449_v11  ;;  %v1418_v15 = vpack.c.bf16 %v629_v14, %v627_v12 }
 0x121   :  { %v789_v4 = vpop.f32.mrf.mxu1  ;;  %v631_v17 = vpop.f32.mrf.mxu0 }
 0x122   :  { %v1450_v16 = vpack.c.bf16 %v789_v4, %v787_v13  ;;  %1250 = vst [vmem:[%s2153_s4 + $0xa0] sm:$0xff] %v1418_v15 }
 0x123   :  { %v791_v18 = vpop.f32.mrf.mxu1  ;;  %v633_v19 = vpop.f32.mrf.mxu0 }
 0x124   :  { %1282 = vst [vmem:[%s2153_s4 + $0x1a0] sm:$0xff] %v1450_v16  ;;  %v1419_v9 = vpack.c.bf16 %v633_v19, %v631_v17 }
 0x125   :  { %v793_v20 = vpop.f32.mrf.mxu1  ;;  %v637_v22 = vpop.f32.mrf.mxu0 }
 0x126   :  { %v1451_v21 = vpack.c.bf16 %v793_v20, %v791_v18  ;;  %1251 = vst [vmem:[%s2153_s4 + $0xa8] sm:$0xff] %v1419_v9 }
 0x127   :  { %v797_v23 = vpop.f32.mrf.mxu1  ;;  %v639_v24 = vpop.f32.mrf.mxu0 }
 0x128   :  { %1283 = vst [vmem:[%s2153_s4 + $0x1a8] sm:$0xff] %v1451_v21  ;;  %v1420_v25 = vpack.c.bf16 %v639_v24, %v637_v22 }
 0x129   :  { %v799_v1 = vpop.f32.mrf.mxu1  ;;  %v641_v27 = vpop.f32.mrf.mxu0 }
 0x12a   :  { %v1452_v26 = vpack.c.bf16 %v799_v1, %v797_v23  ;;  %1252 = vst [vmem:[%s2153_s4 + $0xb0] sm:$0xff] %v1420_v25 }
 0x12b   :  { %v801_v28 = vpop.f32.mrf.mxu1  ;;  %v643_v29 = vpop.f32.mrf.mxu0 }
 0x12c   :  { %1284 = vst [vmem:[%s2153_s4 + $0x1b0] sm:$0xff] %v1452_v26  ;;  %v1421_v30 = vpack.c.bf16 %v643_v29, %v641_v27 }
 0x12d   :  { %v803_v31 = vpop.f32.mrf.mxu1  ;;  %v647_v33 = vpop.f32.mrf.mxu0 }
 0x12e   :  { %v1453_v32 = vpack.c.bf16 %v803_v31, %v801_v28  ;;  %1253 = vst [vmem:[%s2153_s4 + $0xb8] sm:$0xff] %v1421_v30 }
 0x12f   :  { %v807_v34 = vpop.f32.mrf.mxu1  ;;  %v649_v35 = vpop.f32.mrf.mxu0 }
 0x130   :  { %1285 = vst [vmem:[%s2153_s4 + $0x1b8] sm:$0xff] %v1453_v32  ;;  %v1422_v36 = vpack.c.bf16 %v649_v35, %v647_v33 }
 0x131   :  { %v809_v37 = vpop.f32.mrf.mxu1  ;;  %v651_v39 = vpop.f32.mrf.mxu0 }
 0x132   :  { %v1454_v38 = vpack.c.bf16 %v809_v37, %v807_v34  ;;  %1254 = vst [vmem:[%s2153_s4 + $0xc0] sm:$0xff] %v1422_v36 }
 0x133   :  { %v811_v40 = vpop.f32.mrf.mxu1  ;;  %v653_v41 = vpop.f32.mrf.mxu0 }
 0x134   :  { %1286 = vst [vmem:[%s2153_s4 + $0x1c0] sm:$0xff] %v1454_v38  ;;  %v1423_v42 = vpack.c.bf16 %v653_v41, %v651_v39 }
 0x135   :  { %v813_v43 = vpop.f32.mrf.mxu1  ;;  %v657_v45 = vpop.f32.mrf.mxu0 }
 0x136   :  { %v1455_v44 = vpack.c.bf16 %v813_v43, %v811_v40  ;;  %1255 = vst [vmem:[%s2153_s4 + $0xc8] sm:$0xff] %v1423_v42 }
 0x137   :  { %v817_v46 = vpop.f32.mrf.mxu1  ;;  %v659_v47 = vpop.f32.mrf.mxu0 }
 0x138   :  { %1287 = vst [vmem:[%s2153_s4 + $0x1c8] sm:$0xff] %v1455_v44  ;;  %v1424_v48 = vpack.c.bf16 %v659_v47, %v657_v45 }
 0x139   :  { %v819_v49 = vpop.f32.mrf.mxu1  ;;  %v661_v51 = vpop.f32.mrf.mxu0 }
 0x13a   :  { %v1456_v50 = vpack.c.bf16 %v819_v49, %v817_v46  ;;  %1256 = vst [vmem:[%s2153_s4 + $0xd0] sm:$0xff] %v1424_v48 }
 0x13b   :  { %v821_v52 = vpop.f32.mrf.mxu1  ;;  %v663_v53 = vpop.f32.mrf.mxu0 }
 0x13c   :  { %1288 = vst [vmem:[%s2153_s4 + $0x1d0] sm:$0xff] %v1456_v50  ;;  %v1425_v54 = vpack.c.bf16 %v663_v53, %v661_v51 }
 0x13d   :  { %v823_v55 = vpop.f32.mrf.mxu1  ;;  %v667_v57 = vpop.f32.mrf.mxu0 }
 0x13e   :  { %v1457_v56 = vpack.c.bf16 %v823_v55, %v821_v52  ;;  %1257 = vst [vmem:[%s2153_s4 + $0xd8] sm:$0xff] %v1425_v54 }
 0x13f   :  { %v827_v58 = vpop.f32.mrf.mxu1  ;;  %v669_v59 = vpop.f32.mrf.mxu0 }
 0x140   :  { %1289 = vst [vmem:[%s2153_s4 + $0x1d8] sm:$0xff] %v1457_v56  ;;  %v1426_v60 = vpack.c.bf16 %v669_v59, %v667_v57 }
 0x141   :  { %v829_v61 = vpop.f32.mrf.mxu1  ;;  %v671_v63 = vpop.f32.mrf.mxu0 }
 0x142   :  { %v1458_v62 = vpack.c.bf16 %v829_v61, %v827_v58  ;;  %1258 = vst [vmem:[%s2153_s4 + $0xe0] sm:$0xff] %v1426_v60 }
 0x143   :  { %v831_v0 = vpop.f32.mrf.mxu1  ;;  %v673_v2 = vpop.f32.mrf.mxu0 }
 0x144   :  { %1290 = vst [vmem:[%s2153_s4 + $0x1e0] sm:$0xff] %v1458_v62  ;;  %v1427_v3 = vpack.c.bf16 %v673_v2, %v671_v63 }
 0x145   :  { %v833_v5 = vpop.f32.mrf.mxu1  ;;  %v677_v7 = vpop.f32.mrf.mxu0 }
 0x146   :  { %v1459_v6 = vpack.c.bf16 %v833_v5, %v831_v0  ;;  %1259 = vst [vmem:[%s2153_s4 + $0xe8] sm:$0xff] %v1427_v3 }
 0x147   :  { %v837_v8 = vpop.f32.mrf.mxu1  ;;  %v679_v10 = vpop.f32.mrf.mxu0 }
 0x148   :  { %1291 = vst [vmem:[%s2153_s4 + $0x1e8] sm:$0xff] %v1459_v6  ;;  %v1428_v11 = vpack.c.bf16 %v679_v10, %v677_v7 }
 0x149   :  { %v839_v12 = vpop.f32.mrf.mxu1  ;;  %v681_v14 = vpop.f32.mrf.mxu0 }
 0x14a   :  { %v1460_v13 = vpack.c.bf16 %v839_v12, %v837_v8  ;;  %1260 = vst [vmem:[%s2153_s4 + $0xf0] sm:$0xff] %v1428_v11 }
 0x14b   :  { %v841_v15 = vpop.f32.mrf.mxu1  ;;  %v683_v4 = vpop.f32.mrf.mxu0 }
 0x14c   :  { %1292 = vst [vmem:[%s2153_s4 + $0x1f0] sm:$0xff] %v1460_v13  ;;  %v1429_v16 = vpack.c.bf16 %v683_v4, %v681_v14 }
 0x14d   :  { %v843_v17 = vpop.f32.mrf.mxu1 }
 0x14e   :  { %v1461_v18 = vpack.c.bf16 %v843_v17, %v841_v15  ;;  %1261 = vst [vmem:[%s2153_s4 + $0xf8] sm:$0xff] %v1429_v16 }
 0x150   :  { %1293 = vst [vmem:[%s2153_s4 + $0x1f8] sm:$0xff] %v1461_v18 }

// kernel: _lambda_.9
= control target key start
LH: loop header
LB: loop body
LE: loop exit
PB: predicated region body
PF: predicated region fallthrough
CT: control target
= control target key end

     0   :  { %s3579_s15 = smov 0   ;;  %s3581_s16 = smov 0   ;;  %s4222_s0 = inlined_call_operand.vmem [shape: bf16[2048,16], index: 0, kind: input, shape index: {}]   ;;  %s4223_s1 = inlined_call_operand.vmem [shape: f32[1,16], index: 1, kind: input, shape index: {}]   ;;  %s4224_s2 = inlined_call_operand.vmem [shape: f32[1,16], index: 2, kind: input, shape index: {}]   ;;  %s4225_s3 = inlined_call_operand.vmem [shape: bf16[16,256], index: 3, kind: input, shape index: {}]   ;;  %s4226_s4 = inlined_call_operand.vmem [shape: bf16[2048,256], index: 4, kind: output, shape index: {}]  }
   0x1   :  { %s3583_s17 = smov 0  }
   0x2 LB: > { %s26_s18 = sadd.s32 1, %s3547_s16  ;;  %p2845_p0 = scmp.ge.s32.totalorder %s3551_s17, 1  ;;  %s3551_s17 = sphi %s3583_s17, %s14_s17   ;;  %s3547_s16 = sphi %s3581_s16, %s4228_s16   ;;  %s3543_s15 = sphi %s3579_s15, %s4227_s15  }
   0x3   : > { %p28_p1 = scmp.ge.s32.totalorder %s26_s18, 2  ;;  %p188_p2 = scmp.lt.s32.totalorder %s3551_s17, 3 }
   0x5   : > { %s4230_s18 = smov (%p28_p1, %s26_s18), 0  ;;  %p189_p3 = pnand %p2845_p0, %p188_p2 }
   0x6   : > { %s2846_s21 = sshll.u32 (!%p189_p3), %s3543_s15, 7 }
   0x7   : > { %192 = sbr.rel (%p189_p3) target bundleno = 477 (0x1dd), region = 36  ;;  %p225_p4 = scmp.lt.s32.totalorder (!%p189_p3), %s2846_s21, 255 }
   0xc   : > { %v3524_v0 = vld [vmem:[%s4225_s3 + $0x4] ss:$8 sps:$4 sm:$0xff]   ;;  %v3526_v1 = vld [vmem:[%s4225_s3] ss:$8 sps:$4 sm:$0xff]   ;;  %v3553_v2 = vmov 0   ;;  %s4232_s21 = smov (!%p225_p4, %s2846_s21), 255 }
   0xd   : > { %1204 = vmatprep.mubr.bf16.mxu0 %v3553_v2  ;;  %1524 = vmatprep.mubr.bf16.mxu1 %v3553_v2  ;;  %s2847_s24 = sshll.u32 %s4232_s21, 2  ;;  %v3616_v3 = vld [vmem:[%s4223_s1] ss:$0 sm:$0xff]  ;;  %vm979_vm0 = vcmask 130048   ;;  %s3049_s10 = sshll.u32 %s4232_s21, 3 }
   0xe   : > { %1186 = vmatprep.subr.bf16.mxu0 %v3524_v0  ;;  %3497 = vmatprep.subr.bf16.mxu1 %v3524_v0  ;;  %s3611_s27 = scalar_lea.vmem %s4222_s0, %s2847_s24  ;;  %v3625_v12 = vld [vmem:[%s4224_s2] ss:$0 sm:$0xff]  ;;  %s4005_s13 = scalar_lea.vmem %s4226_s4, %s3049_s10 }
   0xf   : > { %1187 = vmatpush1.bf16.msra.mxu0 %v3526_v1  ;;  %3498 = vmatpush1.bf16.msra.mxu1 %v3526_v1  ;;  %v3179_v4 = vld [vmem:[%s3611_s27] sm:$0xff]   ;;  %v3434_v6 = vld [vmem:[%s3611_s27 + $0x8] sm:$0xff]   ;;  %v3435_v33 = vld [vmem:[%s3611_s27 + $0x10] sm:$0xff]  }
  0x10   : > { %v3465_v5 = vld [vmem:[%s3611_s27 + $0x100] sm:$0xff]   ;;  %v3180_v7 = vunpack.c.l.bf16 %v3179_v4  ;;  %v3181_v8 = vunpack.c.h.bf16 %v3179_v4  ;;  %v3466_v11 = vld [vmem:[%s3611_s27 + $0x108] sm:$0xff]   ;;  %v3184_v13 = vunpack.c.l.bf16 %v3434_v6  ;;  %v3185_v14 = vunpack.c.h.bf16 %v3434_v6  ;;  %v3467_v38 = vld [vmem:[%s3611_s27 + $0x110] sm:$0xff]  }
  0x11   : > { %v3308_v9 = vunpack.c.l.bf16 %v3465_v5  ;;  %v3309_v10 = vunpack.c.h.bf16 %v3465_v5  ;;  %v3312_v15 = vunpack.c.l.bf16 %v3466_v11  ;;  %v3313_v16 = vunpack.c.h.bf16 %v3466_v11  ;;  %v3436_v49 = vld [vmem:[%s3611_s27 + $0x18] sm:$0xff]   ;;  %v3437_v11 = vld [vmem:[%s3611_s27 + $0x20] sm:$0xff]  }
  0x12   : > { %v512_v17 = vmul.f32 %v3180_v7, %v3616_v3  ;;  %v513_v18 = vmul.f32 %v3181_v8, %v3616_v3  ;;  %v514_v21 = vmul.f32 %v3184_v13, %v3616_v3  ;;  %v515_v22 = vmul.f32 %v3185_v14, %v3616_v3  ;;  %v3468_v52 = vld [vmem:[%s3611_s27 + $0x118] sm:$0xff]   ;;  %v3469_v13 = vld [vmem:[%s3611_s27 + $0x120] sm:$0xff]  }
  0x13   : > { %v576_v19 = vmul.f32 %v3308_v9, %v3616_v3  ;;  %v577_v20 = vmul.f32 %v3309_v10, %v3616_v3  ;;  %v578_v23 = vmul.f32 %v3312_v15, %v3616_v3  ;;  %v579_v24 = vmul.f32 %v3313_v16, %v3616_v3 }
  0x14   : > { %v647_v25 = vadd.f32 %v3625_v12, %v512_v17  ;;  %v648_v26 = vadd.f32 %v3625_v12, %v513_v18  ;;  %v649_v29 = vadd.f32 %v3625_v12, %v514_v21  ;;  %v650_v30 = vadd.f32 %v3625_v12, %v515_v22 }
  0x15   : > { %v711_v27 = vadd.f32 %v3625_v12, %v576_v19  ;;  %v712_v28 = vadd.f32 %v3625_v12, %v577_v20  ;;  %v713_v31 = vadd.f32 %v3625_v12, %v578_v23  ;;  %v714_v32 = vadd.f32 %v3625_v12, %v579_v24 }
  0x16   : > { %v775_v34 = vmax.f32 %v647_v25, 0.0  ;;  %v776_v35 = vmax.f32 %v648_v26, 0.0  ;;  %v777_v39 = vmax.f32 %v649_v29, 0.0  ;;  %v778_v40 = vmax.f32 %v650_v30, 0.0 }
  0x17   : > { %v839_v36 = vmax.f32 %v711_v27, 0.0  ;;  %v840_v37 = vmax.f32 %v712_v28, 0.0  ;;  %v3188_v43 = vunpack.c.l.bf16 %v3435_v33  ;;  %v3189_v44 = vunpack.c.h.bf16 %v3435_v33  ;;  %v3438_v28 = vld [vmem:[%s3611_s27 + $0x28] sm:$0xff]  }
  0x18   : > { %v903_v41 = vpack.c.bf16 %v776_v35, %v775_v34  ;;  %v841_v45 = vmax.f32 %v713_v31, 0.0  ;;  %v842_v46 = vmax.f32 %v714_v32, 0.0  ;;  %v3316_v47 = vunpack.c.l.bf16 %v3467_v38  ;;  %v3470_v33 = vld [vmem:[%s3611_s27 + $0x128] sm:$0xff]  }
  0x19   : > { %v935_v42 = vpack.c.bf16 %v840_v37, %v839_v36  ;;  %v3317_v48 = vunpack.c.h.bf16 %v3467_v38  ;;  %v516_v50 = vmul.f32 %v3188_v43, %v3616_v3  ;;  %v517_v51 = vmul.f32 %v3189_v44, %v3616_v3 }
  0x1a   : > { %2855 = vmatmul.mubr.msk.bf16.vlgmr.msra.gmra.mxu0 %vm979_vm0, %v903_v41  ;;  %v580_v53 = vmul.f32 %v3316_v47, %v3616_v3  ;;  %v3192_v55 = vunpack.c.l.bf16 %v3436_v49  ;;  %v3193_v56 = vunpack.c.h.bf16 %v3436_v49  ;;  %v904_v57 = vpack.c.bf16 %v778_v40, %v777_v39 }
  0x1b   : > { %2887 = vmatmul.mubr.msk.bf16.vlgmr.msra.gmra.mxu1 %vm979_vm0, %v935_v42  ;;  %1214 = vmatprep.mubr.bf16.mxu0 %v3553_v2  ;;  %v581_v54 = vmul.f32 %v3317_v48, %v3616_v3  ;;  %v936_v58 = vpack.c.bf16 %v842_v46, %v841_v45  ;;  %v3320_v59 = vunpack.c.l.bf16 %v3468_v52  ;;  %v3321_v60 = vunpack.c.h.bf16 %v3468_v52  ;;  %v3439_v52 = vld [vmem:[%s3611_s27 + $0x30] sm:$0xff]  }
  0x1c   : > { %1534 = vmatprep.mubr.bf16.mxu1 %v3553_v2  ;;  %v651_v61 = vadd.f32 %v3625_v12, %v516_v50  ;;  %v652_v62 = vadd.f32 %v3625_v12, %v517_v51  ;;  %v715_v63 = vadd.f32 %v3625_v12, %v580_v53  ;;  %v518_v1 = vmul.f32 %v3192_v55, %v3616_v3  ;;  %v3471_v53 = vld [vmem:[%s3611_s27 + $0x130] sm:$0xff]  }
  0x1d   : > { %v716_v0 = vadd.f32 %v3625_v12, %v581_v54  ;;  %v519_v4 = vmul.f32 %v3193_v56, %v3616_v3  ;;  %v582_v5 = vmul.f32 %v3320_v59, %v3616_v3  ;;  %v583_v6 = vmul.f32 %v3321_v60, %v3616_v3 }
  0x1e   : > { %v779_v7 = vmax.f32 %v651_v61, 0.0  ;;  %v780_v8 = vmax.f32 %v652_v62, 0.0  ;;  %v843_v9 = vmax.f32 %v715_v63, 0.0  ;;  %v653_v14 = vadd.f32 %v3625_v12, %v518_v1 }
  0x1f   : > { %v844_v10 = vmax.f32 %v716_v0, 0.0  ;;  %v654_v15 = vadd.f32 %v3625_v12, %v519_v4  ;;  %v717_v16 = vadd.f32 %v3625_v12, %v582_v5  ;;  %v718_v17 = vadd.f32 %v3625_v12, %v583_v6  ;;  %v3440_v6 = vld [vmem:[%s3611_s27 + $0x38] sm:$0xff]  }
  0x20   : > { %v3196_v18 = vunpack.c.l.bf16 %v3437_v11  ;;  %v3197_v19 = vunpack.c.h.bf16 %v3437_v11  ;;  %v905_v20 = vpack.c.bf16 %v780_v8, %v779_v7  ;;  %v3324_v22 = vunpack.c.l.bf16 %v3469_v13  ;;  %v3472_v11 = vld [vmem:[%s3611_s27 + $0x138] sm:$0xff]  }
  0x21   : > { %v937_v21 = vpack.c.bf16 %v844_v10, %v843_v9  ;;  %v3325_v23 = vunpack.c.h.bf16 %v3469_v13  ;;  %v781_v24 = vmax.f32 %v653_v14, 0.0  ;;  %v782_v25 = vmax.f32 %v654_v15, 0.0 }
  0x22   : > { %2856 = vmatmul.mubr.msk.bf16.gmra.mxu0 %vm979_vm0, %v904_v57  ;;  %v520_v26 = vmul.f32 %v3196_v18, %v3616_v3  ;;  %v521_v27 = vmul.f32 %v3197_v19, %v3616_v3  ;;  %v845_v29 = vmax.f32 %v717_v16, 0.0  ;;  %v846_v30 = vmax.f32 %v718_v17, 0.0 }
  0x23   : > { %2888 = vmatmul.mubr.msk.bf16.gmra.mxu1 %vm979_vm0, %v936_v58  ;;  %1224 = vmatprep.mubr.bf16.mxu0 %v3553_v2  ;;  %v584_v31 = vmul.f32 %v3324_v22, %v3616_v3  ;;  %v585_v32 = vmul.f32 %v3325_v23, %v3616_v3  ;;  %v3200_v34 = vunpack.c.l.bf16 %v3438_v28  ;;  %v3201_v35 = vunpack.c.h.bf16 %v3438_v28 }
  0x24   : > { %1544 = vmatprep.mubr.bf16.mxu1 %v3553_v2  ;;  %v906_v36 = vpack.c.bf16 %v782_v25, %v781_v24  ;;  %v655_v37 = vadd.f32 %v3625_v12, %v520_v26  ;;  %v656_v38 = vadd.f32 %v3625_v12, %v521_v27  ;;  %v3328_v39 = vunpack.c.l.bf16 %v3470_v33 }
  0x25   : > { %v938_v40 = vpack.c.bf16 %v846_v30, %v845_v29  ;;  %v719_v41 = vadd.f32 %v3625_v12, %v584_v31  ;;  %v720_v42 = vadd.f32 %v3625_v12, %v585_v32  ;;  %v3329_v43 = vunpack.c.h.bf16 %v3470_v33  ;;  %v3441_v31 = vld [vmem:[%s3611_s27 + $0x40] sm:$0xff]  }
  0x26   : > { %v522_v44 = vmul.f32 %v3200_v34, %v3616_v3  ;;  %v523_v45 = vmul.f32 %v3201_v35, %v3616_v3  ;;  %v783_v46 = vmax.f32 %v655_v37, 0.0  ;;  %v784_v47 = vmax.f32 %v656_v38, 0.0  ;;  %v3473_v32 = vld [vmem:[%s3611_s27 + $0x140] sm:$0xff]  }
  0x27   : > { %v586_v48 = vmul.f32 %v3328_v39, %v3616_v3  ;;  %v847_v49 = vmax.f32 %v719_v41, 0.0  ;;  %v848_v50 = vmax.f32 %v720_v42, 0.0  ;;  %v587_v51 = vmul.f32 %v3329_v43, %v3616_v3 }
  0x28   : > { %v657_v54 = vadd.f32 %v3625_v12, %v522_v44  ;;  %v658_v55 = vadd.f32 %v3625_v12, %v523_v45  ;;  %v907_v56 = vpack.c.bf16 %v784_v47, %v783_v46  ;;  %v3204_v58 = vunpack.c.l.bf16 %v3439_v52  ;;  %v3442_v47 = vld [vmem:[%s3611_s27 + $0x48] sm:$0xff]  }
  0x29   : > { %v721_v57 = vadd.f32 %v3625_v12, %v586_v48  ;;  %v3205_v59 = vunpack.c.h.bf16 %v3439_v52  ;;  %v939_v60 = vpack.c.bf16 %v848_v50, %v847_v49  ;;  %v722_v61 = vadd.f32 %v3625_v12, %v587_v51  ;;  %v3474_v52 = vld [vmem:[%s3611_s27 + $0x148] sm:$0xff]  }
  0x2a   : > { %2857 = vmatmul.mubr.msk.bf16.gmra.mxu0 %vm979_vm0, %v905_v20  ;;  %v3332_v62 = vunpack.c.l.bf16 %v3471_v53  ;;  %v3333_v63 = vunpack.c.h.bf16 %v3471_v53  ;;  %v785_v0 = vmax.f32 %v657_v54, 0.0  ;;  %v786_v1 = vmax.f32 %v658_v55, 0.0 }
  0x2b   : > { %2889 = vmatmul.mubr.msk.bf16.gmra.mxu1 %vm979_vm0, %v937_v21  ;;  %1234 = vmatprep.mubr.bf16.mxu0 %v3553_v2  ;;  %v524_v4 = vmul.f32 %v3204_v58, %v3616_v3  ;;  %v525_v5 = vmul.f32 %v3205_v59, %v3616_v3  ;;  %v849_v7 = vmax.f32 %v721_v57, 0.0  ;;  %v850_v8 = vmax.f32 %v722_v61, 0.0 }
  0x2c   : > { %1554 = vmatprep.mubr.bf16.mxu1 %v3553_v2  ;;  %v588_v9 = vmul.f32 %v3332_v62, %v3616_v3  ;;  %v589_v10 = vmul.f32 %v3333_v63, %v3616_v3  ;;  %v3208_v13 = vunpack.c.l.bf16 %v3440_v6  ;;  %v3209_v14 = vunpack.c.h.bf16 %v3440_v6 }
  0x2d   : > { %v908_v15 = vpack.c.bf16 %v786_v1, %v785_v0  ;;  %v659_v16 = vadd.f32 %v3625_v12, %v524_v4  ;;  %v660_v17 = vadd.f32 %v3625_v12, %v525_v5  ;;  %v3336_v18 = vunpack.c.l.bf16 %v3472_v11 }
  0x2e   : > { %v940_v19 = vpack.c.bf16 %v850_v8, %v849_v7  ;;  %v723_v20 = vadd.f32 %v3625_v12, %v588_v9  ;;  %v724_v21 = vadd.f32 %v3625_v12, %v589_v10  ;;  %v3337_v22 = vunpack.c.h.bf16 %v3472_v11  ;;  %v3443_v9 = vld [vmem:[%s3611_s27 + $0x50] sm:$0xff]  }
  0x2f   : > { %v526_v23 = vmul.f32 %v3208_v13, %v3616_v3  ;;  %v527_v24 = vmul.f32 %v3209_v14, %v3616_v3  ;;  %v787_v25 = vmax.f32 %v659_v16, 0.0  ;;  %v788_v26 = vmax.f32 %v660_v17, 0.0  ;;  %v3475_v10 = vld [vmem:[%s3611_s27 + $0x150] sm:$0xff]  }
  0x30   : > { %v590_v27 = vmul.f32 %v3336_v18, %v3616_v3  ;;  %v851_v28 = vmax.f32 %v723_v20, 0.0  ;;  %v852_v29 = vmax.f32 %v724_v21, 0.0  ;;  %v591_v30 = vmul.f32 %v3337_v22, %v3616_v3 }
  0x31   : > { %v661_v33 = vadd.f32 %v3625_v12, %v526_v23  ;;  %v662_v34 = vadd.f32 %v3625_v12, %v527_v24  ;;  %v909_v35 = vpack.c.bf16 %v788_v26, %v787_v25  ;;  %v3212_v37 = vunpack.c.l.bf16 %v3441_v31  ;;  %v3444_v26 = vld [vmem:[%s3611_s27 + $0x58] sm:$0xff]  }
  0x32   : > { %2858 = vmatmul.mubr.msk.bf16.gmra.mxu0 %vm979_vm0, %v906_v36  ;;  %v725_v36 = vadd.f32 %v3625_v12, %v590_v27  ;;  %v3213_v38 = vunpack.c.h.bf16 %v3441_v31  ;;  %v941_v39 = vpack.c.bf16 %v852_v29, %v851_v28  ;;  %v3340_v41 = vunpack.c.l.bf16 %v3473_v32  ;;  %v3476_v31 = vld [vmem:[%s3611_s27 + $0x158] sm:$0xff]  }
  0x33   : > { %2890 = vmatmul.mubr.msk.bf16.gmra.mxu1 %vm979_vm0, %v938_v40  ;;  %1244 = vmatprep.mubr.bf16.mxu0 %v3553_v2  ;;  %v726_v40 = vadd.f32 %v3625_v12, %v591_v30  ;;  %v3341_v42 = vunpack.c.h.bf16 %v3473_v32  ;;  %v789_v43 = vmax.f32 %v661_v33, 0.0  ;;  %v790_v44 = vmax.f32 %v662_v34, 0.0 }
  0x34   : > { %1564 = vmatprep.mubr.bf16.mxu1 %v3553_v2  ;;  %v528_v45 = vmul.f32 %v3212_v37, %v3616_v3  ;;  %v529_v46 = vmul.f32 %v3213_v38, %v3616_v3  ;;  %v853_v48 = vmax.f32 %v725_v36, 0.0  ;;  %v592_v50 = vmul.f32 %v3340_v41, %v3616_v3 }
  0x35   : > { %v854_v49 = vmax.f32 %v726_v40, 0.0  ;;  %v593_v51 = vmul.f32 %v3341_v42, %v3616_v3  ;;  %v3216_v53 = vunpack.c.l.bf16 %v3442_v47  ;;  %v3217_v54 = vunpack.c.h.bf16 %v3442_v47  ;;  %v3445_v47 = vld [vmem:[%s3611_s27 + $0x60] sm:$0xff]  }
  0x36   : > { %v910_v55 = vpack.c.bf16 %v790_v44, %v789_v43  ;;  %v664_v57 = vadd.f32 %v3625_v12, %v529_v46  ;;  %v3344_v58 = vunpack.c.l.bf16 %v3474_v52  ;;  %v3345_v62 = vunpack.c.h.bf16 %v3474_v52 }
  0x37   : > { %v942_v59 = vpack.c.bf16 %v854_v49, %v853_v48  ;;  %v728_v61 = vadd.f32 %v3625_v12, %v593_v51  ;;  %v530_v63 = vmul.f32 %v3216_v53, %v3616_v3  ;;  %v531_v0 = vmul.f32 %v3217_v54, %v3616_v3  ;;  %v3477_v51 = vld [vmem:[%s3611_s27 + $0x160] sm:$0xff]  }
  0x38   : > { %v792_v4 = vmax.f32 %v664_v57, 0.0  ;;  %v594_v5 = vmul.f32 %v3344_v58, %v3616_v3  ;;  %v595_v8 = vmul.f32 %v3345_v62, %v3616_v3  ;;  %v3220_v16 = vunpack.c.l.bf16 %v3443_v9 }
  0x39   : > { %v856_v7 = vmax.f32 %v728_v61, 0.0  ;;  %v665_v11 = vadd.f32 %v3625_v12, %v530_v63  ;;  %v666_v13 = vadd.f32 %v3625_v12, %v531_v0  ;;  %v3221_v17 = vunpack.c.h.bf16 %v3443_v9  ;;  %v3478_v9 = vld [vmem:[%s3611_s27 + $0x168] sm:$0xff]  }
  0x3a   : > { %2859 = vmatmul.mubr.msk.bf16.gmra.mxu0 %vm979_vm0, %v907_v56  ;;  %v663_v56 = vadd.f32 %v3625_v12, %v528_v45  ;;  %v3348_v20 = vunpack.c.l.bf16 %v3475_v10  ;;  %v3349_v21 = vunpack.c.h.bf16 %v3475_v10  ;;  %v532_v24 = vmul.f32 %v3220_v16, %v3616_v3 }
  0x3b   : > { %2891 = vmatmul.mubr.msk.bf16.gmra.mxu1 %vm979_vm0, %v939_v60  ;;  %1254 = vmatprep.mubr.bf16.mxu0 %v3553_v2  ;;  %v727_v60 = vadd.f32 %v3625_v12, %v592_v50  ;;  %v793_v22 = vmax.f32 %v665_v11, 0.0  ;;  %v794_v23 = vmax.f32 %v666_v13, 0.0  ;;  %v533_v25 = vmul.f32 %v3221_v17, %v3616_v3 }
  0x3c   : > { %1574 = vmatprep.mubr.bf16.mxu1 %v3553_v2  ;;  %v791_v1 = vmax.f32 %v663_v56, 0.0  ;;  %v596_v29 = vmul.f32 %v3348_v20, %v3616_v3  ;;  %v597_v30 = vmul.f32 %v3349_v21, %v3616_v3  ;;  %v3224_v33 = vunpack.c.l.bf16 %v3444_v26 }
  0x3d   : > { %v855_v6 = vmax.f32 %v727_v60, 0.0  ;;  %v912_v32 = vpack.c.bf16 %v794_v23, %v793_v22  ;;  %v667_v34 = vadd.f32 %v3625_v12, %v532_v24  ;;  %v3225_v36 = vunpack.c.h.bf16 %v3444_v26  ;;  %v3447_v26 = vld [vmem:[%s3611_s27 + $0x70] sm:$0xff]  }
  0x3e   : > { %v911_v14 = vpack.c.bf16 %v792_v4, %v791_v1  ;;  %v3352_v37 = vunpack.c.l.bf16 %v3476_v31  ;;  %v732_v40 = vadd.f32 %v3625_v12, %v597_v30  ;;  %v3353_v41 = vunpack.c.h.bf16 %v3476_v31  ;;  %v3446_v4 = vld [vmem:[%s3611_s27 + $0x68] sm:$0xff]   ;;  %v3479_v30 = vld [vmem:[%s3611_s27 + $0x170] sm:$0xff]  }
  0x3f   : > { %v943_v18 = vpack.c.bf16 %v856_v7, %v855_v6  ;;  %v534_v42 = vmul.f32 %v3224_v33, %v3616_v3  ;;  %v795_v43 = vmax.f32 %v667_v34, 0.0  ;;  %v535_v45 = vmul.f32 %v3225_v36, %v3616_v3 }
  0x40   : > { %v598_v46 = vmul.f32 %v3352_v37, %v3616_v3  ;;  %v860_v49 = vmax.f32 %v732_v40, 0.0  ;;  %v599_v50 = vmul.f32 %v3353_v41, %v3616_v3  ;;  %v3228_v53 = vunpack.c.l.bf16 %v3445_v47 }
  0x41   : > { %v669_v52 = vadd.f32 %v3625_v12, %v534_v42  ;;  %v3229_v57 = vunpack.c.h.bf16 %v3445_v47  ;;  %v3356_v60 = vunpack.c.l.bf16 %v3477_v51  ;;  %v3357_v61 = vunpack.c.h.bf16 %v3477_v51 }
  0x42   : > { %2860 = vmatmul.mubr.msk.bf16.gmra.mxu0 %vm979_vm0, %v908_v15  ;;  %v729_v15 = vadd.f32 %v3625_v12, %v594_v5  ;;  %v733_v56 = vadd.f32 %v3625_v12, %v598_v46  ;;  %v536_v62 = vmul.f32 %v3228_v53, %v3616_v3  ;;  %v3232_v11 = vunpack.c.l.bf16 %v3446_v4 }
  0x43   : > { %2892 = vmatmul.mubr.msk.bf16.gmra.mxu1 %vm979_vm0, %v940_v19  ;;  %1264 = vmatprep.mubr.bf16.mxu0 %v3553_v2  ;;  %v730_v19 = vadd.f32 %v3625_v12, %v595_v8  ;;  %v797_v63 = vmax.f32 %v669_v52, 0.0  ;;  %v537_v1 = vmul.f32 %v3229_v57, %v3616_v3  ;;  %v600_v7 = vmul.f32 %v3356_v60, %v3616_v3 }
  0x44   : > { %1584 = vmatprep.mubr.bf16.mxu1 %v3553_v2  ;;  %v857_v27 = vmax.f32 %v729_v15, 0.0  ;;  %v861_v5 = vmax.f32 %v733_v56, 0.0  ;;  %v601_v8 = vmul.f32 %v3357_v61, %v3616_v3  ;;  %v671_v10 = vadd.f32 %v3625_v12, %v536_v62 }
  0x45   : > { %v858_v28 = vmax.f32 %v730_v19, 0.0  ;;  %v3233_v15 = vunpack.c.h.bf16 %v3446_v4  ;;  %v3360_v16 = vunpack.c.l.bf16 %v3478_v9  ;;  %v3361_v20 = vunpack.c.h.bf16 %v3478_v9  ;;  %v3449_v4 = vld [vmem:[%s3611_s27 + $0x80] sm:$0xff]  }
  0x46   : > { %v736_v19 = vadd.f32 %v3625_v12, %v601_v8  ;;  %v538_v21 = vmul.f32 %v3232_v11, %v3616_v3  ;;  %v799_v22 = vmax.f32 %v671_v10, 0.0  ;;  %v3237_v36 = vunpack.c.h.bf16 %v3447_v26  ;;  %v3481_v8 = vld [vmem:[%s3611_s27 + $0x180] sm:$0xff]  }
  0x47   : > { %v944_v38 = vpack.c.bf16 %v858_v28, %v857_v27  ;;  %v539_v24 = vmul.f32 %v3233_v15, %v3616_v3  ;;  %v3365_v40 = vunpack.c.h.bf16 %v3479_v30  ;;  %v3244_v10 = vunpack.c.l.bf16 %v3449_v4 }
  0x48   : > { %v864_v28 = vmax.f32 %v736_v19, 0.0  ;;  %v673_v31 = vadd.f32 %v3625_v12, %v538_v21  ;;  %v3245_v15 = vunpack.c.h.bf16 %v3449_v4  ;;  %v3373_v19 = vunpack.c.h.bf16 %v3481_v8 }
  0x49   : > { %v674_v34 = vadd.f32 %v3625_v12, %v539_v24  ;;  %v3450_v24 = vld [vmem:[%s3611_s27 + $0x88] sm:$0xff]  }
  0x4a   : > { %2861 = vmatmul.mubr.msk.bf16.gmra.mxu0 %vm979_vm0, %v909_v35  ;;  %v668_v35 = vadd.f32 %v3625_v12, %v533_v25  ;;  %v602_v25 = vmul.f32 %v3360_v16, %v3616_v3  ;;  %v801_v42 = vmax.f32 %v673_v31, 0.0  ;;  %v3248_v31 = vunpack.c.l.bf16 %v3450_v24 }
  0x4b   : > { %2893 = vmatmul.mubr.msk.bf16.gmra.mxu1 %vm979_vm0, %v941_v39  ;;  %1274 = vmatprep.mubr.bf16.mxu0 %v3553_v2  ;;  %v731_v39 = vadd.f32 %v3625_v12, %v596_v29  ;;  %v603_v29 = vmul.f32 %v3361_v20, %v3616_v3  ;;  %v544_v20 = vmul.f32 %v3244_v10, %v3616_v3 }
  0x4c   : > { %1594 = vmatprep.mubr.bf16.mxu1 %v3553_v2  ;;  %v796_v44 = vmax.f32 %v668_v35, 0.0  ;;  %v737_v35 = vadd.f32 %v3625_v12, %v602_v25 }
  0x4d   : > { %v859_v48 = vmax.f32 %v731_v39, 0.0  ;;  %v3364_v39 = vunpack.c.l.bf16 %v3479_v30  ;;  %v679_v30 = vadd.f32 %v3625_v12, %v544_v20 }
  0x4e   : > { %v913_v54 = vpack.c.bf16 %v796_v44, %v795_v43  ;;  %v802_v43 = vmax.f32 %v674_v34, 0.0  ;;  %v541_v44 = vmul.f32 %v3237_v36, %v3616_v3  ;;  %v865_v46 = vmax.f32 %v737_v35, 0.0 }
  0x4f   : > { %v945_v58 = vpack.c.bf16 %v860_v49, %v859_v48  ;;  %v604_v48 = vmul.f32 %v3364_v39, %v3616_v3  ;;  %v605_v49 = vmul.f32 %v3365_v40, %v3616_v3  ;;  %v3249_v34 = vunpack.c.h.bf16 %v3450_v24  ;;  %v3453_v24 = vld [vmem:[%s3611_s27 + $0xa0] sm:$0xff]  }
  0x50   : > { %v916_v53 = vpack.c.bf16 %v802_v43, %v801_v42  ;;  %v546_v40 = vmul.f32 %v3248_v31, %v3616_v3 }
  0x51   : > { %v547_v43 = vmul.f32 %v3249_v34, %v3616_v3  ;;  %v3261_v34 = vunpack.c.h.bf16 %v3453_v24 }
  0x52   : > { %2862 = vmatmul.mubr.msk.bf16.gmra.mxu0 %vm979_vm0, %v910_v55  ;;  %v670_v55 = vadd.f32 %v3625_v12, %v535_v45  ;;  %v3448_v45 = vld [vmem:[%s3611_s27 + $0x78] sm:$0xff]  }
  0x53   : > { %2894 = vmatmul.mubr.msk.bf16.gmra.mxu1 %vm979_vm0, %v942_v59  ;;  %1284 = vmatprep.mubr.bf16.mxu0 %v3553_v2  ;;  %v734_v59 = vadd.f32 %v3625_v12, %v599_v50  ;;  %v3480_v50 = vld [vmem:[%s3611_s27 + $0x178] sm:$0xff]   ;;  %v3240_v52 = vunpack.c.l.bf16 %v3448_v45 }
  0x54   : > { %1604 = vmatprep.mubr.bf16.mxu1 %v3553_v2  ;;  %v798_v0 = vmax.f32 %v670_v55, 0.0  ;;  %v3241_v55 = vunpack.c.h.bf16 %v3448_v45  ;;  %v3368_v56 = vunpack.c.l.bf16 %v3480_v50  ;;  %v3369_v60 = vunpack.c.h.bf16 %v3480_v50  ;;  %v3451_v45 = vld [vmem:[%s3611_s27 + $0x90] sm:$0xff]  }
  0x55   : > { %v862_v6 = vmax.f32 %v734_v59, 0.0  ;;  %v740_v59 = vadd.f32 %v3625_v12, %v605_v49  ;;  %v542_v61 = vmul.f32 %v3240_v52, %v3616_v3  ;;  %v3483_v49 = vld [vmem:[%s3611_s27 + $0x190] sm:$0xff]   ;;  %v681_v50 = vadd.f32 %v3625_v12, %v546_v40 }
  0x56   : > { %v914_v13 = vpack.c.bf16 %v798_v0, %v797_v63  ;;  %v543_v0 = vmul.f32 %v3241_v55, %v3616_v3  ;;  %v3253_v55 = vunpack.c.h.bf16 %v3451_v45 }
  0x57   : > { %v946_v17 = vpack.c.bf16 %v862_v6, %v861_v5  ;;  %v868_v6 = vmax.f32 %v740_v59, 0.0  ;;  %v677_v9 = vadd.f32 %v3625_v12, %v542_v61  ;;  %v3381_v59 = vunpack.c.h.bf16 %v3483_v49 }
  0x58   : > { %v809_v61 = vmax.f32 %v681_v50, 0.0 }
  0x59   : > { %v805_v21 = vmax.f32 %v677_v9, 0.0 }
  0x5a   : > { %2863 = vmatmul.mubr.msk.bf16.gmra.mxu0 %vm979_vm0, %v911_v14  ;;  %v672_v14 = vadd.f32 %v3625_v12, %v537_v1  ;;  %v606_v1 = vmul.f32 %v3368_v56, %v3616_v3 }
  0x5b   : > { %2895 = vmatmul.mubr.msk.bf16.gmra.mxu1 %vm979_vm0, %v943_v18  ;;  %1294 = vmatprep.mubr.bf16.mxu0 %v3553_v2  ;;  %v735_v18 = vadd.f32 %v3625_v12, %v600_v7  ;;  %v607_v7 = vmul.f32 %v3369_v60, %v3616_v3 }
  0x5c   : > { %1614 = vmatprep.mubr.bf16.mxu1 %v3553_v2  ;;  %v800_v23 = vmax.f32 %v672_v14, 0.0  ;;  %v741_v14 = vadd.f32 %v3625_v12, %v606_v1 }
  0x5d   : > { %v863_v27 = vmax.f32 %v735_v18, 0.0  ;;  %v3372_v18 = vunpack.c.l.bf16 %v3481_v8 }
  0x5e   : > { %v915_v33 = vpack.c.bf16 %v800_v23, %v799_v22  ;;  %v545_v23 = vmul.f32 %v3245_v15, %v3616_v3  ;;  %v869_v25 = vmax.f32 %v741_v14, 0.0 }
  0x5f   : > { %v947_v37 = vpack.c.bf16 %v864_v28, %v863_v27  ;;  %v608_v27 = vmul.f32 %v3372_v18, %v3616_v3  ;;  %v609_v28 = vmul.f32 %v3373_v19, %v3616_v3 }
  0x62   : > { %2864 = vmatmul.mubr.msk.bf16.gmra.mxu0 %vm979_vm0, %v912_v32  ;;  %v3236_v32 = vunpack.c.l.bf16 %v3447_v26 }
  0x63   : > { %2896 = vmatmul.mubr.msk.bf16.gmra.mxu1 %vm979_vm0, %v944_v38  ;;  %1304 = vmatprep.mubr.bf16.mxu0 %v3553_v2  ;;  %v738_v38 = vadd.f32 %v3625_v12, %v603_v29  ;;  %v3482_v29 = vld [vmem:[%s3611_s27 + $0x188] sm:$0xff]  }
  0x64   : > { %1624 = vmatprep.mubr.bf16.mxu1 %v3553_v2  ;;  %v540_v41 = vmul.f32 %v3236_v32, %v3616_v3  ;;  %v3376_v35 = vunpack.c.l.bf16 %v3482_v29  ;;  %v3377_v39 = vunpack.c.h.bf16 %v3482_v29 }
  0x65   : > { %v866_v47 = vmax.f32 %v738_v38, 0.0  ;;  %v744_v38 = vadd.f32 %v3625_v12, %v609_v28  ;;  %v3485_v28 = vld [vmem:[%s3611_s27 + $0x1a0] sm:$0xff]  }
  0x66   : > { %v675_v51 = vadd.f32 %v3625_v12, %v540_v41  ;;  %v807_v41 = vmax.f32 %v679_v30, 0.0  ;;  %v3260_v30 = vunpack.c.l.bf16 %v3453_v24 }
  0x67   : > { %v948_v57 = vpack.c.bf16 %v866_v47, %v865_v46  ;;  %v872_v47 = vmax.f32 %v744_v38, 0.0  ;;  %v3389_v38 = vunpack.c.h.bf16 %v3485_v28 }
  0x68   : > { %v803_v62 = vmax.f32 %v675_v51, 0.0  ;;  %v3252_v51 = vunpack.c.l.bf16 %v3451_v45 }
  0x6a   : > { %2865 = vmatmul.mubr.msk.bf16.gmra.mxu0 %vm979_vm0, %v913_v54  ;;  %v676_v54 = vadd.f32 %v3625_v12, %v541_v44  ;;  %v610_v44 = vmul.f32 %v3376_v35, %v3616_v3  ;;  %v548_v60 = vmul.f32 %v3252_v51, %v3616_v3 }
  0x6b   : > { %2897 = vmatmul.mubr.msk.bf16.gmra.mxu1 %vm979_vm0, %v945_v58  ;;  %1314 = vmatprep.mubr.bf16.mxu0 %v3553_v2  ;;  %v739_v58 = vadd.f32 %v3625_v12, %v604_v48  ;;  %v611_v48 = vmul.f32 %v3377_v39, %v3616_v3  ;;  %v552_v39 = vmul.f32 %v3260_v30, %v3616_v3  ;;  %v3943_v30 = vld [vmem:[%s4224_s2] ss:$0 sm:$0xff] }
  0x6c   : > { %1634 = vmatprep.mubr.bf16.mxu1 %v3553_v2  ;;  %v804_v63 = vmax.f32 %v676_v54, 0.0  ;;  %v745_v54 = vadd.f32 %v3625_v12, %v610_v44  ;;  %v683_v8 = vadd.f32 %v3625_v12, %v548_v60 }
  0x6d   : > { %v867_v5 = vmax.f32 %v739_v58, 0.0  ;;  %v3380_v58 = vunpack.c.l.bf16 %v3483_v49  ;;  %v687_v49 = vadd.f32 %v3625_v12, %v552_v39 }
  0x6e   : > { %v917_v11 = vpack.c.bf16 %v804_v63, %v803_v62  ;;  %v549_v63 = vmul.f32 %v3253_v55, %v3616_v3  ;;  %v873_v1 = vmax.f32 %v745_v54, 0.0  ;;  %v811_v20 = vmax.f32 %v683_v8, 0.0 }
  0x6f   : > { %v949_v16 = vpack.c.bf16 %v868_v6, %v867_v5  ;;  %v612_v5 = vmul.f32 %v3380_v58, %v3616_v3  ;;  %v613_v6 = vmul.f32 %v3381_v59, %v3616_v3  ;;  %v815_v60 = vmax.f32 %v687_v49, 0.0 }
  0x72   : > { %2866 = vmatmul.mubr.msk.bf16.gmra.mxu0 %vm979_vm0, %v914_v13  ;;  %v678_v13 = vadd.f32 %v3625_v12, %v543_v0  ;;  %v3452_v0 = vld [vmem:[%s3611_s27 + $0x98] sm:$0xff]  }
  0x73   : > { %2898 = vmatmul.mubr.msk.bf16.gmra.mxu1 %vm979_vm0, %v946_v17  ;;  %1324 = vmatprep.mubr.bf16.mxu0 %v3553_v2  ;;  %v742_v17 = vadd.f32 %v3625_v12, %v607_v7  ;;  %v3484_v7 = vld [vmem:[%s3611_s27 + $0x198] sm:$0xff]   ;;  %v3256_v9 = vunpack.c.l.bf16 %v3452_v0 }
  0x74   : > { %1644 = vmatprep.mubr.bf16.mxu1 %v3553_v2  ;;  %v806_v22 = vmax.f32 %v678_v13, 0.0  ;;  %v3257_v13 = vunpack.c.h.bf16 %v3452_v0  ;;  %v3384_v14 = vunpack.c.l.bf16 %v3484_v7  ;;  %v3385_v18 = vunpack.c.h.bf16 %v3484_v7  ;;  %v3455_v0 = vld [vmem:[%s3611_s27 + $0xb0] sm:$0xff]  }
  0x75   : > { %v870_v26 = vmax.f32 %v742_v17, 0.0  ;;  %v748_v17 = vadd.f32 %v3625_v12, %v613_v6  ;;  %v550_v19 = vmul.f32 %v3256_v9, %v3616_v3  ;;  %v3487_v6 = vld [vmem:[%s3611_s27 + $0x1b0] sm:$0xff]   ;;  %v3268_v8 = vunpack.c.l.bf16 %v3455_v0 }
  0x76   : > { %v918_v32 = vpack.c.bf16 %v806_v22, %v805_v21  ;;  %v551_v22 = vmul.f32 %v3257_v13, %v3616_v3  ;;  %v3269_v13 = vunpack.c.h.bf16 %v3455_v0 }
  0x77   : > { %v950_v36 = vpack.c.bf16 %v870_v26, %v869_v25  ;;  %v876_v26 = vmax.f32 %v748_v17, 0.0  ;;  %v685_v29 = vadd.f32 %v3625_v12, %v550_v19  ;;  %v3928_v19 = vld [vmem:[%s4223_s1] ss:$0 sm:$0xff] }
  0x79   : > { %v813_v40 = vmax.f32 %v685_v29, 0.0 }
  0x7a   : > { %2867 = vmatmul.mubr.msk.bf16.gmra.mxu0 %vm979_vm0, %v915_v33  ;;  %v680_v33 = vadd.f32 %v3625_v12, %v545_v23  ;;  %v614_v23 = vmul.f32 %v3384_v14, %v3616_v3 }
  0x7b   : > { %2899 = vmatmul.mubr.msk.bf16.gmra.mxu1 %vm979_vm0, %v947_v37  ;;  %1334 = vmatprep.mubr.bf16.mxu0 %v3553_v2  ;;  %v743_v37 = vadd.f32 %v3625_v12, %v608_v27  ;;  %v615_v27 = vmul.f32 %v3385_v18, %v3616_v3 }
  0x7c   : > { %1654 = vmatprep.mubr.bf16.mxu1 %v3553_v2  ;;  %v808_v42 = vmax.f32 %v680_v33, 0.0  ;;  %v749_v33 = vadd.f32 %v3625_v12, %v614_v23 }
  0x7d   : > { %v871_v46 = vmax.f32 %v743_v37, 0.0  ;;  %v3388_v37 = vunpack.c.l.bf16 %v3485_v28 }
  0x7e   : > { %v919_v52 = vpack.c.bf16 %v808_v42, %v807_v41  ;;  %v553_v42 = vmul.f32 %v3261_v34, %v3616_v3  ;;  %v877_v44 = vmax.f32 %v749_v33, 0.0 }
  0x7f   : > { %v951_v56 = vpack.c.bf16 %v872_v47, %v871_v46  ;;  %v616_v46 = vmul.f32 %v3388_v37, %v3616_v3  ;;  %v617_v47 = vmul.f32 %v3389_v38, %v3616_v3 }
  0x82   : > { %2868 = vmatmul.mubr.msk.bf16.gmra.mxu0 %vm979_vm0, %v916_v53  ;;  %v682_v53 = vadd.f32 %v3625_v12, %v547_v43  ;;  %v3454_v43 = vld [vmem:[%s3611_s27 + $0xa8] sm:$0xff]  }
  0x83   : > { %2900 = vmatmul.mubr.msk.bf16.gmra.mxu1 %vm979_vm0, %v948_v57  ;;  %1344 = vmatprep.mubr.bf16.mxu0 %v3553_v2  ;;  %v746_v57 = vadd.f32 %v3625_v12, %v611_v48  ;;  %v3486_v48 = vld [vmem:[%s3611_s27 + $0x1a8] sm:$0xff]   ;;  %v3264_v50 = vunpack.c.l.bf16 %v3454_v43 }
  0x84   : > { %1664 = vmatprep.mubr.bf16.mxu1 %v3553_v2  ;;  %v810_v62 = vmax.f32 %v682_v53, 0.0  ;;  %v3265_v53 = vunpack.c.h.bf16 %v3454_v43  ;;  %v3392_v54 = vunpack.c.l.bf16 %v3486_v48  ;;  %v3393_v58 = vunpack.c.h.bf16 %v3486_v48  ;;  %v3457_v43 = vld [vmem:[%s3611_s27 + $0xc0] sm:$0xff]  }
  0x85   : > { %v874_v4 = vmax.f32 %v746_v57, 0.0  ;;  %v752_v57 = vadd.f32 %v3625_v12, %v617_v47  ;;  %v554_v59 = vmul.f32 %v3264_v50, %v3616_v3  ;;  %v3489_v47 = vld [vmem:[%s3611_s27 + $0x1c0] sm:$0xff]   ;;  %v3276_v50 = vunpack.c.l.bf16 %v3457_v43 }
  0x86   : > { %v920_v10 = vpack.c.bf16 %v810_v62, %v809_v61  ;;  %v555_v62 = vmul.f32 %v3265_v53, %v3616_v3  ;;  %v3277_v53 = vunpack.c.h.bf16 %v3457_v43 }
  0x87   : > { %v952_v15 = vpack.c.bf16 %v874_v4, %v873_v1  ;;  %v880_v4 = vmax.f32 %v752_v57, 0.0  ;;  %v689_v7 = vadd.f32 %v3625_v12, %v554_v59  ;;  %v3405_v57 = vunpack.c.h.bf16 %v3489_v47 }
  0x89   : > { %v817_v17 = vmax.f32 %v689_v7, 0.0 }
  0x8a   : > { %2869 = vmatmul.mubr.msk.bf16.gmra.mxu0 %vm979_vm0, %v917_v11  ;;  %v684_v11 = vadd.f32 %v3625_v12, %v549_v63  ;;  %v618_v63 = vmul.f32 %v3392_v54, %v3616_v3 }
  0x8b   : > { %2901 = vmatmul.mubr.msk.bf16.gmra.mxu1 %vm979_vm0, %v949_v16  ;;  %1354 = vmatprep.mubr.bf16.mxu0 %v3553_v2  ;;  %v747_v16 = vadd.f32 %v3625_v12, %v612_v5  ;;  %v619_v5 = vmul.f32 %v3393_v58, %v3616_v3  ;;  %v3396_v3 = vunpack.c.l.bf16 %v3487_v6 }
  0x8c   : > { %1674 = vmatprep.mubr.bf16.mxu1 %v3553_v2  ;;  %v812_v21 = vmax.f32 %v684_v11, 0.0  ;;  %v753_v11 = vadd.f32 %v3625_v12, %v618_v63 }
  0x8d   : > { %v875_v25 = vmax.f32 %v747_v16, 0.0  ;;  %v3397_v16 = vunpack.c.h.bf16 %v3487_v6  ;;  %v620_v24 = vmul.f32 %v3928_v19, %v3396_v3 }
  0x8e   : > { %v921_v31 = vpack.c.bf16 %v812_v21, %v811_v20  ;;  %v556_v20 = vmul.f32 %v3928_v19, %v3268_v8  ;;  %v557_v21 = vmul.f32 %v3928_v19, %v3269_v13  ;;  %v881_v23 = vmax.f32 %v753_v11, 0.0 }
  0x8f   : > { %v953_v35 = vpack.c.bf16 %v876_v26, %v875_v25  ;;  %v621_v25 = vmul.f32 %v3928_v19, %v3397_v16  ;;  %v3488_v26 = vld [vmem:[%s3611_s27 + $0x1b8] sm:$0xff]  }
  0x90   : > { %v3400_v33 = vunpack.c.l.bf16 %v3488_v26  ;;  %v3401_v37 = vunpack.c.h.bf16 %v3488_v26 }
  0x92   : > { %2870 = vmatmul.mubr.msk.bf16.gmra.mxu0 %vm979_vm0, %v918_v32  ;;  %v686_v32 = vadd.f32 %v3625_v12, %v551_v22  ;;  %v3456_v22 = vld [vmem:[%s3611_s27 + $0xb8] sm:$0xff]  }
  0x93   : > { %2902 = vmatmul.mubr.msk.bf16.gmra.mxu1 %vm979_vm0, %v950_v36  ;;  %1364 = vmatprep.mubr.bf16.mxu0 %v3553_v2  ;;  %v750_v36 = vadd.f32 %v3625_v12, %v615_v27  ;;  %v3272_v27 = vunpack.c.l.bf16 %v3456_v22  ;;  %v3273_v28 = vunpack.c.h.bf16 %v3456_v22  ;;  %v3459_v22 = vld [vmem:[%s3611_s27 + $0xd0] sm:$0xff]  }
  0x94   : > { %1684 = vmatprep.mubr.bf16.mxu1 %v3553_v2  ;;  %v814_v41 = vmax.f32 %v686_v32, 0.0  ;;  %v692_v32 = vadd.f32 %v3943_v30, %v557_v21  ;;  %v3284_v26 = vunpack.c.l.bf16 %v3459_v22 }
  0x95   : > { %v878_v45 = vmax.f32 %v750_v36, 0.0  ;;  %v756_v36 = vadd.f32 %v3943_v30, %v621_v25  ;;  %v558_v38 = vmul.f32 %v3928_v19, %v3272_v27  ;;  %v559_v39 = vmul.f32 %v3928_v19, %v3273_v28  ;;  %v3491_v25 = vld [vmem:[%s3611_s27 + $0x1d0] sm:$0xff]  }
  0x96   : > { %v922_v51 = vpack.c.bf16 %v814_v41, %v813_v40  ;;  %v820_v41 = vmax.f32 %v692_v32, 0.0  ;;  %v3285_v27 = vunpack.c.h.bf16 %v3459_v22 }
  0x97   : > { %v954_v55 = vpack.c.bf16 %v878_v45, %v877_v44  ;;  %v884_v45 = vmax.f32 %v756_v36, 0.0  ;;  %v693_v48 = vadd.f32 %v3943_v30, %v558_v38  ;;  %v694_v49 = vadd.f32 %v3943_v30, %v559_v39 }
  0x98   : > { %v3413_v36 = vunpack.c.h.bf16 %v3491_v25  ;;  %v565_v38 = vmul.f32 %v3928_v19, %v3285_v27 }
  0x99   : > { %v821_v58 = vmax.f32 %v693_v48, 0.0  ;;  %v822_v59 = vmax.f32 %v694_v49, 0.0  ;;  %v3492_v48 = vld [vmem:[%s3611_s27 + $0x1d8] sm:$0xff]  }
  0x9a   : > { %2871 = vmatmul.mubr.msk.bf16.gmra.mxu0 %vm979_vm0, %v919_v52  ;;  %v688_v52 = vadd.f32 %v3625_v12, %v553_v42  ;;  %v622_v42 = vmul.f32 %v3928_v19, %v3400_v33 }
  0x9b   : > { %2903 = vmatmul.mubr.msk.bf16.gmra.mxu1 %vm979_vm0, %v951_v56  ;;  %1374 = vmatprep.mubr.bf16.mxu0 %v3553_v2  ;;  %v751_v56 = vadd.f32 %v3625_v12, %v616_v46  ;;  %v623_v46 = vmul.f32 %v3928_v19, %v3401_v37  ;;  %v926_v6 = vpack.c.bf16 %v822_v59, %v821_v58  ;;  %v3416_v58 = vunpack.c.l.bf16 %v3492_v48 }
  0x9c   : > { %1694 = vmatprep.mubr.bf16.mxu1 %v3553_v2  ;;  %v816_v61 = vmax.f32 %v688_v52, 0.0  ;;  %v757_v52 = vadd.f32 %v3943_v30, %v622_v42  ;;  %v564_v37 = vmul.f32 %v3928_v19, %v3284_v26 }
  0x9d   : > { %v879_v1 = vmax.f32 %v751_v56, 0.0  ;;  %v3404_v56 = vunpack.c.l.bf16 %v3489_v47  ;;  %v629_v47 = vmul.f32 %v3928_v19, %v3413_v36 }
  0x9e   : > { %v923_v9 = vpack.c.bf16 %v816_v61, %v815_v60  ;;  %v560_v60 = vmul.f32 %v3928_v19, %v3276_v50  ;;  %v561_v61 = vmul.f32 %v3928_v19, %v3277_v53 }
  0x9f   : > { %v955_v14 = vpack.c.bf16 %v880_v4, %v879_v1  ;;  %v624_v0 = vmul.f32 %v3928_v19, %v3404_v56  ;;  %v625_v1 = vmul.f32 %v3928_v19, %v3405_v57  ;;  %v3458_v4 = vld [vmem:[%s3611_s27 + $0xc8] sm:$0xff]  }
  0xa0   : > { %v695_v7 = vadd.f32 %v3943_v30, %v560_v60  ;;  %v696_v8 = vadd.f32 %v3943_v30, %v561_v61 }
  0xa2   : > { %2872 = vmatmul.mubr.msk.bf16.gmra.mxu0 %vm979_vm0, %v920_v10  ;;  %v690_v10 = vadd.f32 %v3625_v12, %v555_v62  ;;  %v885_v62 = vmax.f32 %v757_v52, 0.0  ;;  %v823_v16 = vmax.f32 %v695_v7, 0.0  ;;  %v700_v52 = vadd.f32 %v3943_v30, %v565_v38 }
  0xa3   : > { %2904 = vmatmul.mubr.msk.bf16.gmra.mxu1 %vm979_vm0, %v952_v15  ;;  %1384 = vmatprep.mubr.bf16.mxu0 %v3553_v2  ;;  %v754_v15 = vadd.f32 %v3625_v12, %v619_v5  ;;  %v3490_v5 = vld [vmem:[%s3611_s27 + $0x1c8] sm:$0xff]  }
  0xa4   : > { %1704 = vmatprep.mubr.bf16.mxu1 %v3553_v2  ;;  %v818_v18 = vmax.f32 %v690_v10, 0.0  ;;  %v3281_v10 = vunpack.c.h.bf16 %v3458_v4  ;;  %v3408_v11 = vunpack.c.l.bf16 %v3490_v5  ;;  %v3409_v3 = vunpack.c.h.bf16 %v3490_v5 }
  0xa5   : > { %v882_v12 = vmax.f32 %v754_v15, 0.0  ;;  %v760_v15 = vadd.f32 %v3943_v30, %v625_v1 }
  0xa6   : > { %v924_v29 = vpack.c.bf16 %v818_v18, %v817_v17  ;;  %v824_v17 = vmax.f32 %v696_v8, 0.0  ;;  %v626_v21 = vmul.f32 %v3928_v19, %v3408_v11  ;;  %v630_v11 = vmul.f32 %v3928_v19, %v3416_v58 }
  0xa7   : > { %v956_v34 = vpack.c.bf16 %v882_v12, %v881_v23  ;;  %v888_v12 = vmax.f32 %v760_v15, 0.0 }
  0xa8   : > { %v927_v28 = vpack.c.bf16 %v824_v17, %v823_v16  ;;  %v761_v32 = vadd.f32 %v3943_v30, %v626_v21  ;;  %v765_v27 = vadd.f32 %v3943_v30, %v630_v11 }
  0xaa   : > { %2873 = vmatmul.mubr.msk.bf16.gmra.mxu0 %vm979_vm0, %v921_v31  ;;  %v691_v31 = vadd.f32 %v3943_v30, %v556_v20  ;;  %v563_v20 = vmul.f32 %v3928_v19, %v3281_v10 }
  0xab   : > { %2905 = vmatmul.mubr.msk.bf16.gmra.mxu1 %vm979_vm0, %v953_v35  ;;  %1394 = vmatprep.mubr.bf16.mxu0 %v3553_v2  ;;  %v755_v35 = vadd.f32 %v3943_v30, %v620_v24  ;;  %v627_v24 = vmul.f32 %v3928_v19, %v3409_v3 }
  0xac   : > { %1714 = vmatprep.mubr.bf16.mxu1 %v3553_v2  ;;  %v819_v40 = vmax.f32 %v691_v31, 0.0  ;;  %v698_v31 = vadd.f32 %v3943_v30, %v563_v20 }
  0xad   : > { %v883_v44 = vmax.f32 %v755_v35, 0.0  ;;  %v3412_v35 = vunpack.c.l.bf16 %v3491_v25 }
  0xaf   : > { %v957_v54 = vpack.c.bf16 %v884_v45, %v883_v44  ;;  %v889_v44 = vmax.f32 %v761_v32, 0.0 }
  0xb2   : > { %2874 = vmatmul.mubr.msk.bf16.gmra.mxu0 %vm979_vm0, %v922_v51  ;;  %v925_v51 = vpack.c.bf16 %v820_v41, %v819_v40  ;;  %v826_v40 = vmax.f32 %v698_v31, 0.0  ;;  %v3460_v41 = vld [vmem:[%s3611_s27 + $0xd8] sm:$0xff]  }
  0xb3   : > { %2906 = vmatmul.mubr.msk.bf16.gmra.mxu1 %vm979_vm0, %v954_v55  ;;  %1404 = vmatprep.mubr.bf16.mxu0 %v3553_v2  ;;  %v758_v55 = vadd.f32 %v3943_v30, %v623_v46  ;;  %v628_v46 = vmul.f32 %v3928_v19, %v3412_v35  ;;  %v3288_v53 = vunpack.c.l.bf16 %v3460_v41 }
  0xb4   : > { %1724 = vmatprep.mubr.bf16.mxu1 %v3553_v2 }
  0xb5   : > { %v886_v63 = vmax.f32 %v758_v55, 0.0  ;;  %v566_v7 = vmul.f32 %v3928_v19, %v3288_v53 }
  0xb7   : > { %v958_v13 = vpack.c.bf16 %v886_v63, %v885_v62  ;;  %v763_v62 = vadd.f32 %v3943_v30, %v628_v46  ;;  %v764_v63 = vadd.f32 %v3943_v30, %v629_v47 }
  0xb9   : > { %v891_v3 = vmax.f32 %v763_v62, 0.0  ;;  %v892_v16 = vmax.f32 %v764_v63, 0.0 }
  0xba   : > { %2875 = vmatmul.mubr.msk.bf16.gmra.mxu0 %vm979_vm0, %v923_v9  ;;  %v3280_v9 = vunpack.c.l.bf16 %v3458_v4 }
  0xbb   : > { %2907 = vmatmul.mubr.msk.bf16.gmra.mxu1 %vm979_vm0, %v955_v14  ;;  %1414 = vmatprep.mubr.bf16.mxu0 %v3553_v2  ;;  %v759_v14 = vadd.f32 %v3943_v30, %v624_v0  ;;  %v3417_v0 = vunpack.c.h.bf16 %v3492_v48  ;;  %v961_v32 = vpack.c.bf16 %v892_v16, %v891_v3 }
  0xbc   : > { %1734 = vmatprep.mubr.bf16.mxu1 %v3553_v2  ;;  %v562_v18 = vmul.f32 %v3928_v19, %v3280_v9 }
  0xbd   : > { %v887_v23 = vmax.f32 %v759_v14, 0.0  ;;  %v631_v17 = vmul.f32 %v3928_v19, %v3417_v0 }
  0xbf   : > { %v959_v33 = vpack.c.bf16 %v888_v12, %v887_v23  ;;  %v701_v23 = vadd.f32 %v3943_v30, %v566_v7 }
  0xc1   : > { %v829_v38 = vmax.f32 %v701_v23, 0.0 }
  0xc2   : > { %2876 = vmatmul.mubr.msk.bf16.gmra.mxu0 %vm979_vm0, %v924_v29  ;;  %v697_v29 = vadd.f32 %v3943_v30, %v562_v18  ;;  %v3493_v18 = vld [vmem:[%s3611_s27 + $0x1e0] sm:$0xff]  }
  0xc3   : > { %2908 = vmatmul.mubr.msk.bf16.gmra.mxu1 %vm979_vm0, %v956_v34  ;;  %1424 = vmatprep.mubr.bf16.mxu0 %v3553_v2  ;;  %v762_v34 = vadd.f32 %v3943_v30, %v627_v24  ;;  %v3421_v35 = vunpack.c.h.bf16 %v3493_v18 }
  0xc4   : > { %1744 = vmatprep.mubr.bf16.mxu1 %v3553_v2  ;;  %v825_v39 = vmax.f32 %v697_v29, 0.0 }
  0xc5   : > { %v890_v45 = vmax.f32 %v762_v34, 0.0  ;;  %v3420_v34 = vunpack.c.l.bf16 %v3493_v18 }
  0xc6   : > { %v928_v57 = vpack.c.bf16 %v826_v40, %v825_v39 }
  0xc7   : > { %v960_v61 = vpack.c.bf16 %v890_v45, %v889_v44  ;;  %v3462_v44 = vld [vmem:[%s3611_s27 + $0xe8] sm:$0xff]  }
  0xca   : > { %2877 = vmatmul.mubr.msk.bf16.gmra.mxu0 %vm979_vm0, %v925_v51  ;;  %v699_v51 = vadd.f32 %v3943_v30, %v564_v37 }
  0xcb   : > { %2909 = vmatmul.mubr.msk.bf16.gmra.mxu1 %vm979_vm0, %v957_v54  ;;  %1434 = vmatprep.mubr.bf16.mxu0 %v3553_v2  ;;  %v3289_v54 = vunpack.c.h.bf16 %v3460_v41 }
  0xcc   : > { %1754 = vmatprep.mubr.bf16.mxu1 %v3553_v2  ;;  %v827_v5 = vmax.f32 %v699_v51, 0.0  ;;  %v3494_v51 = vld [vmem:[%s3611_s27 + $0x1e8] sm:$0xff]  }
  0xcd   : > { %v567_v8 = vmul.f32 %v3928_v19, %v3289_v54 }
  0xcf   : > { %v702_v12 = vadd.f32 %v3943_v30, %v567_v8 }
  0xd1   : > { %v830_v39 = vmax.f32 %v702_v12, 0.0 }
  0xd2   : > { %2878 = vmatmul.mubr.msk.bf16.gmra.mxu0 %vm979_vm0, %v926_v6  ;;  %v828_v6 = vmax.f32 %v700_v52, 0.0 }
  0xd3   : > { %2910 = vmatmul.mubr.msk.bf16.gmra.mxu1 %vm979_vm0, %v958_v13  ;;  %1444 = vmatprep.mubr.bf16.mxu0 %v3553_v2  ;;  %v3461_v13 = vld [vmem:[%s3611_s27 + $0xe0] sm:$0xff]   ;;  %v930_v54 = vpack.c.bf16 %v830_v39, %v829_v38 }
  0xd4   : > { %1764 = vmatprep.mubr.bf16.mxu1 %v3553_v2  ;;  %v929_v22 = vpack.c.bf16 %v828_v6, %v827_v5  ;;  %v3292_v24 = vunpack.c.l.bf16 %v3461_v13 }
  0xd6   : > { %v568_v40 = vmul.f32 %v3928_v19, %v3292_v24 }
  0xda   : > { %v1206_v42 = vpop.f32.mrf.mxu0  ;;  %2879 = vmatmul.mubr.msk.bf16.gmra.mxu0 %vm979_vm0, %v927_v28  ;;  %v3293_v28 = vunpack.c.h.bf16 %v3461_v13 }
  0xdb   : > { %v1526_v43 = vpop.f32.mrf.mxu1  ;;  %2911 = vmatmul.mubr.msk.bf16.gmra.mxu1 %vm979_vm0, %v959_v33  ;;  %1454 = vmatprep.mubr.bf16.mxu0 %v3553_v2  ;;  %v766_v33 = vadd.f32 %v3943_v30, %v631_v17 }
  0xdc   : > { %1774 = vmatprep.mubr.bf16.mxu1 %v3553_v2  ;;  %v1208_v49 = vpop.f32.mrf.mxu0  ;;  %v569_v48 = vmul.f32 %v3928_v19, %v3293_v28 }
  0xdd   : > { %v1528_v50 = vpop.f32.mrf.mxu1  ;;  %v3050_v55 = vpack.c.bf16 %v1208_v49, %v1206_v42  ;;  %v894_v47 = vmax.f32 %v766_v33, 0.0  ;;  %v632_v49 = vmul.f32 %v3928_v19, %v3420_v34 }
  0xde   : > { %v3114_v56 = vpack.c.bf16 %v1528_v50, %v1526_v43  ;;  %v1210_v59 = vpop.f32.mrf.mxu0  ;;  %v893_v43 = vmax.f32 %v765_v27, 0.0  ;;  %v633_v50 = vmul.f32 %v3928_v19, %v3421_v35 }
  0xdf   : > { %v1530_v60 = vpop.f32.mrf.mxu1  ;;  %2613 = vst [vmem:[%s4005_s13] sm:$0xff] %v3050_v55  ;;  %v703_v55 = vadd.f32 %v3943_v30, %v568_v40 }
  0xe0   : > { %2677 = vst [vmem:[%s4005_s13 + $0x200] sm:$0xff] %v3114_v56  ;;  %v1212_v1 = vpop.f32.mrf.mxu0  ;;  %v3296_v56 = vunpack.c.l.bf16 %v3462_v44  ;;  %v962_v0 = vpack.c.bf16 %v894_v47, %v893_v43  ;;  %v768_v5 = vadd.f32 %v3943_v30, %v633_v50 }
  0xe1   : > { %v1532_v4 = vpop.f32.mrf.mxu1  ;;  %v3051_v9 = vpack.c.bf16 %v1212_v1, %v1210_v59  ;;  %v704_v1 = vadd.f32 %v3943_v30, %v569_v48  ;;  %v831_v17 = vmax.f32 %v703_v55, 0.0 }
  0xe2   : > { %v3115_v10 = vpack.c.bf16 %v1532_v4, %v1530_v60  ;;  %v1216_v14 = vpop.f32.mrf.mxu0  ;;  %2880 = vmatmul.mubr.msk.bf16.gmra.mxu0 %vm979_vm0, %v928_v57  ;;  %v3297_v57 = vunpack.c.h.bf16 %v3462_v44  ;;  %v3424_v60 = vunpack.c.l.bf16 %v3494_v51  ;;  %v767_v4 = vadd.f32 %v3943_v30, %v632_v49  ;;  %v3464_v49 = vld [vmem:[%s3611_s27 + $0xf8] sm:$0xff]  }
  0xe3   : > { %v1536_v15 = vpop.f32.mrf.mxu1  ;;  %2912 = vmatmul.mubr.msk.bf16.gmra.mxu1 %vm979_vm0, %v960_v61  ;;  %2614 = vst [vmem:[%s4005_s13 + $0x8] sm:$0xff] %v3051_v9  ;;  %1464 = vmatprep.mubr.bf16.mxu0 %v3553_v2  ;;  %v3425_v61 = vunpack.c.h.bf16 %v3494_v51  ;;  %v570_v8 = vmul.f32 %v3928_v19, %v3296_v56  ;;  %v832_v18 = vmax.f32 %v704_v1, 0.0 }
  0xe4   : > { %2678 = vst [vmem:[%s4005_s13 + $0x208] sm:$0xff] %v3115_v10  ;;  %1784 = vmatprep.mubr.bf16.mxu1 %v3553_v2  ;;  %v1218_v20 = vpop.f32.mrf.mxu0  ;;  %v571_v9 = vmul.f32 %v3928_v19, %v3297_v57  ;;  %v634_v13 = vmul.f32 %v3928_v19, %v3424_v60  ;;  %v3304_v60 = vunpack.c.l.bf16 %v3464_v49 }
  0xe5   : > { %v1538_v21 = vpop.f32.mrf.mxu1  ;;  %v3052_v25 = vpack.c.bf16 %v1218_v20, %v1216_v14  ;;  %v635_v14 = vmul.f32 %v3928_v19, %v3425_v61  ;;  %v895_v20 = vmax.f32 %v767_v4, 0.0  ;;  %v705_v24 = vadd.f32 %v3943_v30, %v570_v8 }
  0xe6   : > { %v3116_v26 = vpack.c.bf16 %v1538_v21, %v1536_v15  ;;  %v1220_v29 = vpop.f32.mrf.mxu0  ;;  %v3463_v15 = vld [vmem:[%s3611_s27 + $0xf0] sm:$0xff]   ;;  %v896_v21 = vmax.f32 %v768_v5, 0.0  ;;  %v931_v35 = vpack.c.bf16 %v832_v18, %v831_v17 }
  0xe7   : > { %v1540_v31 = vpop.f32.mrf.mxu1  ;;  %2615 = vst [vmem:[%s4005_s13 + $0x10] sm:$0xff] %v3052_v25  ;;  %v706_v25 = vadd.f32 %v3943_v30, %v571_v9  ;;  %v3301_v27 = vunpack.c.h.bf16 %v3463_v15 }
  0xe8   : > { %2679 = vst [vmem:[%s4005_s13 + $0x210] sm:$0xff] %v3116_v26  ;;  %v1222_v36 = vpop.f32.mrf.mxu0  ;;  %v3300_v26 = vunpack.c.l.bf16 %v3463_v15 }
  0xe9   : > { %v1542_v37 = vpop.f32.mrf.mxu1  ;;  %v3053_v41 = vpack.c.bf16 %v1222_v36, %v1220_v29  ;;  %v963_v36 = vpack.c.bf16 %v896_v21, %v895_v20  ;;  %v573_v44 = vmul.f32 %v3928_v19, %v3301_v27 }
  0xea   : > { %v3117_v42 = vpack.c.bf16 %v1542_v37, %v1540_v31  ;;  %v1226_v45 = vpop.f32.mrf.mxu0  ;;  %2881 = vmatmul.mubr.msk.bf16.gmra.mxu0 %vm979_vm0, %v929_v22  ;;  %v3495_v22 = vld [vmem:[%s3611_s27 + $0x1f0] sm:$0xff]   ;;  %v769_v31 = vadd.f32 %v3943_v30, %v634_v13  ;;  %v572_v43 = vmul.f32 %v3928_v19, %v3300_v26  ;;  %v574_v13 = vmul.f32 %v3928_v19, %v3304_v60 }
  0xeb   : > { %v1546_v46 = vpop.f32.mrf.mxu1  ;;  %2913 = vmatmul.mubr.msk.bf16.gmra.mxu1 %vm979_vm0, %v961_v32  ;;  %2616 = vst [vmem:[%s4005_s13 + $0x18] sm:$0xff] %v3053_v41  ;;  %1474 = vmatprep.mubr.bf16.mxu0 %v3553_v2  ;;  %v770_v32 = vadd.f32 %v3943_v30, %v635_v14  ;;  %v3428_v37 = vunpack.c.l.bf16 %v3495_v22  ;;  %v3429_v38 = vunpack.c.h.bf16 %v3495_v22  ;;  %v833_v41 = vmax.f32 %v705_v24, 0.0 }
  0xec   : > { %2680 = vst [vmem:[%s4005_s13 + $0x218] sm:$0xff] %v3117_v42  ;;  %1794 = vmatprep.mubr.bf16.mxu1 %v3553_v2  ;;  %v1228_v52 = vpop.f32.mrf.mxu0  ;;  %v834_v42 = vmax.f32 %v706_v25, 0.0  ;;  %v897_v47 = vmax.f32 %v769_v31, 0.0 }
  0xed   : > { %v1548_v53 = vpop.f32.mrf.mxu1  ;;  %v3054_v58 = vpack.c.bf16 %v1228_v52, %v1226_v45  ;;  %v898_v48 = vmax.f32 %v770_v32, 0.0  ;;  %v636_v52 = vmul.f32 %v3928_v19, %v3428_v37 }
  0xee   : > { %v3118_v59 = vpack.c.bf16 %v1548_v53, %v1546_v46  ;;  %v1230_v62 = vpop.f32.mrf.mxu0  ;;  %v637_v53 = vmul.f32 %v3928_v19, %v3429_v38  ;;  %v932_v57 = vpack.c.bf16 %v834_v42, %v833_v41 }
  0xef   : > { %v1550_v63 = vpop.f32.mrf.mxu1  ;;  %2617 = vst [vmem:[%s4005_s13 + $0x20] sm:$0xff] %v3054_v58  ;;  %v707_v58 = vadd.f32 %v3943_v30, %v572_v43  ;;  %v771_v5 = vadd.f32 %v3943_v30, %v636_v52 }
  0xf0   : > { %2681 = vst [vmem:[%s4005_s13 + $0x220] sm:$0xff] %v3118_v59  ;;  %v1232_v6 = vpop.f32.mrf.mxu0  ;;  %v708_v59 = vadd.f32 %v3943_v30, %v573_v44 }
  0xf1   : > { %v1552_v7 = vpop.f32.mrf.mxu1  ;;  %v3055_v10 = vpack.c.bf16 %v1232_v6, %v1230_v62  ;;  %v772_v6 = vadd.f32 %v3943_v30, %v637_v53  ;;  %v899_v20 = vmax.f32 %v771_v5, 0.0 }
  0xf2   : > { %v3119_v11 = vpack.c.bf16 %v1552_v7, %v1550_v63  ;;  %v1236_v3 = vpop.f32.mrf.mxu0  ;;  %2882 = vmatmul.mubr.msk.bf16.gmra.mxu0 %vm979_vm0, %v930_v54  ;;  %v3496_v54 = vld [vmem:[%s3611_s27 + $0x1f8] sm:$0xff]   ;;  %v964_v63 = vpack.c.bf16 %v898_v48, %v897_v47 }
  0xf3   : > { %v1556_v16 = vpop.f32.mrf.mxu1  ;;  %2914 = vmatmul.mubr.msk.bf16.gmra.mxu1 %vm979_vm0, %v962_v0  ;;  %2618 = vst [vmem:[%s4005_s13 + $0x28] sm:$0xff] %v3055_v10  ;;  %1484 = vmatprep.mubr.bf16.mxu0 %v3553_v2  ;;  %v3305_v0 = vunpack.c.h.bf16 %v3464_v49  ;;  %v3432_v7 = vunpack.c.l.bf16 %v3496_v54  ;;  %v3433_v8 = vunpack.c.h.bf16 %v3496_v54  ;;  %v900_v21 = vmax.f32 %v772_v6, 0.0 }
  0xf4   : > { %2682 = vst [vmem:[%s4005_s13 + $0x228] sm:$0xff] %v3119_v11  ;;  %1804 = vmatprep.mubr.bf16.mxu1 %v3553_v2  ;;  %v1238_v23 = vpop.f32.mrf.mxu0  ;;  %v835_v11 = vmax.f32 %v707_v58, 0.0 }
  0xf5   : > { %v1558_v12 = vpop.f32.mrf.mxu1  ;;  %v3056_v28 = vpack.c.bf16 %v1238_v23, %v1236_v3  ;;  %v836_v3 = vmax.f32 %v708_v59, 0.0  ;;  %v638_v22 = vmul.f32 %v3928_v19, %v3432_v7  ;;  %v639_v23 = vmul.f32 %v3928_v19, %v3433_v8 }
  0xf6   : > { %v3120_v29 = vpack.c.bf16 %v1558_v12, %v1556_v16  ;;  %v1240_v33 = vpop.f32.mrf.mxu0  ;;  %v575_v16 = vmul.f32 %v3928_v19, %v3305_v0  ;;  %v965_v32 = vpack.c.bf16 %v900_v21, %v899_v20 }
  0xf7   : > { %v1560_v34 = vpop.f32.mrf.mxu1  ;;  %2619 = vst [vmem:[%s4005_s13 + $0x30] sm:$0xff] %v3056_v28  ;;  %v933_v27 = vpack.c.bf16 %v836_v3, %v835_v11  ;;  %v709_v28 = vadd.f32 %v3943_v30, %v574_v13 }
  0xf8   : > { %2683 = vst [vmem:[%s4005_s13 + $0x230] sm:$0xff] %v3120_v29  ;;  %v1242_v39 = vpop.f32.mrf.mxu0  ;;  %v710_v19 = vadd.f32 %v3943_v30, %v575_v16 }
  0xf9   : > { %v1562_v40 = vpop.f32.mrf.mxu1  ;;  %v3057_v45 = vpack.c.bf16 %v1242_v39, %v1240_v33  ;;  %v773_v33 = vadd.f32 %v3943_v30, %v638_v22  ;;  %v837_v41 = vmax.f32 %v709_v28, 0.0 }
  0xfa   : > { %v3121_v46 = vpack.c.bf16 %v1562_v40, %v1560_v34  ;;  %v1246_v50 = vpop.f32.mrf.mxu0  ;;  %2883 = vmatmul.mubr.msk.bf16.gmra.mxu0 %vm979_vm0, %v931_v35  ;;  %v774_v34 = vadd.f32 %v3943_v30, %v639_v23  ;;  %v838_v42 = vmax.f32 %v710_v19, 0.0 }
  0xfb   : > { %v1566_v51 = vpop.f32.mrf.mxu1  ;;  %2915 = vmatmul.mubr.msk.bf16.gmra.mxu1 %vm979_vm0, %v963_v36  ;;  %2620 = vst [vmem:[%s4005_s13 + $0x38] sm:$0xff] %v3057_v45  ;;  %1494 = vmatprep.mubr.bf16.mxu0 %v3553_v2  ;;  %v901_v43 = vmax.f32 %v773_v33, 0.0 }
  0xfc   : > { %2684 = vst [vmem:[%s4005_s13 + $0x238] sm:$0xff] %v3121_v46  ;;  %1814 = vmatprep.mubr.bf16.mxu1 %v3553_v2  ;;  %v1248_v55 = vpop.f32.mrf.mxu0  ;;  %v902_v44 = vmax.f32 %v774_v34, 0.0 }
  0xfd   : > { %v1568_v56 = vpop.f32.mrf.mxu1  ;;  %v3058_v61 = vpack.c.bf16 %v1248_v55, %v1246_v50  ;;  %v934_v50 = vpack.c.bf16 %v838_v42, %v837_v41 }
  0xfe   : > { %v3122_v62 = vpack.c.bf16 %v1568_v56, %v1566_v51  ;;  %v1250_v1 = vpop.f32.mrf.mxu0  ;;  %v966_v51 = vpack.c.bf16 %v902_v44, %v901_v43 }
  0xff   : > { %v1570_v4 = vpop.f32.mrf.mxu1  ;;  %2621 = vst [vmem:[%s4005_s13 + $0x40] sm:$0xff] %v3058_v61 }
 0x100   : > { %2685 = vst [vmem:[%s4005_s13 + $0x240] sm:$0xff] %v3122_v62  ;;  %v1252_v9 = vpop.f32.mrf.mxu0 }
 0x101   : > { %v1572_v10 = vpop.f32.mrf.mxu1  ;;  %v3059_v14 = vpack.c.bf16 %v1252_v9, %v1250_v1 }
 0x102   : > { %v3123_v15 = vpack.c.bf16 %v1572_v10, %v1570_v4  ;;  %v1256_v17 = vpop.f32.mrf.mxu0  ;;  %2884 = vmatmul.mubr.msk.bf16.gmra.mxu0 %vm979_vm0, %v932_v57 }
 0x103   : > { %v1576_v18 = vpop.f32.mrf.mxu1  ;;  %2916 = vmatmul.mubr.msk.bf16.gmra.mxu1 %vm979_vm0, %v964_v63  ;;  %2622 = vst [vmem:[%s4005_s13 + $0x48] sm:$0xff] %v3059_v14  ;;  %1504 = vmatprep.mubr.bf16.mxu0 %v3553_v2 }
 0x104   : > { %2686 = vst [vmem:[%s4005_s13 + $0x248] sm:$0xff] %v3123_v15  ;;  %1824 = vmatprep.mubr.bf16.mxu1 %v3553_v2  ;;  %v1258_v12 = vpop.f32.mrf.mxu0 }
 0x105   : > { %v1578_v24 = vpop.f32.mrf.mxu1  ;;  %v3060_v25 = vpack.c.bf16 %v1258_v12, %v1256_v17 }
 0x106   : > { %v3124_v26 = vpack.c.bf16 %v1578_v24, %v1576_v18  ;;  %v1260_v29 = vpop.f32.mrf.mxu0 }
 0x107   : > { %v1580_v31 = vpop.f32.mrf.mxu1  ;;  %2623 = vst [vmem:[%s4005_s13 + $0x50] sm:$0xff] %v3060_v25 }
 0x108   : > { %2687 = vst [vmem:[%s4005_s13 + $0x250] sm:$0xff] %v3124_v26  ;;  %v1262_v35 = vpop.f32.mrf.mxu0 }
 0x109   : > { %v1582_v36 = vpop.f32.mrf.mxu1  ;;  %v3061_v37 = vpack.c.bf16 %v1262_v35, %v1260_v29 }
 0x10a   : > { %v3125_v38 = vpack.c.bf16 %v1582_v36, %v1580_v31  ;;  %v1266_v39 = vpop.f32.mrf.mxu0  ;;  %2885 = vmatmul.mubr.msk.bf16.gmra.mxu0 %vm979_vm0, %v933_v27 }
 0x10b   : > { %v1586_v40 = vpop.f32.mrf.mxu1  ;;  %2917 = vmatmul.mubr.msk.bf16.gmra.mxu1 %vm979_vm0, %v965_v32  ;;  %2624 = vst [vmem:[%s4005_s13 + $0x58] sm:$0xff] %v3061_v37  ;;  %1514 = vmatprep.mubr.bf16.mxu0 %v3553_v2 }
 0x10c   : > { %2688 = vst [vmem:[%s4005_s13 + $0x258] sm:$0xff] %v3125_v38  ;;  %1834 = vmatprep.mubr.bf16.mxu1 %v3553_v2  ;;  %v1268_v30 = vpop.f32.mrf.mxu0 }
 0x10d   : > { %v1588_v45 = vpop.f32.mrf.mxu1  ;;  %v3062_v46 = vpack.c.bf16 %v1268_v30, %v1266_v39 }
 0x10e   : > { %v3126_v47 = vpack.c.bf16 %v1588_v45, %v1586_v40  ;;  %v1270_v48 = vpop.f32.mrf.mxu0 }
 0x10f   : > { %v1590_v49 = vpop.f32.mrf.mxu1  ;;  %2625 = vst [vmem:[%s4005_s13 + $0x60] sm:$0xff] %v3062_v46 }
 0x110   : > { %2689 = vst [vmem:[%s4005_s13 + $0x260] sm:$0xff] %v3126_v47  ;;  %v1272_v52 = vpop.f32.mrf.mxu0 }
 0x111   : > { %v1592_v53 = vpop.f32.mrf.mxu1  ;;  %v3063_v54 = vpack.c.bf16 %v1272_v52, %v1270_v48 }
 0x112   : > { %v3127_v55 = vpack.c.bf16 %v1592_v53, %v1590_v49  ;;  %v1276_v56 = vpop.f32.mrf.mxu0  ;;  %2886 = vmatmul.mubr.msk.bf16.gmra.mxu0 %vm979_vm0, %v934_v50 }
 0x113   : > { %v1596_v2 = vpop.f32.mrf.mxu1  ;;  %2918 = vmatmul.mubr.msk.bf16.gmra.mxu1 %vm979_vm0, %v966_v51  ;;  %2626 = vst [vmem:[%s4005_s13 + $0x68] sm:$0xff] %v3063_v54 }
 0x114   : > { %2690 = vst [vmem:[%s4005_s13 + $0x268] sm:$0xff] %v3127_v55  ;;  %v1278_v57 = vpop.f32.mrf.mxu0 }
 0x115   : > { %v1598_v58 = vpop.f32.mrf.mxu1  ;;  %v3064_v59 = vpack.c.bf16 %v1278_v57, %v1276_v56 }
 0x116   : > { %v3128_v60 = vpack.c.bf16 %v1598_v58, %v1596_v2  ;;  %v1280_v61 = vpop.f32.mrf.mxu0 }
 0x117   : > { %v1600_v62 = vpop.f32.mrf.mxu1  ;;  %2627 = vst [vmem:[%s4005_s13 + $0x70] sm:$0xff] %v3064_v59 }
 0x118   : > { %2691 = vst [vmem:[%s4005_s13 + $0x270] sm:$0xff] %v3128_v60  ;;  %v1282_v63 = vpop.f32.mrf.mxu0 }
 0x119   : > { %v1602_v0 = vpop.f32.mrf.mxu1  ;;  %v3065_v1 = vpack.c.bf16 %v1282_v63, %v1280_v61 }
 0x11a   : > { %v3129_v4 = vpack.c.bf16 %v1602_v0, %v1600_v62  ;;  %v1286_v5 = vpop.f32.mrf.mxu0 }
 0x11b   : > { %v1606_v6 = vpop.f32.mrf.mxu1  ;;  %2628 = vst [vmem:[%s4005_s13 + $0x78] sm:$0xff] %v3065_v1 }
 0x11c   : > { %2692 = vst [vmem:[%s4005_s13 + $0x278] sm:$0xff] %v3129_v4  ;;  %v1288_v7 = vpop.f32.mrf.mxu0 }
 0x11d   : > { %v1608_v8 = vpop.f32.mrf.mxu1  ;;  %v3066_v9 = vpack.c.bf16 %v1288_v7, %v1286_v5 }
 0x11e   : > { %v3130_v10 = vpack.c.bf16 %v1608_v8, %v1606_v6  ;;  %v1290_v11 = vpop.f32.mrf.mxu0 }
 0x11f   : > { %v1610_v13 = vpop.f32.mrf.mxu1  ;;  %2629 = vst [vmem:[%s4005_s13 + $0x80] sm:$0xff] %v3066_v9 }
 0x120   : > { %2693 = vst [vmem:[%s4005_s13 + $0x280] sm:$0xff] %v3130_v10  ;;  %v1292_v14 = vpop.f32.mrf.mxu0 }
 0x121   : > { %v1612_v15 = vpop.f32.mrf.mxu1  ;;  %v3067_v3 = vpack.c.bf16 %v1292_v14, %v1290_v11 }
 0x122   : > { %v3131_v16 = vpack.c.bf16 %v1612_v15, %v1610_v13  ;;  %v1296_v17 = vpop.f32.mrf.mxu0 }
 0x123   : > { %v1616_v18 = vpop.f32.mrf.mxu1  ;;  %2630 = vst [vmem:[%s4005_s13 + $0x88] sm:$0xff] %v3067_v3 }
 0x124   : > { %2694 = vst [vmem:[%s4005_s13 + $0x288] sm:$0xff] %v3131_v16  ;;  %v1298_v20 = vpop.f32.mrf.mxu0 }
 0x125   : > { %v1618_v21 = vpop.f32.mrf.mxu1  ;;  %v3068_v22 = vpack.c.bf16 %v1298_v20, %v1296_v17 }
 0x126   : > { %v3132_v23 = vpack.c.bf16 %v1618_v21, %v1616_v18  ;;  %v1300_v12 = vpop.f32.mrf.mxu0 }
 0x127   : > { %v1620_v24 = vpop.f32.mrf.mxu1  ;;  %2631 = vst [vmem:[%s4005_s13 + $0x90] sm:$0xff] %v3068_v22 }
 0x128   : > { %2695 = vst [vmem:[%s4005_s13 + $0x290] sm:$0xff] %v3132_v23  ;;  %v1302_v25 = vpop.f32.mrf.mxu0 }
 0x129   : > { %v1622_v26 = vpop.f32.mrf.mxu1  ;;  %v3069_v27 = vpack.c.bf16 %v1302_v25, %v1300_v12 }
 0x12a   : > { %v3133_v28 = vpack.c.bf16 %v1622_v26, %v1620_v24  ;;  %v1306_v29 = vpop.f32.mrf.mxu0 }
 0x12b   : > { %v1626_v31 = vpop.f32.mrf.mxu1  ;;  %2632 = vst [vmem:[%s4005_s13 + $0x98] sm:$0xff] %v3069_v27 }
 0x12c   : > { %2696 = vst [vmem:[%s4005_s13 + $0x298] sm:$0xff] %v3133_v28  ;;  %v1308_v32 = vpop.f32.mrf.mxu0 }
 0x12d   : > { %v1628_v19 = vpop.f32.mrf.mxu1  ;;  %v3070_v33 = vpack.c.bf16 %v1308_v32, %v1306_v29 }
 0x12e   : > { %v3134_v34 = vpack.c.bf16 %v1628_v19, %v1626_v31  ;;  %v1310_v35 = vpop.f32.mrf.mxu0 }
 0x12f   : > { %v1630_v36 = vpop.f32.mrf.mxu1  ;;  %2633 = vst [vmem:[%s4005_s13 + $0xa0] sm:$0xff] %v3070_v33 }
 0x130   : > { %2697 = vst [vmem:[%s4005_s13 + $0x2a0] sm:$0xff] %v3134_v34  ;;  %v1312_v37 = vpop.f32.mrf.mxu0 }
 0x131   : > { %v1632_v38 = vpop.f32.mrf.mxu1  ;;  %v3071_v39 = vpack.c.bf16 %v1312_v37, %v1310_v35 }
 0x132   : > { %v3135_v40 = vpack.c.bf16 %v1632_v38, %v1630_v36  ;;  %v1316_v41 = vpop.f32.mrf.mxu0 }
 0x133   : > { %v1636_v42 = vpop.f32.mrf.mxu1  ;;  %2634 = vst [vmem:[%s4005_s13 + $0xa8] sm:$0xff] %v3071_v39 }
 0x134   : > { %2698 = vst [vmem:[%s4005_s13 + $0x2a8] sm:$0xff] %v3135_v40  ;;  %v1318_v43 = vpop.f32.mrf.mxu0 }
 0x135   : > { %v1638_v44 = vpop.f32.mrf.mxu1  ;;  %v3072_v30 = vpack.c.bf16 %v1318_v43, %v1316_v41 }
 0x136   : > { %v3136_v45 = vpack.c.bf16 %v1638_v44, %v1636_v42  ;;  %v1320_v46 = vpop.f32.mrf.mxu0 }
 0x137   : > { %v1640_v47 = vpop.f32.mrf.mxu1  ;;  %2635 = vst [vmem:[%s4005_s13 + $0xb0] sm:$0xff] %v3072_v30 }
 0x138   : > { %2699 = vst [vmem:[%s4005_s13 + $0x2b0] sm:$0xff] %v3136_v45  ;;  %v1322_v48 = vpop.f32.mrf.mxu0 }
 0x139   : > { %v1642_v49 = vpop.f32.mrf.mxu1  ;;  %v3073_v50 = vpack.c.bf16 %v1322_v48, %v1320_v46 }
 0x13a   : > { %v3137_v51 = vpack.c.bf16 %v1642_v49, %v1640_v47  ;;  %v1326_v52 = vpop.f32.mrf.mxu0 }
 0x13b   : > { %v1646_v53 = vpop.f32.mrf.mxu1  ;;  %2636 = vst [vmem:[%s4005_s13 + $0xb8] sm:$0xff] %v3073_v50 }
 0x13c   : > { %2700 = vst [vmem:[%s4005_s13 + $0x2b8] sm:$0xff] %v3137_v51  ;;  %v1328_v54 = vpop.f32.mrf.mxu0 }
 0x13d   : > { %v1648_v55 = vpop.f32.mrf.mxu1  ;;  %v3074_v56 = vpack.c.bf16 %v1328_v54, %v1326_v52 }
 0x13e   : > { %v3138_v2 = vpack.c.bf16 %v1648_v55, %v1646_v53  ;;  %v1330_v57 = vpop.f32.mrf.mxu0 }
 0x13f   : > { %v1650_v58 = vpop.f32.mrf.mxu1  ;;  %2637 = vst [vmem:[%s4005_s13 + $0xc0] sm:$0xff] %v3074_v56 }
 0x140   : > { %2701 = vst [vmem:[%s4005_s13 + $0x2c0] sm:$0xff] %v3138_v2  ;;  %v1332_v59 = vpop.f32.mrf.mxu0 }
 0x141   : > { %v1652_v60 = vpop.f32.mrf.mxu1  ;;  %v3075_v61 = vpack.c.bf16 %v1332_v59, %v1330_v57 }
 0x142   : > { %v3139_v62 = vpack.c.bf16 %v1652_v60, %v1650_v58  ;;  %v1336_v63 = vpop.f32.mrf.mxu0 }
 0x143   : > { %v1656_v0 = vpop.f32.mrf.mxu1  ;;  %2638 = vst [vmem:[%s4005_s13 + $0xc8] sm:$0xff] %v3075_v61 }
 0x144   : > { %2702 = vst [vmem:[%s4005_s13 + $0x2c8] sm:$0xff] %v3139_v62  ;;  %v1338_v1 = vpop.f32.mrf.mxu0 }
 0x145   : > { %v1658_v4 = vpop.f32.mrf.mxu1  ;;  %v3076_v5 = vpack.c.bf16 %v1338_v1, %v1336_v63 }
 0x146   : > { %v3140_v6 = vpack.c.bf16 %v1658_v4, %v1656_v0  ;;  %v1340_v7 = vpop.f32.mrf.mxu0 }
 0x147   : > { %v1660_v8 = vpop.f32.mrf.mxu1  ;;  %2639 = vst [vmem:[%s4005_s13 + $0xd0] sm:$0xff] %v3076_v5 }
 0x148   : > { %2703 = vst [vmem:[%s4005_s13 + $0x2d0] sm:$0xff] %v3140_v6  ;;  %v1342_v9 = vpop.f32.mrf.mxu0 }
 0x149   : > { %v1662_v10 = vpop.f32.mrf.mxu1  ;;  %v3077_v11 = vpack.c.bf16 %v1342_v9, %v1340_v7 }
 0x14a   : > { %v3141_v13 = vpack.c.bf16 %v1662_v10, %v1660_v8  ;;  %v1346_v14 = vpop.f32.mrf.mxu0 }
 0x14b   : > { %v1666_v15 = vpop.f32.mrf.mxu1  ;;  %2640 = vst [vmem:[%s4005_s13 + $0xd8] sm:$0xff] %v3077_v11 }
 0x14c   : > { %2704 = vst [vmem:[%s4005_s13 + $0x2d8] sm:$0xff] %v3141_v13  ;;  %v1348_v3 = vpop.f32.mrf.mxu0 }
 0x14d   : > { %v1668_v16 = vpop.f32.mrf.mxu1  ;;  %v3078_v17 = vpack.c.bf16 %v1348_v3, %v1346_v14 }
 0x14e   : > { %v3142_v18 = vpack.c.bf16 %v1668_v16, %v1666_v15  ;;  %v1350_v20 = vpop.f32.mrf.mxu0 }
 0x14f   : > { %v1670_v21 = vpop.f32.mrf.mxu1  ;;  %2641 = vst [vmem:[%s4005_s13 + $0xe0] sm:$0xff] %v3078_v17 }
 0x150   : > { %2705 = vst [vmem:[%s4005_s13 + $0x2e0] sm:$0xff] %v3142_v18  ;;  %v1352_v22 = vpop.f32.mrf.mxu0 }
 0x151   : > { %v1672_v23 = vpop.f32.mrf.mxu1  ;;  %v3079_v12 = vpack.c.bf16 %v1352_v22, %v1350_v20 }
 0x152   : > { %v3143_v24 = vpack.c.bf16 %v1672_v23, %v1670_v21  ;;  %v1356_v25 = vpop.f32.mrf.mxu0 }
 0x153   : > { %v1676_v26 = vpop.f32.mrf.mxu1  ;;  %2642 = vst [vmem:[%s4005_s13 + $0xe8] sm:$0xff] %v3079_v12 }
 0x154   : > { %2706 = vst [vmem:[%s4005_s13 + $0x2e8] sm:$0xff] %v3143_v24  ;;  %v1358_v27 = vpop.f32.mrf.mxu0 }
 0x155   : > { %v1678_v28 = vpop.f32.mrf.mxu1  ;;  %v3080_v29 = vpack.c.bf16 %v1358_v27, %v1356_v25 }
 0x156   : > { %v3144_v31 = vpack.c.bf16 %v1678_v28, %v1676_v26  ;;  %v1360_v32 = vpop.f32.mrf.mxu0 }
 0x157   : > { %v1680_v19 = vpop.f32.mrf.mxu1  ;;  %2643 = vst [vmem:[%s4005_s13 + $0xf0] sm:$0xff] %v3080_v29 }
 0x158   : > { %2707 = vst [vmem:[%s4005_s13 + $0x2f0] sm:$0xff] %v3144_v31  ;;  %v1362_v33 = vpop.f32.mrf.mxu0 }
 0x159   : > { %v1682_v34 = vpop.f32.mrf.mxu1  ;;  %v3081_v35 = vpack.c.bf16 %v1362_v33, %v1360_v32 }
 0x15a   : > { %v3145_v36 = vpack.c.bf16 %v1682_v34, %v1680_v19  ;;  %v1366_v37 = vpop.f32.mrf.mxu0 }
 0x15b   : > { %v1686_v38 = vpop.f32.mrf.mxu1  ;;  %2644 = vst [vmem:[%s4005_s13 + $0xf8] sm:$0xff] %v3081_v35 }
 0x15c   : > { %2708 = vst [vmem:[%s4005_s13 + $0x2f8] sm:$0xff] %v3145_v36  ;;  %v1368_v39 = vpop.f32.mrf.mxu0 }
 0x15d   : > { %v1688_v40 = vpop.f32.mrf.mxu1  ;;  %v3082_v41 = vpack.c.bf16 %v1368_v39, %v1366_v37 }
 0x15e   : > { %v3146_v42 = vpack.c.bf16 %v1688_v40, %v1686_v38  ;;  %v1370_v43 = vpop.f32.mrf.mxu0 }
 0x15f   : > { %v1690_v44 = vpop.f32.mrf.mxu1  ;;  %2645 = vst [vmem:[%s4005_s13 + $0x100] sm:$0xff] %v3082_v41 }
 0x160   : > { %2709 = vst [vmem:[%s4005_s13 + $0x300] sm:$0xff] %v3146_v42  ;;  %v1372_v30 = vpop.f32.mrf.mxu0 }
 0x161   : > { %v1692_v45 = vpop.f32.mrf.mxu1  ;;  %v3083_v46 = vpack.c.bf16 %v1372_v30, %v1370_v43 }
 0x162   : > { %v3147_v47 = vpack.c.bf16 %v1692_v45, %v1690_v44  ;;  %v1376_v48 = vpop.f32.mrf.mxu0 }
 0x163   : > { %v1696_v49 = vpop.f32.mrf.mxu1  ;;  %2646 = vst [vmem:[%s4005_s13 + $0x108] sm:$0xff] %v3083_v46 }
 0x164   : > { %2710 = vst [vmem:[%s4005_s13 + $0x308] sm:$0xff] %v3147_v47  ;;  %v1378_v50 = vpop.f32.mrf.mxu0 }
 0x165   : > { %v1698_v51 = vpop.f32.mrf.mxu1  ;;  %v3084_v52 = vpack.c.bf16 %v1378_v50, %v1376_v48 }
 0x166   : > { %v3148_v53 = vpack.c.bf16 %v1698_v51, %v1696_v49  ;;  %v1380_v54 = vpop.f32.mrf.mxu0 }
 0x167   : > { %v1700_v55 = vpop.f32.mrf.mxu1  ;;  %2647 = vst [vmem:[%s4005_s13 + $0x110] sm:$0xff] %v3084_v52 }
 0x168   : > { %2711 = vst [vmem:[%s4005_s13 + $0x310] sm:$0xff] %v3148_v53  ;;  %v1382_v56 = vpop.f32.mrf.mxu0 }
 0x169   : > { %v1702_v2 = vpop.f32.mrf.mxu1  ;;  %v3085_v57 = vpack.c.bf16 %v1382_v56, %v1380_v54 }
 0x16a   : > { %v3149_v58 = vpack.c.bf16 %v1702_v2, %v1700_v55  ;;  %v1386_v59 = vpop.f32.mrf.mxu0 }
 0x16b   : > { %v1706_v60 = vpop.f32.mrf.mxu1  ;;  %2648 = vst [vmem:[%s4005_s13 + $0x118] sm:$0xff] %v3085_v57 }
 0x16c   : > { %2712 = vst [vmem:[%s4005_s13 + $0x318] sm:$0xff] %v3149_v58  ;;  %v1388_v61 = vpop.f32.mrf.mxu0 }
 0x16d   : > { %v1708_v62 = vpop.f32.mrf.mxu1  ;;  %v3086_v63 = vpack.c.bf16 %v1388_v61, %v1386_v59 }
 0x16e   : > { %v3150_v0 = vpack.c.bf16 %v1708_v62, %v1706_v60  ;;  %v1390_v1 = vpop.f32.mrf.mxu0 }
 0x16f   : > { %v1710_v4 = vpop.f32.mrf.mxu1  ;;  %2649 = vst [vmem:[%s4005_s13 + $0x120] sm:$0xff] %v3086_v63 }
 0x170   : > { %2713 = vst [vmem:[%s4005_s13 + $0x320] sm:$0xff] %v3150_v0  ;;  %v1392_v5 = vpop.f32.mrf.mxu0 }
 0x171   : > { %v1712_v6 = vpop.f32.mrf.mxu1  ;;  %v3087_v7 = vpack.c.bf16 %v1392_v5, %v1390_v1 }
 0x172   : > { %v3151_v8 = vpack.c.bf16 %v1712_v6, %v1710_v4  ;;  %v1396_v9 = vpop.f32.mrf.mxu0 }
 0x173   : > { %v1716_v10 = vpop.f32.mrf.mxu1  ;;  %2650 = vst [vmem:[%s4005_s13 + $0x128] sm:$0xff] %v3087_v7 }
 0x174   : > { %2714 = vst [vmem:[%s4005_s13 + $0x328] sm:$0xff] %v3151_v8  ;;  %v1398_v11 = vpop.f32.mrf.mxu0 }
 0x175   : > { %v1718_v13 = vpop.f32.mrf.mxu1  ;;  %v3088_v14 = vpack.c.bf16 %v1398_v11, %v1396_v9 }
 0x176   : > { %v3152_v15 = vpack.c.bf16 %v1718_v13, %v1716_v10  ;;  %v1400_v3 = vpop.f32.mrf.mxu0 }
 0x177   : > { %v1720_v16 = vpop.f32.mrf.mxu1  ;;  %2651 = vst [vmem:[%s4005_s13 + $0x130] sm:$0xff] %v3088_v14 }
 0x178   : > { %2715 = vst [vmem:[%s4005_s13 + $0x330] sm:$0xff] %v3152_v15  ;;  %v1402_v17 = vpop.f32.mrf.mxu0 }
 0x179   : > { %v1722_v18 = vpop.f32.mrf.mxu1  ;;  %v3089_v20 = vpack.c.bf16 %v1402_v17, %v1400_v3 }
 0x17a   : > { %v3153_v21 = vpack.c.bf16 %v1722_v18, %v1720_v16  ;;  %v1406_v22 = vpop.f32.mrf.mxu0 }
 0x17b   : > { %v1726_v23 = vpop.f32.mrf.mxu1  ;;  %2652 = vst [vmem:[%s4005_s13 + $0x138] sm:$0xff] %v3089_v20 }
 0x17c   : > { %2716 = vst [vmem:[%s4005_s13 + $0x338] sm:$0xff] %v3153_v21  ;;  %v1408_v12 = vpop.f32.mrf.mxu0 }
 0x17d   : > { %v1728_v24 = vpop.f32.mrf.mxu1  ;;  %v3090_v25 = vpack.c.bf16 %v1408_v12, %v1406_v22 }
 0x17e   : > { %v3154_v26 = vpack.c.bf16 %v1728_v24, %v1726_v23  ;;  %v1410_v27 = vpop.f32.mrf.mxu0 }
 0x17f   : > { %v1730_v28 = vpop.f32.mrf.mxu1  ;;  %2653 = vst [vmem:[%s4005_s13 + $0x140] sm:$0xff] %v3090_v25 }
 0x180   : > { %2717 = vst [vmem:[%s4005_s13 + $0x340] sm:$0xff] %v3154_v26  ;;  %v1412_v29 = vpop.f32.mrf.mxu0 }
 0x181   : > { %v1732_v31 = vpop.f32.mrf.mxu1  ;;  %v3091_v32 = vpack.c.bf16 %v1412_v29, %v1410_v27 }
 0x182   : > { %v3155_v19 = vpack.c.bf16 %v1732_v31, %v1730_v28  ;;  %v1416_v33 = vpop.f32.mrf.mxu0 }
 0x183   : > { %v1736_v34 = vpop.f32.mrf.mxu1  ;;  %2654 = vst [vmem:[%s4005_s13 + $0x148] sm:$0xff] %v3091_v32 }
 0x184   : > { %2718 = vst [vmem:[%s4005_s13 + $0x348] sm:$0xff] %v3155_v19  ;;  %v1418_v35 = vpop.f32.mrf.mxu0 }
 0x185   : > { %v1738_v36 = vpop.f32.mrf.mxu1  ;;  %v3092_v37 = vpack.c.bf16 %v1418_v35, %v1416_v33 }
 0x186   : > { %v3156_v38 = vpack.c.bf16 %v1738_v36, %v1736_v34  ;;  %v1420_v39 = vpop.f32.mrf.mxu0 }
 0x187   : > { %v1740_v40 = vpop.f32.mrf.mxu1  ;;  %2655 = vst [vmem:[%s4005_s13 + $0x150] sm:$0xff] %v3092_v37 }
 0x188   : > { %2719 = vst [vmem:[%s4005_s13 + $0x350] sm:$0xff] %v3156_v38  ;;  %v1422_v41 = vpop.f32.mrf.mxu0 }
 0x189   : > { %v1742_v42 = vpop.f32.mrf.mxu1  ;;  %v3093_v43 = vpack.c.bf16 %v1422_v41, %v1420_v39 }
 0x18a   : > { %v3157_v44 = vpack.c.bf16 %v1742_v42, %v1740_v40  ;;  %v1426_v30 = vpop.f32.mrf.mxu0 }
 0x18b   : > { %v1746_v45 = vpop.f32.mrf.mxu1  ;;  %2656 = vst [vmem:[%s4005_s13 + $0x158] sm:$0xff] %v3093_v43 }
 0x18c   : > { %2720 = vst [vmem:[%s4005_s13 + $0x358] sm:$0xff] %v3157_v44  ;;  %v1428_v46 = vpop.f32.mrf.mxu0 }
 0x18d   : > { %v1748_v47 = vpop.f32.mrf.mxu1  ;;  %v3094_v48 = vpack.c.bf16 %v1428_v46, %v1426_v30 }
 0x18e   : > { %v3158_v49 = vpack.c.bf16 %v1748_v47, %v1746_v45  ;;  %v1430_v50 = vpop.f32.mrf.mxu0 }
 0x18f   : > { %v1750_v51 = vpop.f32.mrf.mxu1  ;;  %2657 = vst [vmem:[%s4005_s13 + $0x160] sm:$0xff] %v3094_v48 }
 0x190   : > { %2721 = vst [vmem:[%s4005_s13 + $0x360] sm:$0xff] %v3158_v49  ;;  %v1432_v52 = vpop.f32.mrf.mxu0 }
 0x191   : > { %v1752_v53 = vpop.f32.mrf.mxu1  ;;  %v3095_v54 = vpack.c.bf16 %v1432_v52, %v1430_v50 }
 0x192   : > { %v3159_v55 = vpack.c.bf16 %v1752_v53, %v1750_v51  ;;  %v1436_v56 = vpop.f32.mrf.mxu0 }
 0x193   : > { %v1756_v2 = vpop.f32.mrf.mxu1  ;;  %2658 = vst [vmem:[%s4005_s13 + $0x168] sm:$0xff] %v3095_v54 }
 0x194   : > { %2722 = vst [vmem:[%s4005_s13 + $0x368] sm:$0xff] %v3159_v55  ;;  %v1438_v57 = vpop.f32.mrf.mxu0 }
 0x195   : > { %v1758_v58 = vpop.f32.mrf.mxu1  ;;  %v3096_v59 = vpack.c.bf16 %v1438_v57, %v1436_v56 }
 0x196   : > { %v3160_v60 = vpack.c.bf16 %v1758_v58, %v1756_v2  ;;  %v1440_v61 = vpop.f32.mrf.mxu0 }
 0x197   : > { %v1760_v62 = vpop.f32.mrf.mxu1  ;;  %2659 = vst [vmem:[%s4005_s13 + $0x170] sm:$0xff] %v3096_v59 }
 0x198   : > { %2723 = vst [vmem:[%s4005_s13 + $0x370] sm:$0xff] %v3160_v60  ;;  %v1442_v63 = vpop.f32.mrf.mxu0 }
 0x199   : > { %v1762_v0 = vpop.f32.mrf.mxu1  ;;  %v3097_v1 = vpack.c.bf16 %v1442_v63, %v1440_v61 }
 0x19a   : > { %v3161_v4 = vpack.c.bf16 %v1762_v0, %v1760_v62  ;;  %v1446_v5 = vpop.f32.mrf.mxu0 }
 0x19b   : > { %v1766_v6 = vpop.f32.mrf.mxu1  ;;  %2660 = vst [vmem:[%s4005_s13 + $0x178] sm:$0xff] %v3097_v1 }
 0x19c   : > { %2724 = vst [vmem:[%s4005_s13 + $0x378] sm:$0xff] %v3161_v4  ;;  %v1448_v7 = vpop.f32.mrf.mxu0 }
 0x19d   : > { %v1768_v8 = vpop.f32.mrf.mxu1  ;;  %v3098_v9 = vpack.c.bf16 %v1448_v7, %v1446_v5 }
 0x19e   : > { %v3162_v10 = vpack.c.bf16 %v1768_v8, %v1766_v6  ;;  %v1450_v11 = vpop.f32.mrf.mxu0 }
 0x19f   : > { %v1770_v13 = vpop.f32.mrf.mxu1  ;;  %2661 = vst [vmem:[%s4005_s13 + $0x180] sm:$0xff] %v3098_v9 }
 0x1a0   : > { %2725 = vst [vmem:[%s4005_s13 + $0x380] sm:$0xff] %v3162_v10  ;;  %v1452_v14 = vpop.f32.mrf.mxu0 }
 0x1a1   : > { %v1772_v15 = vpop.f32.mrf.mxu1  ;;  %v3099_v3 = vpack.c.bf16 %v1452_v14, %v1450_v11 }
 0x1a2   : > { %v3163_v16 = vpack.c.bf16 %v1772_v15, %v1770_v13  ;;  %v1456_v17 = vpop.f32.mrf.mxu0 }
 0x1a3   : > { %v1776_v18 = vpop.f32.mrf.mxu1  ;;  %2662 = vst [vmem:[%s4005_s13 + $0x188] sm:$0xff] %v3099_v3 }
 0x1a4   : > { %2726 = vst [vmem:[%s4005_s13 + $0x388] sm:$0xff] %v3163_v16  ;;  %v1458_v20 = vpop.f32.mrf.mxu0 }
 0x1a5   : > { %v1778_v21 = vpop.f32.mrf.mxu1  ;;  %v3100_v22 = vpack.c.bf16 %v1458_v20, %v1456_v17 }
 0x1a6   : > { %v3164_v23 = vpack.c.bf16 %v1778_v21, %v1776_v18  ;;  %v1460_v12 = vpop.f32.mrf.mxu0 }
 0x1a7   : > { %v1780_v24 = vpop.f32.mrf.mxu1  ;;  %2663 = vst [vmem:[%s4005_s13 + $0x190] sm:$0xff] %v3100_v22 }
 0x1a8   : > { %2727 = vst [vmem:[%s4005_s13 + $0x390] sm:$0xff] %v3164_v23  ;;  %v1462_v25 = vpop.f32.mrf.mxu0 }
 0x1a9   : > { %v1782_v26 = vpop.f32.mrf.mxu1  ;;  %v3101_v27 = vpack.c.bf16 %v1462_v25, %v1460_v12 }
 0x1aa   : > { %v3165_v28 = vpack.c.bf16 %v1782_v26, %v1780_v24  ;;  %v1466_v29 = vpop.f32.mrf.mxu0 }
 0x1ab   : > { %v1786_v31 = vpop.f32.mrf.mxu1  ;;  %2664 = vst [vmem:[%s4005_s13 + $0x198] sm:$0xff] %v3101_v27 }
 0x1ac   : > { %2728 = vst [vmem:[%s4005_s13 + $0x398] sm:$0xff] %v3165_v28  ;;  %v1468_v32 = vpop.f32.mrf.mxu0 }
 0x1ad   : > { %v1788_v19 = vpop.f32.mrf.mxu1  ;;  %v3102_v33 = vpack.c.bf16 %v1468_v32, %v1466_v29 }
 0x1ae   : > { %v3166_v34 = vpack.c.bf16 %v1788_v19, %v1786_v31  ;;  %v1470_v35 = vpop.f32.mrf.mxu0 }
 0x1af   : > { %v1790_v36 = vpop.f32.mrf.mxu1  ;;  %2665 = vst [vmem:[%s4005_s13 + $0x1a0] sm:$0xff] %v3102_v33 }
 0x1b0   : > { %2729 = vst [vmem:[%s4005_s13 + $0x3a0] sm:$0xff] %v3166_v34  ;;  %v1472_v37 = vpop.f32.mrf.mxu0 }
 0x1b1   : > { %v1792_v38 = vpop.f32.mrf.mxu1  ;;  %v3103_v39 = vpack.c.bf16 %v1472_v37, %v1470_v35 }
 0x1b2   : > { %v3167_v40 = vpack.c.bf16 %v1792_v38, %v1790_v36  ;;  %v1476_v41 = vpop.f32.mrf.mxu0 }
 0x1b3   : > { %v1796_v42 = vpop.f32.mrf.mxu1  ;;  %2666 = vst [vmem:[%s4005_s13 + $0x1a8] sm:$0xff] %v3103_v39 }
 0x1b4   : > { %2730 = vst [vmem:[%s4005_s13 + $0x3a8] sm:$0xff] %v3167_v40  ;;  %v1478_v43 = vpop.f32.mrf.mxu0 }
 0x1b5   : > { %v1798_v44 = vpop.f32.mrf.mxu1  ;;  %v3104_v30 = vpack.c.bf16 %v1478_v43, %v1476_v41 }
 0x1b6   : > { %v3168_v45 = vpack.c.bf16 %v1798_v44, %v1796_v42  ;;  %v1480_v46 = vpop.f32.mrf.mxu0 }
 0x1b7   : > { %v1800_v47 = vpop.f32.mrf.mxu1  ;;  %2667 = vst [vmem:[%s4005_s13 + $0x1b0] sm:$0xff] %v3104_v30 }
 0x1b8   : > { %2731 = vst [vmem:[%s4005_s13 + $0x3b0] sm:$0xff] %v3168_v45  ;;  %v1482_v48 = vpop.f32.mrf.mxu0 }
 0x1b9   : > { %v1802_v49 = vpop.f32.mrf.mxu1  ;;  %v3105_v50 = vpack.c.bf16 %v1482_v48, %v1480_v46 }
 0x1ba   : > { %v3169_v51 = vpack.c.bf16 %v1802_v49, %v1800_v47  ;;  %v1486_v52 = vpop.f32.mrf.mxu0 }
 0x1bb   : > { %v1806_v53 = vpop.f32.mrf.mxu1  ;;  %2668 = vst [vmem:[%s4005_s13 + $0x1b8] sm:$0xff] %v3105_v50 }
 0x1bc   : > { %2732 = vst [vmem:[%s4005_s13 + $0x3b8] sm:$0xff] %v3169_v51  ;;  %v1488_v54 = vpop.f32.mrf.mxu0 }
 0x1bd   : > { %v1808_v55 = vpop.f32.mrf.mxu1  ;;  %v3106_v56 = vpack.c.bf16 %v1488_v54, %v1486_v52 }
 0x1be   : > { %v3170_v2 = vpack.c.bf16 %v1808_v55, %v1806_v53  ;;  %v1490_v57 = vpop.f32.mrf.mxu0 }
 0x1bf   : > { %v1810_v58 = vpop.f32.mrf.mxu1  ;;  %2669 = vst [vmem:[%s4005_s13 + $0x1c0] sm:$0xff] %v3106_v56 }
 0x1c0   : > { %2733 = vst [vmem:[%s4005_s13 + $0x3c0] sm:$0xff] %v3170_v2  ;;  %v1492_v59 = vpop.f32.mrf.mxu0 }
 0x1c1   : > { %v1812_v60 = vpop.f32.mrf.mxu1  ;;  %v3107_v61 = vpack.c.bf16 %v1492_v59, %v1490_v57 }
 0x1c2   : > { %v3171_v62 = vpack.c.bf16 %v1812_v60, %v1810_v58  ;;  %v1496_v63 = vpop.f32.mrf.mxu0 }
 0x1c3   : > { %v1816_v0 = vpop.f32.mrf.mxu1  ;;  %2670 = vst [vmem:[%s4005_s13 + $0x1c8] sm:$0xff] %v3107_v61 }
 0x1c4   : > { %2734 = vst [vmem:[%s4005_s13 + $0x3c8] sm:$0xff] %v3171_v62  ;;  %v1498_v1 = vpop.f32.mrf.mxu0 }
 0x1c5   : > { %v1818_v4 = vpop.f32.mrf.mxu1  ;;  %v3108_v5 = vpack.c.bf16 %v1498_v1, %v1496_v63 }
 0x1c6   : > { %v3172_v6 = vpack.c.bf16 %v1818_v4, %v1816_v0  ;;  %v1500_v7 = vpop.f32.mrf.mxu0 }
 0x1c7   : > { %v1820_v8 = vpop.f32.mrf.mxu1  ;;  %2671 = vst [vmem:[%s4005_s13 + $0x1d0] sm:$0xff] %v3108_v5 }
 0x1c8   : > { %2735 = vst [vmem:[%s4005_s13 + $0x3d0] sm:$0xff] %v3172_v6  ;;  %v1502_v9 = vpop.f32.mrf.mxu0 }
 0x1c9   : > { %v1822_v10 = vpop.f32.mrf.mxu1  ;;  %v3109_v11 = vpack.c.bf16 %v1502_v9, %v1500_v7 }
 0x1ca   : > { %v3173_v13 = vpack.c.bf16 %v1822_v10, %v1820_v8  ;;  %v1506_v14 = vpop.f32.mrf.mxu0 }
 0x1cb   : > { %v1826_v15 = vpop.f32.mrf.mxu1  ;;  %2672 = vst [vmem:[%s4005_s13 + $0x1d8] sm:$0xff] %v3109_v11 }
 0x1cc   : > { %2736 = vst [vmem:[%s4005_s13 + $0x3d8] sm:$0xff] %v3173_v13  ;;  %v1508_v3 = vpop.f32.mrf.mxu0 }
 0x1cd   : > { %v1828_v16 = vpop.f32.mrf.mxu1  ;;  %v3110_v17 = vpack.c.bf16 %v1508_v3, %v1506_v14 }
 0x1ce   : > { %v3174_v18 = vpack.c.bf16 %v1828_v16, %v1826_v15  ;;  %v1510_v20 = vpop.f32.mrf.mxu0 }
 0x1cf   : > { %v1830_v21 = vpop.f32.mrf.mxu1  ;;  %2673 = vst [vmem:[%s4005_s13 + $0x1e0] sm:$0xff] %v3110_v17 }
 0x1d0   : > { %2737 = vst [vmem:[%s4005_s13 + $0x3e0] sm:$0xff] %v3174_v18  ;;  %v1512_v22 = vpop.f32.mrf.mxu0 }
 0x1d1   : > { %v1832_v23 = vpop.f32.mrf.mxu1  ;;  %v3111_v12 = vpack.c.bf16 %v1512_v22, %v1510_v20 }
 0x1d2   : > { %v3175_v24 = vpack.c.bf16 %v1832_v23, %v1830_v21  ;;  %v1516_v25 = vpop.f32.mrf.mxu0 }
 0x1d3   : > { %v1836_v26 = vpop.f32.mrf.mxu1  ;;  %2674 = vst [vmem:[%s4005_s13 + $0x1e8] sm:$0xff] %v3111_v12 }
 0x1d4   : > { %2738 = vst [vmem:[%s4005_s13 + $0x3e8] sm:$0xff] %v3175_v24  ;;  %v1518_v27 = vpop.f32.mrf.mxu0 }
 0x1d5   : > { %v1838_v28 = vpop.f32.mrf.mxu1  ;;  %v3112_v29 = vpack.c.bf16 %v1518_v27, %v1516_v25 }
 0x1d6   : > { %v3176_v31 = vpack.c.bf16 %v1838_v28, %v1836_v26  ;;  %v1520_v32 = vpop.f32.mrf.mxu0 }
 0x1d7   : > { %v1840_v19 = vpop.f32.mrf.mxu1  ;;  %2675 = vst [vmem:[%s4005_s13 + $0x1f0] sm:$0xff] %v3112_v29 }
 0x1d8   : > { %2739 = vst [vmem:[%s4005_s13 + $0x3f0] sm:$0xff] %v3176_v31  ;;  %v1522_v33 = vpop.f32.mrf.mxu0 }
 0x1d9   : > { %v1842_v34 = vpop.f32.mrf.mxu1  ;;  %v3113_v35 = vpack.c.bf16 %v1522_v33, %v1520_v32 }
 0x1da   : > { %v3177_v36 = vpack.c.bf16 %v1842_v34, %v1840_v19 }
 0x1db   : > { %2676 = vst [vmem:[%s4005_s13 + $0x1f8] sm:$0xff] %v3113_v35 }
 0x1dc   : > { %2740 = vst [vmem:[%s4005_s13 + $0x3f8] sm:$0xff] %v3177_v36 }
 0x1dd PF: > { %s14_s17 = sadd.s32 1, %s3551_s17   ;;  %s4227_s15 = smov %s3547_s16 }
 0x1de   : > { %p11_p5 = scmp.ge.s32.totalorder %s14_s17, 4   ;;  %s4228_s16 = smov %s4230_s18 }
 0x1e0   :  { %13 = sbr.rel (!%p11_p5) target bundleno = 2 (0x2), region = 69 }

</bundles_post_ra>
